<compile_context>
chip_gen: v6e
topology: v6e:2x2x1
jax: 0.10.0
libtpu: 0.0.40
codegen_flags: <defaults>
</compile_context>

<pallas_src>
import math
import numpy as np
import jax
import jax.numpy as jnp
from jax.experimental import pallas as pl
from jax.experimental.pallas import tpu as pltpu

# ----- model hyperparameters (small, consistent with the module's forward) -----
B, S, D = 2, 8, 32          # batch, src_len, model_dim
H = 4                       # head_count
DK = D // H                 # head size
FF = 64                     # ff_dim
L = 2                       # num_layers
EPS = 1e-5                  # PyTorch nn.LayerNorm default eps
NEG_INF = -1e30
USE_APPROX_RECIP = True     # exact-divide fallback if tolerances ever tighten

# ----- row offsets inside the packed [*, D] parameter blob (all static) -----
WO_OFF = 0                  # Wo rows: (l, h) at WO_OFF + l*D + h*DK, DK rows each
W2_OFF = WO_OFF + L * D     # W2 rows: layer l at W2_OFF + l*FF, FF rows each
PE_OFF = W2_OFF + L * FF    # sinusoidal PE, S rows (192 -> 8-aligned)
VEC_OFF = PE_OFF + S        # single-row vectors below
LN1W = VEC_OFF + 0 * L
LN1B = VEC_OFF + 1 * L
LN2W = VEC_OFF + 2 * L
LN2B = VEC_OFF + 3 * L
BO   = VEC_OFF + 4 * L
B2   = VEC_OFF + 5 * L
LNFW = VEC_OFF + 6 * L
LNFB = LNFW + 1
DBLOB_ROWS = LNFB + 1       # 214


def _layer_norm(x, w, b):
    mu = jnp.mean(x, axis=-1, keepdims=True)
    var = jnp.mean((x - mu) ** 2, axis=-1, keepdims=True)
    return (x - mu) * jax.lax.rsqrt(var + EPS) * w + b


def encoder_kernel(x_ref, mask_ref, qkvwb_ref, w1b1_ref, dblob_ref, out_ref):
    def row(i):                                   # [1, D] vector from the blob
        return dblob_ref[i:i + 1, :]

    # positional encoding + fold the batch dim into the matmul M dim: [B*S, D]
    pe = dblob_ref[PE_OFF:PE_OFF + S, :]                              # [S, D]
    x = (x_ref[...].astype(jnp.float32) + pe[None, :, :]).reshape(B * S, D)

    # additive key-padding bias, built + broadcast ONCE, reused for all L*H heads
    bias = jnp.where(mask_ref[...] > 0, 0.0, NEG_INF).astype(jnp.float32)  # [B,1,S]
    bias = jnp.broadcast_to(bias, (B, S, S))

    for l in range(L):                            # static unroll over layers
        # ---------------- self-attention sublayer (pre-LN) ----------------
        xn = _layer_norm(x, row(LN1W + l), row(LN1B + l))             # [BS, D]

        attn = jnp.zeros((B * S, D), jnp.float32)
        for h in range(H):                        # static unroll over heads
            base = l * H + h
            wq = qkvwb_ref[0 * L * H + base]      # [D+1, DK]; row D = bias
            wk = qkvwb_ref[1 * L * H + base]
            wv = qkvwb_ref[2 * L * H + base]

            qh = jnp.dot(xn, wq[:D], preferred_element_type=jnp.float32) + wq[D:]
            kh = jnp.dot(xn, wk[:D], preferred_element_type=jnp.float32) + wk[D:]
            vh = jnp.dot(xn, wv[:D], preferred_element_type=jnp.float32) + wv[D:]

            # only scores / probs@V need per-batch [S,S] pieces (sublane-aligned)
            q3 = qh.reshape(B, S, DK)
            k3 = kh.reshape(B, S, DK)
            v3 = vh.reshape(B, S, DK)
            s = jnp.einsum('bqd,bkd->bqk', q3, k3,
                           preferred_element_type=jnp.float32) + bias   # scale folded in Wq

            m = jnp.max(s, axis=-1, keepdims=True)
            e = jnp.exp(s - m)
            denom = jnp.sum(e, axis=-1, keepdims=True)
            if USE_APPROX_RECIP:
                p = e * pl.reciprocal(denom, approx=True)
            else:
                p = e / denom

            ctx = jnp.einsum('bqk,bkd->bqd', p, v3,
                             preferred_element_type=jnp.float32)
            wo = dblob_ref[WO_OFF + l * D + h * DK:
                           WO_OFF + l * D + h * DK + DK, :]             # [DK, D]
            attn = attn + jnp.dot(ctx.reshape(B * S, DK), wo,
                                  preferred_element_type=jnp.float32)

        x = x + attn + row(BO + l)                # dropout = identity (eval mode)

        # ---------------- feed-forward sublayer (pre-LN) ----------------
        xn2 = _layer_norm(x, row(LN2W + l), row(LN2B + l))
        w1b = w1b1_ref[l]                                              # [D+1, FF]
        hdn = jnp.dot(xn2, w1b[:D], preferred_element_type=jnp.float32) + w1b[D:]
        hdn = jnp.maximum(hdn, 0.0)               # ReLU
        w2 = dblob_ref[W2_OFF + l * FF: W2_OFF + (l + 1) * FF, :]      # [FF, D]
        x = x + jnp.dot(hdn, w2, preferred_element_type=jnp.float32) + row(B2 + l)

    # final LayerNorm of the pre-LN encoder; the only output write.
    y = _layer_norm(x, row(LNFW), row(LNFB))
    out_ref[...] = y.reshape(B, S, D).astype(out_ref.dtype)


def sinusoidal_pe(seq_len, dim):
    pos = np.arange(seq_len, dtype=np.float32)[:, None]
    div = np.exp(np.arange(0, dim, 2, dtype=np.float32) * -(math.log(10000.0) / dim))
    pe = np.zeros((seq_len, dim), dtype=np.float32)
    pe[:, 0::2] = np.sin(pos * div)
    pe[:, 1::2] = np.cos(pos * div)
    return jnp.asarray(pe)


def prepare_params(p):
    """One-time host-side packing of all parameters into 3 VMEM blobs."""
    scale = 1.0 / math.sqrt(DK)

    def split_heads(w):   # [L, D, D] -> [L, H, D, DK]  (columns grouped head-major)
        return jnp.transpose(w.reshape(L, D, H, DK), (0, 2, 1, 3))

    def split_bias(b):    # [L, 1, D] -> [L, H, 1, DK]
        return jnp.transpose(b.reshape(L, 1, H, DK), (0, 2, 1, 3))

    wq = split_heads(p['Wq']) * scale             # fold 1/sqrt(DK) into Wq / bq
    wk = split_heads(p['Wk'])
    wv = split_heads(p['Wv'])
    bq = split_bias(p['bq']) * scale
    bk = split_bias(p['bk'])
    bv = split_bias(p['bv'])

    w3 = jnp.stack([wq, wk, wv], axis=0)          # [3, L, H, D,  DK]
    b3 = jnp.stack([bq, bk, bv], axis=0)          # [3, L, H, 1,  DK]
    qkvwb = jnp.concatenate([w3, b3], axis=3)     # [3, L, H, D+1, DK]
    qkvwb = qkvwb.reshape(3 * L * H, D + 1, DK)

    w1b1 = jnp.concatenate([p['W1'], p['b1']], axis=1)    # [L, D+1, FF]

    wo_rows = p['Wo'].reshape(L * D, D)           # head-major rows per layer
    w2_rows = p['W2'].reshape(L * FF, D)
    pe_rows = sinusoidal_pe(S, D)                 # [S, D]
    vec_rows = jnp.concatenate([
        p['ln1_w'].reshape(L, D), p['ln1_b'].reshape(L, D),
        p['ln2_w'].reshape(L, D), p['ln2_b'].reshape(L, D),
        p['bo'].reshape(L, D),    p['b2'].reshape(L, D),
        p['lnf_w'].reshape(1, D), p['lnf_b'].reshape(1, D),
    ], axis=0)                                    # [14, D]
    dblob = jnp.concatenate([wo_rows, w2_rows, pe_rows, vec_rows], axis=0)
    assert dblob.shape == (DBLOB_ROWS, D)
    return qkvwb, w1b1, dblob


def transformer_encoder(embed_src, mask, packed):
    """embed_src [B,S,D] f32, mask [B,1,S] (nonzero=valid). Returns [B,S,D] f32.
    No per-call host-side prep: the wrapper is just the pallas_call."""
    qkvwb, w1b1, dblob = packed
    vmem = pl.BlockSpec(memory_space=pltpu.MemorySpace.VMEM)
    f = pl.pallas_call(
        encoder_kernel,
        out_shape=jax.ShapeDtypeStruct((B, S, D), jnp.float32),
        in_specs=[vmem] * 5,
        out_specs=vmem,
    )
    return f(embed_src, mask, qkvwb, w1b1, dblob)


def init_params(key):
    ks = jax.random.split(key, 8)
    scale = 0.02
    return {
        'ln1_w': jnp.ones((L, 1, D), jnp.float32),
        'ln1_b': jnp.zeros((L, 1, D), jnp.float32),
        'Wq': scale * jax.random.normal(ks[0], (L, D, D), jnp.float32),
        'bq': jnp.zeros((L, 1, D), jnp.float32),
        'Wk': scale * jax.random.normal(ks[1], (L, D, D), jnp.float32),
        'bk': jnp.zeros((L, 1, D), jnp.float32),
        'Wv': scale * jax.random.normal(ks[2], (L, D, D), jnp.float32),
        'bv': jnp.zeros((L, 1, D), jnp.float32),
        'Wo': scale * jax.random.normal(ks[3], (L, D, D), jnp.float32),
        'bo': jnp.zeros((L, 1, D), jnp.float32),
        'ln2_w': jnp.ones((L, 1, D), jnp.float32),
        'ln2_b': jnp.zeros((L, 1, D), jnp.float32),
        'W1': scale * jax.random.normal(ks[4], (L, D, FF), jnp.float32),
        'b1': jnp.zeros((L, 1, FF), jnp.float32),
        'W2': scale * jax.random.normal(ks[5], (L, FF, D), jnp.float32),
        'b2': jnp.zeros((L, 1, D), jnp.float32),
        'lnf_w': jnp.ones((1, D), jnp.float32),
        'lnf_b': jnp.zeros((1, D), jnp.float32),
    }


def reference_encoder(embed_src, mask, p):
    """Pure-JAX mirror of the PyTorch forward, for a correctness check."""
    x = embed_src + sinusoidal_pe(S, D)[None, :, :]
    for l in range(L):
        xn = _layer_norm(x, p['ln1_w'][l], p['ln1_b'][l])
        q = xn @ p['Wq'][l] + p['bq'][l]
        k = xn @ p['Wk'][l] + p['bk'][l]
        v = xn @ p['Wv'][l] + p['bv'][l]
        q4 = q.reshape(B, S, H, DK)
        k4 = k.reshape(B, S, H, DK)
        v4 = v.reshape(B, S, H, DK)
        scores = jnp.einsum('bqhd,bkhd->bhqk', q4, k4) / math.sqrt(DK)
        scores = jnp.where(mask[:, None, :, :] > 0, scores, NEG_INF)
        probs = jax.nn.softmax(scores, axis=-1)
        ctx = jnp.einsum('bhqk,bkhd->bqhd', probs, v4).reshape(B, S, D)
        x = x + (ctx @ p['Wo'][l] + p['bo'][l])
        xn2 = _layer_norm(x, p['ln2_w'][l], p['ln2_b'][l])
        h = jnp.maximum(xn2 @ p['W1'][l] + p['b1'][l], 0.0)
        x = x + (h @ p['W2'][l] + p['b2'][l])
    return _layer_norm(x, p['lnf_w'], p['lnf_b'])


if __name__ == "__main__":
    key = jax.random.PRNGKey(0)
    k_emb, k_par = jax.random.split(key)

    embed_src = jax.random.normal(k_emb, (B, S, D), jnp.float32)
    # mask [B, 1, S]: batch 0 fully valid, batch 1 has last 2 tokens padded
    mask_np = np.ones((B, 1, S), np.float32)
    mask_np[1, 0, -2:] = 0.0
    mask = jnp.asarray(mask_np)

    params = init_params(k_par)
    packed = prepare_params(params)          # one-time packing; not per call

    out = transformer_encoder(embed_src, mask, packed)
    out = jax.block_until_ready(out)

    ref = reference_encoder(embed_src, mask, params)
    np.testing.assert_allclose(np.asarray(out), np.asarray(ref), rtol=2e-3, atol=2e-3)

    print("KERNEL_OK")
</pallas_src>

<mosaic_0001>
module attributes {stable_mosaic.version = 11 : i64} {
  func.func @encoder_kernel(%arg0: memref<2x8x32xf32, #tpu.memory_space<vmem>>, %arg1: memref<2x1x8xf32, #tpu.memory_space<vmem>>, %arg2: memref<24x33x8xf32, #tpu.memory_space<vmem>>, %arg3: memref<2x33x64xf32, #tpu.memory_space<vmem>>, %arg4: memref<214x32xf32, #tpu.memory_space<vmem>>, %arg5: memref<2x8x32xf32, #tpu.memory_space<vmem>>) attributes {dimension_semantics = [], scalar_prefetch = 0 : i64, scratch_operands = 0 : i64, tpu.core_type = #tpu.core_type<tc>} {
    %c192 = arith.constant 192 : index
    %c0 = arith.constant 0 : index
    %0 = vector.load %arg4[%c192, %c0] : memref<214x32xf32, #tpu.memory_space<vmem>>, vector<8x32xf32>
    %c0_0 = arith.constant 0 : index
    %c0_1 = arith.constant 0 : index
    %c0_2 = arith.constant 0 : index
    %1 = vector.load %arg0[%c0_0, %c0_1, %c0_2] : memref<2x8x32xf32, #tpu.memory_space<vmem>>, vector<2x8x32xf32>
    %2 = vector.shape_cast %0 : vector<8x32xf32> to vector<1x8x32xf32>
    %3 = vector.broadcast %2 : vector<1x8x32xf32> to vector<2x8x32xf32>
    %4 = arith.addf %1, %3 : vector<2x8x32xf32>
    %5 = vector.shape_cast %4 : vector<2x8x32xf32> to vector<16x32xf32>
    %c0_3 = arith.constant 0 : index
    %c0_4 = arith.constant 0 : index
    %c0_5 = arith.constant 0 : index
    %6 = vector.load %arg1[%c0_3, %c0_4, %c0_5] : memref<2x1x8xf32, #tpu.memory_space<vmem>>, vector<2x1x8xf32>
    %cst = arith.constant 0.000000e+00 : f32
    %7 = vector.broadcast %cst : f32 to vector<2x1x8xf32>
    %8 = arith.cmpf ogt, %6, %7 : vector<2x1x8xf32>
    %cst_6 = arith.constant 0.000000e+00 : f32
    %cst_7 = arith.constant -1.000000e+30 : f32
    %9 = vector.broadcast %cst_6 : f32 to vector<2x1x8xf32>
    %10 = vector.broadcast %cst_7 : f32 to vector<2x1x8xf32>
    %11 = arith.select %8, %9, %10 : vector<2x1x8xi1>, vector<2x1x8xf32>
    %12 = vector.shape_cast %11 : vector<2x1x8xf32> to vector<2x1x8xf32>
    %13 = vector.broadcast %12 : vector<2x1x8xf32> to vector<2x8x8xf32>
    %c200 = arith.constant 200 : index
    %c0_8 = arith.constant 0 : index
    %14 = vector.load %arg4[%c200, %c0_8] : memref<214x32xf32, #tpu.memory_space<vmem>>, vector<1x32xf32>
    %c202 = arith.constant 202 : index
    %c0_9 = arith.constant 0 : index
    %15 = vector.load %arg4[%c202, %c0_9] : memref<214x32xf32, #tpu.memory_space<vmem>>, vector<1x32xf32>
    %cst_10 = arith.constant dense<0.000000e+00> : vector<16xf32>
    %16 = vector.multi_reduction <add>, %5, %cst_10 [1] : vector<16x32xf32> to vector<16xf32>
    %17 = vector.shape_cast %16 : vector<16xf32> to vector<16x1xf32>
    %cst_11 = arith.constant 3.200000e+01 : f32
    %18 = vector.broadcast %cst_11 : f32 to vector<16x1xf32>
    %19 = arith.divf %17, %18 : vector<16x1xf32>
    %20 = vector.broadcast %19 : vector<16x1xf32> to vector<16x32xf32>
    %21 = arith.subf %5, %20 : vector<16x32xf32>
    %22 = arith.mulf %21, %21 : vector<16x32xf32>
    %cst_12 = arith.constant dense<0.000000e+00> : vector<16xf32>
    %23 = vector.multi_reduction <add>, %22, %cst_12 [1] : vector<16x32xf32> to vector<16xf32>
    %24 = vector.shape_cast %23 : vector<16xf32> to vector<16x1xf32>
    %cst_13 = arith.constant 3.200000e+01 : f32
    %25 = vector.broadcast %cst_13 : f32 to vector<16x1xf32>
    %26 = arith.divf %24, %25 : vector<16x1xf32>
    %27 = vector.broadcast %19 : vector<16x1xf32> to vector<16x32xf32>
    %28 = arith.subf %5, %27 : vector<16x32xf32>
    %cst_14 = arith.constant 9.99999974E-6 : f32
    %29 = vector.broadcast %cst_14 : f32 to vector<16x1xf32>
    %30 = arith.addf %26, %29 : vector<16x1xf32>
    %31 = math.rsqrt %30 : vector<16x1xf32>
    %32 = vector.broadcast %31 : vector<16x1xf32> to vector<16x32xf32>
    %33 = arith.mulf %28, %32 : vector<16x32xf32>
    %34 = vector.broadcast %14 : vector<1x32xf32> to vector<16x32xf32>
    %35 = arith.mulf %33, %34 : vector<16x32xf32>
    %36 = vector.broadcast %15 : vector<1x32xf32> to vector<16x32xf32>
    %37 = arith.addf %35, %36 : vector<16x32xf32>
    %cst_15 = arith.constant 0.000000e+00 : f32
    %38 = vector.broadcast %cst_15 : f32 to vector<16x32xf32>
    %c0_16 = arith.constant 0 : index
    %c0_17 = arith.constant 0 : index
    %c0_18 = arith.constant 0 : index
    %39 = vector.load %arg2[%c0_16, %c0_17, %c0_18] : memref<24x33x8xf32, #tpu.memory_space<vmem>>, vector<1x33x8xf32>
    %40 = vector.shape_cast %39 : vector<1x33x8xf32> to vector<33x8xf32>
    %c8 = arith.constant 8 : index
    %c0_19 = arith.constant 0 : index
    %c0_20 = arith.constant 0 : index
    %41 = vector.load %arg2[%c8, %c0_19, %c0_20] : memref<24x33x8xf32, #tpu.memory_space<vmem>>, vector<1x33x8xf32>
    %42 = vector.shape_cast %41 : vector<1x33x8xf32> to vector<33x8xf32>
    %c16 = arith.constant 16 : index
    %c0_21 = arith.constant 0 : index
    %c0_22 = arith.constant 0 : index
    %43 = vector.load %arg2[%c16, %c0_21, %c0_22] : memref<24x33x8xf32, #tpu.memory_space<vmem>>, vector<1x33x8xf32>
    %44 = vector.shape_cast %43 : vector<1x33x8xf32> to vector<33x8xf32>
    %45 = vector.extract_strided_slice %40 {offsets = [0, 0], sizes = [32, 8], strides = [1, 1]} : vector<33x8xf32> to vector<32x8xf32>
    %cst_23 = arith.constant dense<0.000000e+00> : vector<16x8xf32>
    %46 = tpu.matmul %37, %45, %cst_23 {dimension_numbers = #tpu.dot_dimension_numbers<[1], [0], [0], [1], [0, 0, 1, 1], [], []>} : vector<16x32xf32>, vector<32x8xf32>, vector<16x8xf32> -> vector<16x8xf32>
    %47 = vector.extract_strided_slice %40 {offsets = [32, 0], sizes = [1, 8], strides = [1, 1]} : vector<33x8xf32> to vector<1x8xf32>
    %48 = vector.broadcast %47 : vector<1x8xf32> to vector<16x8xf32>
    %49 = arith.addf %46, %48 : vector<16x8xf32>
    %50 = vector.extract_strided_slice %42 {offsets = [0, 0], sizes = [32, 8], strides = [1, 1]} : vector<33x8xf32> to vector<32x8xf32>
    %cst_24 = arith.constant dense<0.000000e+00> : vector<16x8xf32>
    %51 = tpu.matmul %37, %50, %cst_24 {dimension_numbers = #tpu.dot_dimension_numbers<[1], [0], [0], [1], [0, 0, 1, 1], [], []>} : vector<16x32xf32>, vector<32x8xf32>, vector<16x8xf32> -> vector<16x8xf32>
    %52 = vector.extract_strided_slice %42 {offsets = [32, 0], sizes = [1, 8], strides = [1, 1]} : vector<33x8xf32> to vector<1x8xf32>
    %53 = vector.broadcast %52 : vector<1x8xf32> to vector<16x8xf32>
    %54 = arith.addf %51, %53 : vector<16x8xf32>
    %55 = vector.extract_strided_slice %44 {offsets = [0, 0], sizes = [32, 8], strides = [1, 1]} : vector<33x8xf32> to vector<32x8xf32>
    %cst_25 = arith.constant dense<0.000000e+00> : vector<16x8xf32>
    %56 = tpu.matmul %37, %55, %cst_25 {dimension_numbers = #tpu.dot_dimension_numbers<[1], [0], [0], [1], [0, 0, 1, 1], [], []>} : vector<16x32xf32>, vector<32x8xf32>, vector<16x8xf32> -> vector<16x8xf32>
    %57 = vector.extract_strided_slice %44 {offsets = [32, 0], sizes = [1, 8], strides = [1, 1]} : vector<33x8xf32> to vector<1x8xf32>
    %58 = vector.broadcast %57 : vector<1x8xf32> to vector<16x8xf32>
    %59 = arith.addf %56, %58 : vector<16x8xf32>
    %60 = vector.shape_cast %49 : vector<16x8xf32> to vector<2x8x8xf32>
    %61 = vector.shape_cast %54 : vector<16x8xf32> to vector<2x8x8xf32>
    %62 = vector.shape_cast %59 : vector<16x8xf32> to vector<2x8x8xf32>
    "tpu.trace_start"() <{level = 10 : i32, message = "bqd,bkd->bqk"}> : () -> ()
    %cst_26 = arith.constant dense<0.000000e+00> : vector<2x8x8xf32>
    %63 = tpu.matmul %60, %61, %cst_26 {dimension_numbers = #tpu.dot_dimension_numbers<[2], [2], [1], [1], [0, 0, 0, 1, 1, 1], [0], [0]>} : vector<2x8x8xf32>, vector<2x8x8xf32>, vector<2x8x8xf32> -> vector<2x8x8xf32>
    "tpu.trace_stop"() : () -> ()
    %64 = arith.addf %63, %13 : vector<2x8x8xf32>
    %cst_27 = arith.constant dense<0xFF800000> : vector<2x8xf32>
    %65 = vector.multi_reduction <maximumf>, %64, %cst_27 [2] : vector<2x8x8xf32> to vector<2x8xf32>
    %66 = vector.shape_cast %65 : vector<2x8xf32> to vector<2x8x1xf32>
    %67 = vector.broadcast %66 : vector<2x8x1xf32> to vector<2x8x8xf32>
    %68 = arith.subf %64, %67 : vector<2x8x8xf32>
    %69 = math.exp %68 : vector<2x8x8xf32>
    %cst_28 = arith.constant dense<0.000000e+00> : vector<2x8xf32>
    %70 = vector.multi_reduction <add>, %69, %cst_28 [2] : vector<2x8x8xf32> to vector<2x8xf32>
    %71 = vector.shape_cast %70 : vector<2x8xf32> to vector<2x8x1xf32>
    %72 = tpu.reciprocal %71 {approx = true} : vector<2x8x1xf32> -> vector<2x8x1xf32>
    %73 = vector.broadcast %72 : vector<2x8x1xf32> to vector<2x8x8xf32>
    %74 = arith.mulf %69, %73 : vector<2x8x8xf32>
    "tpu.trace_start"() <{level = 10 : i32, message = "bqk,bkd->bqd"}> : () -> ()
    %cst_29 = arith.constant dense<0.000000e+00> : vector<2x8x8xf32>
    %75 = tpu.matmul %74, %62, %cst_29 {dimension_numbers = #tpu.dot_dimension_numbers<[2], [1], [1], [2], [0, 0, 0, 1, 1, 2], [0], [0]>} : vector<2x8x8xf32>, vector<2x8x8xf32>, vector<2x8x8xf32> -> vector<2x8x8xf32>
    "tpu.trace_stop"() : () -> ()
    %c0_30 = arith.constant 0 : index
    %c0_31 = arith.constant 0 : index
    %76 = vector.load %arg4[%c0_30, %c0_31] : memref<214x32xf32, #tpu.memory_space<vmem>>, vector<8x32xf32>
    %77 = vector.shape_cast %75 : vector<2x8x8xf32> to vector<16x8xf32>
    %cst_32 = arith.constant dense<0.000000e+00> : vector<16x32xf32>
    %78 = tpu.matmul %77, %76, %cst_32 {dimension_numbers = #tpu.dot_dimension_numbers<[1], [0], [0], [1], [0, 0, 1, 1], [], []>} : vector<16x8xf32>, vector<8x32xf32>, vector<16x32xf32> -> vector<16x32xf32>
    %79 = arith.addf %38, %78 : vector<16x32xf32>
    %c1 = arith.constant 1 : index
    %c0_33 = arith.constant 0 : index
    %c0_34 = arith.constant 0 : index
    %80 = vector.load %arg2[%c1, %c0_33, %c0_34] : memref<24x33x8xf32, #tpu.memory_space<vmem>>, vector<1x33x8xf32>
    %81 = vector.shape_cast %80 : vector<1x33x8xf32> to vector<33x8xf32>
    %c9 = arith.constant 9 : index
    %c0_35 = arith.constant 0 : index
    %c0_36 = arith.constant 0 : index
    %82 = vector.load %arg2[%c9, %c0_35, %c0_36] : memref<24x33x8xf32, #tpu.memory_space<vmem>>, vector<1x33x8xf32>
    %83 = vector.shape_cast %82 : vector<1x33x8xf32> to vector<33x8xf32>
    %c17 = arith.constant 17 : index
    %c0_37 = arith.constant 0 : index
    %c0_38 = arith.constant 0 : index
    %84 = vector.load %arg2[%c17, %c0_37, %c0_38] : memref<24x33x8xf32, #tpu.memory_space<vmem>>, vector<1x33x8xf32>
    %85 = vector.shape_cast %84 : vector<1x33x8xf32> to vector<33x8xf32>
    %86 = vector.extract_strided_slice %81 {offsets = [0, 0], sizes = [32, 8], strides = [1, 1]} : vector<33x8xf32> to vector<32x8xf32>
    %cst_39 = arith.constant dense<0.000000e+00> : vector<16x8xf32>
    %87 = tpu.matmul %37, %86, %cst_39 {dimension_numbers = #tpu.dot_dimension_numbers<[1], [0], [0], [1], [0, 0, 1, 1], [], []>} : vector<16x32xf32>, vector<32x8xf32>, vector<16x8xf32> -> vector<16x8xf32>
    %88 = vector.extract_strided_slice %81 {offsets = [32, 0], sizes = [1, 8], strides = [1, 1]} : vector<33x8xf32> to vector<1x8xf32>
    %89 = vector.broadcast %88 : vector<1x8xf32> to vector<16x8xf32>
    %90 = arith.addf %87, %89 : vector<16x8xf32>
    %91 = vector.extract_strided_slice %83 {offsets = [0, 0], sizes = [32, 8], strides = [1, 1]} : vector<33x8xf32> to vector<32x8xf32>
    %cst_40 = arith.constant dense<0.000000e+00> : vector<16x8xf32>
    %92 = tpu.matmul %37, %91, %cst_40 {dimension_numbers = #tpu.dot_dimension_numbers<[1], [0], [0], [1], [0, 0, 1, 1], [], []>} : vector<16x32xf32>, vector<32x8xf32>, vector<16x8xf32> -> vector<16x8xf32>
    %93 = vector.extract_strided_slice %83 {offsets = [32, 0], sizes = [1, 8], strides = [1, 1]} : vector<33x8xf32> to vector<1x8xf32>
    %94 = vector.broadcast %93 : vector<1x8xf32> to vector<16x8xf32>
    %95 = arith.addf %92, %94 : vector<16x8xf32>
    %96 = vector.extract_strided_slice %85 {offsets = [0, 0], sizes = [32, 8], strides = [1, 1]} : vector<33x8xf32> to vector<32x8xf32>
    %cst_41 = arith.constant dense<0.000000e+00> : vector<16x8xf32>
    %97 = tpu.matmul %37, %96, %cst_41 {dimension_numbers = #tpu.dot_dimension_numbers<[1], [0], [0], [1], [0, 0, 1, 1], [], []>} : vector<16x32xf32>, vector<32x8xf32>, vector<16x8xf32> -> vector<16x8xf32>
    %98 = vector.extract_strided_slice %85 {offsets = [32, 0], sizes = [1, 8], strides = [1, 1]} : vector<33x8xf32> to vector<1x8xf32>
    %99 = vector.broadcast %98 : vector<1x8xf32> to vector<16x8xf32>
    %100 = arith.addf %97, %99 : vector<16x8xf32>
    %101 = vector.shape_cast %90 : vector<16x8xf32> to vector<2x8x8xf32>
    %102 = vector.shape_cast %95 : vector<16x8xf32> to vector<2x8x8xf32>
    %103 = vector.shape_cast %100 : vector<16x8xf32> to vector<2x8x8xf32>
    "tpu.trace_start"() <{level = 10 : i32, message = "bqd,bkd->bqk"}> : () -> ()
    %cst_42 = arith.constant dense<0.000000e+00> : vector<2x8x8xf32>
    %104 = tpu.matmul %101, %102, %cst_42 {dimension_numbers = #tpu.dot_dimension_numbers<[2], [2], [1], [1], [0, 0, 0, 1, 1, 1], [0], [0]>} : vector<2x8x8xf32>, vector<2x8x8xf32>, vector<2x8x8xf32> -> vector<2x8x8xf32>
    "tpu.trace_stop"() : () -> ()
    %105 = arith.addf %104, %13 : vector<2x8x8xf32>
    %cst_43 = arith.constant dense<0xFF800000> : vector<2x8xf32>
    %106 = vector.multi_reduction <maximumf>, %105, %cst_43 [2] : vector<2x8x8xf32> to vector<2x8xf32>
    %107 = vector.shape_cast %106 : vector<2x8xf32> to vector<2x8x1xf32>
    %108 = vector.broadcast %107 : vector<2x8x1xf32> to vector<2x8x8xf32>
    %109 = arith.subf %105, %108 : vector<2x8x8xf32>
    %110 = math.exp %109 : vector<2x8x8xf32>
    %cst_44 = arith.constant dense<0.000000e+00> : vector<2x8xf32>
    %111 = vector.multi_reduction <add>, %110, %cst_44 [2] : vector<2x8x8xf32> to vector<2x8xf32>
    %112 = vector.shape_cast %111 : vector<2x8xf32> to vector<2x8x1xf32>
    %113 = tpu.reciprocal %112 {approx = true} : vector<2x8x1xf32> -> vector<2x8x1xf32>
    %114 = vector.broadcast %113 : vector<2x8x1xf32> to vector<2x8x8xf32>
    %115 = arith.mulf %110, %114 : vector<2x8x8xf32>
    "tpu.trace_start"() <{level = 10 : i32, message = "bqk,bkd->bqd"}> : () -> ()
    %cst_45 = arith.constant dense<0.000000e+00> : vector<2x8x8xf32>
    %116 = tpu.matmul %115, %103, %cst_45 {dimension_numbers = #tpu.dot_dimension_numbers<[2], [1], [1], [2], [0, 0, 0, 1, 1, 2], [0], [0]>} : vector<2x8x8xf32>, vector<2x8x8xf32>, vector<2x8x8xf32> -> vector<2x8x8xf32>
    "tpu.trace_stop"() : () -> ()
    %c8_46 = arith.constant 8 : index
    %c0_47 = arith.constant 0 : index
    %117 = vector.load %arg4[%c8_46, %c0_47] : memref<214x32xf32, #tpu.memory_space<vmem>>, vector<8x32xf32>
    %118 = vector.shape_cast %116 : vector<2x8x8xf32> to vector<16x8xf32>
    %cst_48 = arith.constant dense<0.000000e+00> : vector<16x32xf32>
    %119 = tpu.matmul %118, %117, %cst_48 {dimension_numbers = #tpu.dot_dimension_numbers<[1], [0], [0], [1], [0, 0, 1, 1], [], []>} : vector<16x8xf32>, vector<8x32xf32>, vector<16x32xf32> -> vector<16x32xf32>
    %120 = arith.addf %79, %119 : vector<16x32xf32>
    %c2 = arith.constant 2 : index
    %c0_49 = arith.constant 0 : index
    %c0_50 = arith.constant 0 : index
    %121 = vector.load %arg2[%c2, %c0_49, %c0_50] : memref<24x33x8xf32, #tpu.memory_space<vmem>>, vector<1x33x8xf32>
    %122 = vector.shape_cast %121 : vector<1x33x8xf32> to vector<33x8xf32>
    %c10 = arith.constant 10 : index
    %c0_51 = arith.constant 0 : index
    %c0_52 = arith.constant 0 : index
    %123 = vector.load %arg2[%c10, %c0_51, %c0_52] : memref<24x33x8xf32, #tpu.memory_space<vmem>>, vector<1x33x8xf32>
    %124 = vector.shape_cast %123 : vector<1x33x8xf32> to vector<33x8xf32>
    %c18 = arith.constant 18 : index
    %c0_53 = arith.constant 0 : index
    %c0_54 = arith.constant 0 : index
    %125 = vector.load %arg2[%c18, %c0_53, %c0_54] : memref<24x33x8xf32, #tpu.memory_space<vmem>>, vector<1x33x8xf32>
    %126 = vector.shape_cast %125 : vector<1x33x8xf32> to vector<33x8xf32>
    %127 = vector.extract_strided_slice %122 {offsets = [0, 0], sizes = [32, 8], strides = [1, 1]} : vector<33x8xf32> to vector<32x8xf32>
    %cst_55 = arith.constant dense<0.000000e+00> : vector<16x8xf32>
    %128 = tpu.matmul %37, %127, %cst_55 {dimension_numbers = #tpu.dot_dimension_numbers<[1], [0], [0], [1], [0, 0, 1, 1], [], []>} : vector<16x32xf32>, vector<32x8xf32>, vector<16x8xf32> -> vector<16x8xf32>
    %129 = vector.extract_strided_slice %122 {offsets = [32, 0], sizes = [1, 8], strides = [1, 1]} : vector<33x8xf32> to vector<1x8xf32>
    %130 = vector.broadcast %129 : vector<1x8xf32> to vector<16x8xf32>
    %131 = arith.addf %128, %130 : vector<16x8xf32>
    %132 = vector.extract_strided_slice %124 {offsets = [0, 0], sizes = [32, 8], strides = [1, 1]} : vector<33x8xf32> to vector<32x8xf32>
    %cst_56 = arith.constant dense<0.000000e+00> : vector<16x8xf32>
    %133 = tpu.matmul %37, %132, %cst_56 {dimension_numbers = #tpu.dot_dimension_numbers<[1], [0], [0], [1], [0, 0, 1, 1], [], []>} : vector<16x32xf32>, vector<32x8xf32>, vector<16x8xf32> -> vector<16x8xf32>
    %134 = vector.extract_strided_slice %124 {offsets = [32, 0], sizes = [1, 8], strides = [1, 1]} : vector<33x8xf32> to vector<1x8xf32>
    %135 = vector.broadcast %134 : vector<1x8xf32> to vector<16x8xf32>
    %136 = arith.addf %133, %135 : vector<16x8xf32>
    %137 = vector.extract_strided_slice %126 {offsets = [0, 0], sizes = [32, 8], strides = [1, 1]} : vector<33x8xf32> to vector<32x8xf32>
    %cst_57 = arith.constant dense<0.000000e+00> : vector<16x8xf32>
    %138 = tpu.matmul %37, %137, %cst_57 {dimension_numbers = #tpu.dot_dimension_numbers<[1], [0], [0], [1], [0, 0, 1, 1], [], []>} : vector<16x32xf32>, vector<32x8xf32>, vector<16x8xf32> -> vector<16x8xf32>
    %139 = vector.extract_strided_slice %126 {offsets = [32, 0], sizes = [1, 8], strides = [1, 1]} : vector<33x8xf32> to vector<1x8xf32>
    %140 = vector.broadcast %139 : vector<1x8xf32> to vector<16x8xf32>
    %141 = arith.addf %138, %140 : vector<16x8xf32>
    %142 = vector.shape_cast %131 : vector<16x8xf32> to vector<2x8x8xf32>
    %143 = vector.shape_cast %136 : vector<16x8xf32> to vector<2x8x8xf32>
    %144 = vector.shape_cast %141 : vector<16x8xf32> to vector<2x8x8xf32>
    "tpu.trace_start"() <{level = 10 : i32, message = "bqd,bkd->bqk"}> : () -> ()
    %cst_58 = arith.constant dense<0.000000e+00> : vector<2x8x8xf32>
    %145 = tpu.matmul %142, %143, %cst_58 {dimension_numbers = #tpu.dot_dimension_numbers<[2], [2], [1], [1], [0, 0, 0, 1, 1, 1], [0], [0]>} : vector<2x8x8xf32>, vector<2x8x8xf32>, vector<2x8x8xf32> -> vector<2x8x8xf32>
    "tpu.trace_stop"() : () -> ()
    %146 = arith.addf %145, %13 : vector<2x8x8xf32>
    %cst_59 = arith.constant dense<0xFF800000> : vector<2x8xf32>
    %147 = vector.multi_reduction <maximumf>, %146, %cst_59 [2] : vector<2x8x8xf32> to vector<2x8xf32>
    %148 = vector.shape_cast %147 : vector<2x8xf32> to vector<2x8x1xf32>
    %149 = vector.broadcast %148 : vector<2x8x1xf32> to vector<2x8x8xf32>
    %150 = arith.subf %146, %149 : vector<2x8x8xf32>
    %151 = math.exp %150 : vector<2x8x8xf32>
    %cst_60 = arith.constant dense<0.000000e+00> : vector<2x8xf32>
    %152 = vector.multi_reduction <add>, %151, %cst_60 [2] : vector<2x8x8xf32> to vector<2x8xf32>
    %153 = vector.shape_cast %152 : vector<2x8xf32> to vector<2x8x1xf32>
    %154 = tpu.reciprocal %153 {approx = true} : vector<2x8x1xf32> -> vector<2x8x1xf32>
    %155 = vector.broadcast %154 : vector<2x8x1xf32> to vector<2x8x8xf32>
    %156 = arith.mulf %151, %155 : vector<2x8x8xf32>
    "tpu.trace_start"() <{level = 10 : i32, message = "bqk,bkd->bqd"}> : () -> ()
    %cst_61 = arith.constant dense<0.000000e+00> : vector<2x8x8xf32>
    %157 = tpu.matmul %156, %144, %cst_61 {dimension_numbers = #tpu.dot_dimension_numbers<[2], [1], [1], [2], [0, 0, 0, 1, 1, 2], [0], [0]>} : vector<2x8x8xf32>, vector<2x8x8xf32>, vector<2x8x8xf32> -> vector<2x8x8xf32>
    "tpu.trace_stop"() : () -> ()
    %c16_62 = arith.constant 16 : index
    %c0_63 = arith.constant 0 : index
    %158 = vector.load %arg4[%c16_62, %c0_63] : memref<214x32xf32, #tpu.memory_space<vmem>>, vector<8x32xf32>
    %159 = vector.shape_cast %157 : vector<2x8x8xf32> to vector<16x8xf32>
    %cst_64 = arith.constant dense<0.000000e+00> : vector<16x32xf32>
    %160 = tpu.matmul %159, %158, %cst_64 {dimension_numbers = #tpu.dot_dimension_numbers<[1], [0], [0], [1], [0, 0, 1, 1], [], []>} : vector<16x8xf32>, vector<8x32xf32>, vector<16x32xf32> -> vector<16x32xf32>
    %161 = arith.addf %120, %160 : vector<16x32xf32>
    %c3 = arith.constant 3 : index
    %c0_65 = arith.constant 0 : index
    %c0_66 = arith.constant 0 : index
    %162 = vector.load %arg2[%c3, %c0_65, %c0_66] : memref<24x33x8xf32, #tpu.memory_space<vmem>>, vector<1x33x8xf32>
    %163 = vector.shape_cast %162 : vector<1x33x8xf32> to vector<33x8xf32>
    %c11 = arith.constant 11 : index
    %c0_67 = arith.constant 0 : index
    %c0_68 = arith.constant 0 : index
    %164 = vector.load %arg2[%c11, %c0_67, %c0_68] : memref<24x33x8xf32, #tpu.memory_space<vmem>>, vector<1x33x8xf32>
    %165 = vector.shape_cast %164 : vector<1x33x8xf32> to vector<33x8xf32>
    %c19 = arith.constant 19 : index
    %c0_69 = arith.constant 0 : index
    %c0_70 = arith.constant 0 : index
    %166 = vector.load %arg2[%c19, %c0_69, %c0_70] : memref<24x33x8xf32, #tpu.memory_space<vmem>>, vector<1x33x8xf32>
    %167 = vector.shape_cast %166 : vector<1x33x8xf32> to vector<33x8xf32>
    %168 = vector.extract_strided_slice %163 {offsets = [0, 0], sizes = [32, 8], strides = [1, 1]} : vector<33x8xf32> to vector<32x8xf32>
    %cst_71 = arith.constant dense<0.000000e+00> : vector<16x8xf32>
    %169 = tpu.matmul %37, %168, %cst_71 {dimension_numbers = #tpu.dot_dimension_numbers<[1], [0], [0], [1], [0, 0, 1, 1], [], []>} : vector<16x32xf32>, vector<32x8xf32>, vector<16x8xf32> -> vector<16x8xf32>
    %170 = vector.extract_strided_slice %163 {offsets = [32, 0], sizes = [1, 8], strides = [1, 1]} : vector<33x8xf32> to vector<1x8xf32>
    %171 = vector.broadcast %170 : vector<1x8xf32> to vector<16x8xf32>
    %172 = arith.addf %169, %171 : vector<16x8xf32>
    %173 = vector.extract_strided_slice %165 {offsets = [0, 0], sizes = [32, 8], strides = [1, 1]} : vector<33x8xf32> to vector<32x8xf32>
    %cst_72 = arith.constant dense<0.000000e+00> : vector<16x8xf32>
    %174 = tpu.matmul %37, %173, %cst_72 {dimension_numbers = #tpu.dot_dimension_numbers<[1], [0], [0], [1], [0, 0, 1, 1], [], []>} : vector<16x32xf32>, vector<32x8xf32>, vector<16x8xf32> -> vector<16x8xf32>
    %175 = vector.extract_strided_slice %165 {offsets = [32, 0], sizes = [1, 8], strides = [1, 1]} : vector<33x8xf32> to vector<1x8xf32>
    %176 = vector.broadcast %175 : vector<1x8xf32> to vector<16x8xf32>
    %177 = arith.addf %174, %176 : vector<16x8xf32>
    %178 = vector.extract_strided_slice %167 {offsets = [0, 0], sizes = [32, 8], strides = [1, 1]} : vector<33x8xf32> to vector<32x8xf32>
    %cst_73 = arith.constant dense<0.000000e+00> : vector<16x8xf32>
    %179 = tpu.matmul %37, %178, %cst_73 {dimension_numbers = #tpu.dot_dimension_numbers<[1], [0], [0], [1], [0, 0, 1, 1], [], []>} : vector<16x32xf32>, vector<32x8xf32>, vector<16x8xf32> -> vector<16x8xf32>
    %180 = vector.extract_strided_slice %167 {offsets = [32, 0], sizes = [1, 8], strides = [1, 1]} : vector<33x8xf32> to vector<1x8xf32>
    %181 = vector.broadcast %180 : vector<1x8xf32> to vector<16x8xf32>
    %182 = arith.addf %179, %181 : vector<16x8xf32>
    %183 = vector.shape_cast %172 : vector<16x8xf32> to vector<2x8x8xf32>
    %184 = vector.shape_cast %177 : vector<16x8xf32> to vector<2x8x8xf32>
    %185 = vector.shape_cast %182 : vector<16x8xf32> to vector<2x8x8xf32>
    "tpu.trace_start"() <{level = 10 : i32, message = "bqd,bkd->bqk"}> : () -> ()
    %cst_74 = arith.constant dense<0.000000e+00> : vector<2x8x8xf32>
    %186 = tpu.matmul %183, %184, %cst_74 {dimension_numbers = #tpu.dot_dimension_numbers<[2], [2], [1], [1], [0, 0, 0, 1, 1, 1], [0], [0]>} : vector<2x8x8xf32>, vector<2x8x8xf32>, vector<2x8x8xf32> -> vector<2x8x8xf32>
    "tpu.trace_stop"() : () -> ()
    %187 = arith.addf %186, %13 : vector<2x8x8xf32>
    %cst_75 = arith.constant dense<0xFF800000> : vector<2x8xf32>
    %188 = vector.multi_reduction <maximumf>, %187, %cst_75 [2] : vector<2x8x8xf32> to vector<2x8xf32>
    %189 = vector.shape_cast %188 : vector<2x8xf32> to vector<2x8x1xf32>
    %190 = vector.broadcast %189 : vector<2x8x1xf32> to vector<2x8x8xf32>
    %191 = arith.subf %187, %190 : vector<2x8x8xf32>
    %192 = math.exp %191 : vector<2x8x8xf32>
    %cst_76 = arith.constant dense<0.000000e+00> : vector<2x8xf32>
    %193 = vector.multi_reduction <add>, %192, %cst_76 [2] : vector<2x8x8xf32> to vector<2x8xf32>
    %194 = vector.shape_cast %193 : vector<2x8xf32> to vector<2x8x1xf32>
    %195 = tpu.reciprocal %194 {approx = true} : vector<2x8x1xf32> -> vector<2x8x1xf32>
    %196 = vector.broadcast %195 : vector<2x8x1xf32> to vector<2x8x8xf32>
    %197 = arith.mulf %192, %196 : vector<2x8x8xf32>
    "tpu.trace_start"() <{level = 10 : i32, message = "bqk,bkd->bqd"}> : () -> ()
    %cst_77 = arith.constant dense<0.000000e+00> : vector<2x8x8xf32>
    %198 = tpu.matmul %197, %185, %cst_77 {dimension_numbers = #tpu.dot_dimension_numbers<[2], [1], [1], [2], [0, 0, 0, 1, 1, 2], [0], [0]>} : vector<2x8x8xf32>, vector<2x8x8xf32>, vector<2x8x8xf32> -> vector<2x8x8xf32>
    "tpu.trace_stop"() : () -> ()
    %c24 = arith.constant 24 : index
    %c0_78 = arith.constant 0 : index
    %199 = vector.load %arg4[%c24, %c0_78] : memref<214x32xf32, #tpu.memory_space<vmem>>, vector<8x32xf32>
    %200 = vector.shape_cast %198 : vector<2x8x8xf32> to vector<16x8xf32>
    %cst_79 = arith.constant dense<0.000000e+00> : vector<16x32xf32>
    %201 = tpu.matmul %200, %199, %cst_79 {dimension_numbers = #tpu.dot_dimension_numbers<[1], [0], [0], [1], [0, 0, 1, 1], [], []>} : vector<16x8xf32>, vector<8x32xf32>, vector<16x32xf32> -> vector<16x32xf32>
    %202 = arith.addf %161, %201 : vector<16x32xf32>
    %203 = arith.addf %5, %202 : vector<16x32xf32>
    %c208 = arith.constant 208 : index
    %c0_80 = arith.constant 0 : index
    %204 = vector.load %arg4[%c208, %c0_80] : memref<214x32xf32, #tpu.memory_space<vmem>>, vector<1x32xf32>
    %205 = vector.broadcast %204 : vector<1x32xf32> to vector<16x32xf32>
    %206 = arith.addf %203, %205 : vector<16x32xf32>
    %c204 = arith.constant 204 : index
    %c0_81 = arith.constant 0 : index
    %207 = vector.load %arg4[%c204, %c0_81] : memref<214x32xf32, #tpu.memory_space<vmem>>, vector<1x32xf32>
    %c206 = arith.constant 206 : index
    %c0_82 = arith.constant 0 : index
    %208 = vector.load %arg4[%c206, %c0_82] : memref<214x32xf32, #tpu.memory_space<vmem>>, vector<1x32xf32>
    %cst_83 = arith.constant dense<0.000000e+00> : vector<16xf32>
    %209 = vector.multi_reduction <add>, %206, %cst_83 [1] : vector<16x32xf32> to vector<16xf32>
    %210 = vector.shape_cast %209 : vector<16xf32> to vector<16x1xf32>
    %cst_84 = arith.constant 3.200000e+01 : f32
    %211 = vector.broadcast %cst_84 : f32 to vector<16x1xf32>
    %212 = arith.divf %210, %211 : vector<16x1xf32>
    %213 = vector.broadcast %212 : vector<16x1xf32> to vector<16x32xf32>
    %214 = arith.subf %206, %213 : vector<16x32xf32>
    %215 = arith.mulf %214, %214 : vector<16x32xf32>
    %cst_85 = arith.constant dense<0.000000e+00> : vector<16xf32>
    %216 = vector.multi_reduction <add>, %215, %cst_85 [1] : vector<16x32xf32> to vector<16xf32>
    %217 = vector.shape_cast %216 : vector<16xf32> to vector<16x1xf32>
    %cst_86 = arith.constant 3.200000e+01 : f32
    %218 = vector.broadcast %cst_86 : f32 to vector<16x1xf32>
    %219 = arith.divf %217, %218 : vector<16x1xf32>
    %220 = vector.broadcast %212 : vector<16x1xf32> to vector<16x32xf32>
    %221 = arith.subf %206, %220 : vector<16x32xf32>
    %cst_87 = arith.constant 9.99999974E-6 : f32
    %222 = vector.broadcast %cst_87 : f32 to vector<16x1xf32>
    %223 = arith.addf %219, %222 : vector<16x1xf32>
    %224 = math.rsqrt %223 : vector<16x1xf32>
    %225 = vector.broadcast %224 : vector<16x1xf32> to vector<16x32xf32>
    %226 = arith.mulf %221, %225 : vector<16x32xf32>
    %227 = vector.broadcast %207 : vector<1x32xf32> to vector<16x32xf32>
    %228 = arith.mulf %226, %227 : vector<16x32xf32>
    %229 = vector.broadcast %208 : vector<1x32xf32> to vector<16x32xf32>
    %230 = arith.addf %228, %229 : vector<16x32xf32>
    %c0_88 = arith.constant 0 : index
    %c0_89 = arith.constant 0 : index
    %c0_90 = arith.constant 0 : index
    %231 = vector.load %arg3[%c0_88, %c0_89, %c0_90] : memref<2x33x64xf32, #tpu.memory_space<vmem>>, vector<1x33x64xf32>
    %232 = vector.shape_cast %231 : vector<1x33x64xf32> to vector<33x64xf32>
    %233 = vector.extract_strided_slice %232 {offsets = [0, 0], sizes = [32, 64], strides = [1, 1]} : vector<33x64xf32> to vector<32x64xf32>
    %cst_91 = arith.constant dense<0.000000e+00> : vector<16x64xf32>
    %234 = tpu.matmul %230, %233, %cst_91 {dimension_numbers = #tpu.dot_dimension_numbers<[1], [0], [0], [1], [0, 0, 1, 1], [], []>} : vector<16x32xf32>, vector<32x64xf32>, vector<16x64xf32> -> vector<16x64xf32>
    %235 = vector.extract_strided_slice %232 {offsets = [32, 0], sizes = [1, 64], strides = [1, 1]} : vector<33x64xf32> to vector<1x64xf32>
    %236 = vector.broadcast %235 : vector<1x64xf32> to vector<16x64xf32>
    %237 = arith.addf %234, %236 : vector<16x64xf32>
    %cst_92 = arith.constant 0.000000e+00 : f32
    %238 = vector.broadcast %cst_92 : f32 to vector<16x64xf32>
    %239 = arith.maximumf %237, %238 : vector<16x64xf32>
    %c64 = arith.constant 64 : index
    %c0_93 = arith.constant 0 : index
    %240 = vector.load %arg4[%c64, %c0_93] : memref<214x32xf32, #tpu.memory_space<vmem>>, vector<64x32xf32>
    %cst_94 = arith.constant dense<0.000000e+00> : vector<16x32xf32>
    %241 = tpu.matmul %239, %240, %cst_94 {dimension_numbers = #tpu.dot_dimension_numbers<[1], [0], [0], [1], [0, 0, 1, 1], [], []>} : vector<16x64xf32>, vector<64x32xf32>, vector<16x32xf32> -> vector<16x32xf32>
    %242 = arith.addf %206, %241 : vector<16x32xf32>
    %c210 = arith.constant 210 : index
    %c0_95 = arith.constant 0 : index
    %243 = vector.load %arg4[%c210, %c0_95] : memref<214x32xf32, #tpu.memory_space<vmem>>, vector<1x32xf32>
    %244 = vector.broadcast %243 : vector<1x32xf32> to vector<16x32xf32>
    %245 = arith.addf %242, %244 : vector<16x32xf32>
    %c201 = arith.constant 201 : index
    %c0_96 = arith.constant 0 : index
    %246 = vector.load %arg4[%c201, %c0_96] : memref<214x32xf32, #tpu.memory_space<vmem>>, vector<1x32xf32>
    %c203 = arith.constant 203 : index
    %c0_97 = arith.constant 0 : index
    %247 = vector.load %arg4[%c203, %c0_97] : memref<214x32xf32, #tpu.memory_space<vmem>>, vector<1x32xf32>
    %cst_98 = arith.constant dense<0.000000e+00> : vector<16xf32>
    %248 = vector.multi_reduction <add>, %245, %cst_98 [1] : vector<16x32xf32> to vector<16xf32>
    %249 = vector.shape_cast %248 : vector<16xf32> to vector<16x1xf32>
    %cst_99 = arith.constant 3.200000e+01 : f32
    %250 = vector.broadcast %cst_99 : f32 to vector<16x1xf32>
    %251 = arith.divf %249, %250 : vector<16x1xf32>
    %252 = vector.broadcast %251 : vector<16x1xf32> to vector<16x32xf32>
    %253 = arith.subf %245, %252 : vector<16x32xf32>
    %254 = arith.mulf %253, %253 : vector<16x32xf32>
    %cst_100 = arith.constant dense<0.000000e+00> : vector<16xf32>
    %255 = vector.multi_reduction <add>, %254, %cst_100 [1] : vector<16x32xf32> to vector<16xf32>
    %256 = vector.shape_cast %255 : vector<16xf32> to vector<16x1xf32>
    %cst_101 = arith.constant 3.200000e+01 : f32
    %257 = vector.broadcast %cst_101 : f32 to vector<16x1xf32>
    %258 = arith.divf %256, %257 : vector<16x1xf32>
    %259 = vector.broadcast %251 : vector<16x1xf32> to vector<16x32xf32>
    %260 = arith.subf %245, %259 : vector<16x32xf32>
    %cst_102 = arith.constant 9.99999974E-6 : f32
    %261 = vector.broadcast %cst_102 : f32 to vector<16x1xf32>
    %262 = arith.addf %258, %261 : vector<16x1xf32>
    %263 = math.rsqrt %262 : vector<16x1xf32>
    %264 = vector.broadcast %263 : vector<16x1xf32> to vector<16x32xf32>
    %265 = arith.mulf %260, %264 : vector<16x32xf32>
    %266 = vector.broadcast %246 : vector<1x32xf32> to vector<16x32xf32>
    %267 = arith.mulf %265, %266 : vector<16x32xf32>
    %268 = vector.broadcast %247 : vector<1x32xf32> to vector<16x32xf32>
    %269 = arith.addf %267, %268 : vector<16x32xf32>
    %cst_103 = arith.constant 0.000000e+00 : f32
    %270 = vector.broadcast %cst_103 : f32 to vector<16x32xf32>
    %c4 = arith.constant 4 : index
    %c0_104 = arith.constant 0 : index
    %c0_105 = arith.constant 0 : index
    %271 = vector.load %arg2[%c4, %c0_104, %c0_105] : memref<24x33x8xf32, #tpu.memory_space<vmem>>, vector<1x33x8xf32>
    %272 = vector.shape_cast %271 : vector<1x33x8xf32> to vector<33x8xf32>
    %c12 = arith.constant 12 : index
    %c0_106 = arith.constant 0 : index
    %c0_107 = arith.constant 0 : index
    %273 = vector.load %arg2[%c12, %c0_106, %c0_107] : memref<24x33x8xf32, #tpu.memory_space<vmem>>, vector<1x33x8xf32>
    %274 = vector.shape_cast %273 : vector<1x33x8xf32> to vector<33x8xf32>
    %c20 = arith.constant 20 : index
    %c0_108 = arith.constant 0 : index
    %c0_109 = arith.constant 0 : index
    %275 = vector.load %arg2[%c20, %c0_108, %c0_109] : memref<24x33x8xf32, #tpu.memory_space<vmem>>, vector<1x33x8xf32>
    %276 = vector.shape_cast %275 : vector<1x33x8xf32> to vector<33x8xf32>
    %277 = vector.extract_strided_slice %272 {offsets = [0, 0], sizes = [32, 8], strides = [1, 1]} : vector<33x8xf32> to vector<32x8xf32>
    %cst_110 = arith.constant dense<0.000000e+00> : vector<16x8xf32>
    %278 = tpu.matmul %269, %277, %cst_110 {dimension_numbers = #tpu.dot_dimension_numbers<[1], [0], [0], [1], [0, 0, 1, 1], [], []>} : vector<16x32xf32>, vector<32x8xf32>, vector<16x8xf32> -> vector<16x8xf32>
    %279 = vector.extract_strided_slice %272 {offsets = [32, 0], sizes = [1, 8], strides = [1, 1]} : vector<33x8xf32> to vector<1x8xf32>
    %280 = vector.broadcast %279 : vector<1x8xf32> to vector<16x8xf32>
    %281 = arith.addf %278, %280 : vector<16x8xf32>
    %282 = vector.extract_strided_slice %274 {offsets = [0, 0], sizes = [32, 8], strides = [1, 1]} : vector<33x8xf32> to vector<32x8xf32>
    %cst_111 = arith.constant dense<0.000000e+00> : vector<16x8xf32>
    %283 = tpu.matmul %269, %282, %cst_111 {dimension_numbers = #tpu.dot_dimension_numbers<[1], [0], [0], [1], [0, 0, 1, 1], [], []>} : vector<16x32xf32>, vector<32x8xf32>, vector<16x8xf32> -> vector<16x8xf32>
    %284 = vector.extract_strided_slice %274 {offsets = [32, 0], sizes = [1, 8], strides = [1, 1]} : vector<33x8xf32> to vector<1x8xf32>
    %285 = vector.broadcast %284 : vector<1x8xf32> to vector<16x8xf32>
    %286 = arith.addf %283, %285 : vector<16x8xf32>
    %287 = vector.extract_strided_slice %276 {offsets = [0, 0], sizes = [32, 8], strides = [1, 1]} : vector<33x8xf32> to vector<32x8xf32>
    %cst_112 = arith.constant dense<0.000000e+00> : vector<16x8xf32>
    %288 = tpu.matmul %269, %287, %cst_112 {dimension_numbers = #tpu.dot_dimension_numbers<[1], [0], [0], [1], [0, 0, 1, 1], [], []>} : vector<16x32xf32>, vector<32x8xf32>, vector<16x8xf32> -> vector<16x8xf32>
    %289 = vector.extract_strided_slice %276 {offsets = [32, 0], sizes = [1, 8], strides = [1, 1]} : vector<33x8xf32> to vector<1x8xf32>
    %290 = vector.broadcast %289 : vector<1x8xf32> to vector<16x8xf32>
    %291 = arith.addf %288, %290 : vector<16x8xf32>
    %292 = vector.shape_cast %281 : vector<16x8xf32> to vector<2x8x8xf32>
    %293 = vector.shape_cast %286 : vector<16x8xf32> to vector<2x8x8xf32>
    %294 = vector.shape_cast %291 : vector<16x8xf32> to vector<2x8x8xf32>
    "tpu.trace_start"() <{level = 10 : i32, message = "bqd,bkd->bqk"}> : () -> ()
    %cst_113 = arith.constant dense<0.000000e+00> : vector<2x8x8xf32>
    %295 = tpu.matmul %292, %293, %cst_113 {dimension_numbers = #tpu.dot_dimension_numbers<[2], [2], [1], [1], [0, 0, 0, 1, 1, 1], [0], [0]>} : vector<2x8x8xf32>, vector<2x8x8xf32>, vector<2x8x8xf32> -> vector<2x8x8xf32>
    "tpu.trace_stop"() : () -> ()
    %296 = arith.addf %295, %13 : vector<2x8x8xf32>
    %cst_114 = arith.constant dense<0xFF800000> : vector<2x8xf32>
    %297 = vector.multi_reduction <maximumf>, %296, %cst_114 [2] : vector<2x8x8xf32> to vector<2x8xf32>
    %298 = vector.shape_cast %297 : vector<2x8xf32> to vector<2x8x1xf32>
    %299 = vector.broadcast %298 : vector<2x8x1xf32> to vector<2x8x8xf32>
    %300 = arith.subf %296, %299 : vector<2x8x8xf32>
    %301 = math.exp %300 : vector<2x8x8xf32>
    %cst_115 = arith.constant dense<0.000000e+00> : vector<2x8xf32>
    %302 = vector.multi_reduction <add>, %301, %cst_115 [2] : vector<2x8x8xf32> to vector<2x8xf32>
    %303 = vector.shape_cast %302 : vector<2x8xf32> to vector<2x8x1xf32>
    %304 = tpu.reciprocal %303 {approx = true} : vector<2x8x1xf32> -> vector<2x8x1xf32>
    %305 = vector.broadcast %304 : vector<2x8x1xf32> to vector<2x8x8xf32>
    %306 = arith.mulf %301, %305 : vector<2x8x8xf32>
    "tpu.trace_start"() <{level = 10 : i32, message = "bqk,bkd->bqd"}> : () -> ()
    %cst_116 = arith.constant dense<0.000000e+00> : vector<2x8x8xf32>
    %307 = tpu.matmul %306, %294, %cst_116 {dimension_numbers = #tpu.dot_dimension_numbers<[2], [1], [1], [2], [0, 0, 0, 1, 1, 2], [0], [0]>} : vector<2x8x8xf32>, vector<2x8x8xf32>, vector<2x8x8xf32> -> vector<2x8x8xf32>
    "tpu.trace_stop"() : () -> ()
    %c32 = arith.constant 32 : index
    %c0_117 = arith.constant 0 : index
    %308 = vector.load %arg4[%c32, %c0_117] : memref<214x32xf32, #tpu.memory_space<vmem>>, vector<8x32xf32>
    %309 = vector.shape_cast %307 : vector<2x8x8xf32> to vector<16x8xf32>
    %cst_118 = arith.constant dense<0.000000e+00> : vector<16x32xf32>
    %310 = tpu.matmul %309, %308, %cst_118 {dimension_numbers = #tpu.dot_dimension_numbers<[1], [0], [0], [1], [0, 0, 1, 1], [], []>} : vector<16x8xf32>, vector<8x32xf32>, vector<16x32xf32> -> vector<16x32xf32>
    %311 = arith.addf %270, %310 : vector<16x32xf32>
    %c5 = arith.constant 5 : index
    %c0_119 = arith.constant 0 : index
    %c0_120 = arith.constant 0 : index
    %312 = vector.load %arg2[%c5, %c0_119, %c0_120] : memref<24x33x8xf32, #tpu.memory_space<vmem>>, vector<1x33x8xf32>
    %313 = vector.shape_cast %312 : vector<1x33x8xf32> to vector<33x8xf32>
    %c13 = arith.constant 13 : index
    %c0_121 = arith.constant 0 : index
    %c0_122 = arith.constant 0 : index
    %314 = vector.load %arg2[%c13, %c0_121, %c0_122] : memref<24x33x8xf32, #tpu.memory_space<vmem>>, vector<1x33x8xf32>
    %315 = vector.shape_cast %314 : vector<1x33x8xf32> to vector<33x8xf32>
    %c21 = arith.constant 21 : index
    %c0_123 = arith.constant 0 : index
    %c0_124 = arith.constant 0 : index
    %316 = vector.load %arg2[%c21, %c0_123, %c0_124] : memref<24x33x8xf32, #tpu.memory_space<vmem>>, vector<1x33x8xf32>
    %317 = vector.shape_cast %316 : vector<1x33x8xf32> to vector<33x8xf32>
    %318 = vector.extract_strided_slice %313 {offsets = [0, 0], sizes = [32, 8], strides = [1, 1]} : vector<33x8xf32> to vector<32x8xf32>
    %cst_125 = arith.constant dense<0.000000e+00> : vector<16x8xf32>
    %319 = tpu.matmul %269, %318, %cst_125 {dimension_numbers = #tpu.dot_dimension_numbers<[1], [0], [0], [1], [0, 0, 1, 1], [], []>} : vector<16x32xf32>, vector<32x8xf32>, vector<16x8xf32> -> vector<16x8xf32>
    %320 = vector.extract_strided_slice %313 {offsets = [32, 0], sizes = [1, 8], strides = [1, 1]} : vector<33x8xf32> to vector<1x8xf32>
    %321 = vector.broadcast %320 : vector<1x8xf32> to vector<16x8xf32>
    %322 = arith.addf %319, %321 : vector<16x8xf32>
    %323 = vector.extract_strided_slice %315 {offsets = [0, 0], sizes = [32, 8], strides = [1, 1]} : vector<33x8xf32> to vector<32x8xf32>
    %cst_126 = arith.constant dense<0.000000e+00> : vector<16x8xf32>
    %324 = tpu.matmul %269, %323, %cst_126 {dimension_numbers = #tpu.dot_dimension_numbers<[1], [0], [0], [1], [0, 0, 1, 1], [], []>} : vector<16x32xf32>, vector<32x8xf32>, vector<16x8xf32> -> vector<16x8xf32>
    %325 = vector.extract_strided_slice %315 {offsets = [32, 0], sizes = [1, 8], strides = [1, 1]} : vector<33x8xf32> to vector<1x8xf32>
    %326 = vector.broadcast %325 : vector<1x8xf32> to vector<16x8xf32>
    %327 = arith.addf %324, %326 : vector<16x8xf32>
    %328 = vector.extract_strided_slice %317 {offsets = [0, 0], sizes = [32, 8], strides = [1, 1]} : vector<33x8xf32> to vector<32x8xf32>
    %cst_127 = arith.constant dense<0.000000e+00> : vector<16x8xf32>
    %329 = tpu.matmul %269, %328, %cst_127 {dimension_numbers = #tpu.dot_dimension_numbers<[1], [0], [0], [1], [0, 0, 1, 1], [], []>} : vector<16x32xf32>, vector<32x8xf32>, vector<16x8xf32> -> vector<16x8xf32>
    %330 = vector.extract_strided_slice %317 {offsets = [32, 0], sizes = [1, 8], strides = [1, 1]} : vector<33x8xf32> to vector<1x8xf32>
    %331 = vector.broadcast %330 : vector<1x8xf32> to vector<16x8xf32>
    %332 = arith.addf %329, %331 : vector<16x8xf32>
    %333 = vector.shape_cast %322 : vector<16x8xf32> to vector<2x8x8xf32>
    %334 = vector.shape_cast %327 : vector<16x8xf32> to vector<2x8x8xf32>
    %335 = vector.shape_cast %332 : vector<16x8xf32> to vector<2x8x8xf32>
    "tpu.trace_start"() <{level = 10 : i32, message = "bqd,bkd->bqk"}> : () -> ()
    %cst_128 = arith.constant dense<0.000000e+00> : vector<2x8x8xf32>
    %336 = tpu.matmul %333, %334, %cst_128 {dimension_numbers = #tpu.dot_dimension_numbers<[2], [2], [1], [1], [0, 0, 0, 1, 1, 1], [0], [0]>} : vector<2x8x8xf32>, vector<2x8x8xf32>, vector<2x8x8xf32> -> vector<2x8x8xf32>
    "tpu.trace_stop"() : () -> ()
    %337 = arith.addf %336, %13 : vector<2x8x8xf32>
    %cst_129 = arith.constant dense<0xFF800000> : vector<2x8xf32>
    %338 = vector.multi_reduction <maximumf>, %337, %cst_129 [2] : vector<2x8x8xf32> to vector<2x8xf32>
    %339 = vector.shape_cast %338 : vector<2x8xf32> to vector<2x8x1xf32>
    %340 = vector.broadcast %339 : vector<2x8x1xf32> to vector<2x8x8xf32>
    %341 = arith.subf %337, %340 : vector<2x8x8xf32>
    %342 = math.exp %341 : vector<2x8x8xf32>
    %cst_130 = arith.constant dense<0.000000e+00> : vector<2x8xf32>
    %343 = vector.multi_reduction <add>, %342, %cst_130 [2] : vector<2x8x8xf32> to vector<2x8xf32>
    %344 = vector.shape_cast %343 : vector<2x8xf32> to vector<2x8x1xf32>
    %345 = tpu.reciprocal %344 {approx = true} : vector<2x8x1xf32> -> vector<2x8x1xf32>
    %346 = vector.broadcast %345 : vector<2x8x1xf32> to vector<2x8x8xf32>
    %347 = arith.mulf %342, %346 : vector<2x8x8xf32>
    "tpu.trace_start"() <{level = 10 : i32, message = "bqk,bkd->bqd"}> : () -> ()
    %cst_131 = arith.constant dense<0.000000e+00> : vector<2x8x8xf32>
    %348 = tpu.matmul %347, %335, %cst_131 {dimension_numbers = #tpu.dot_dimension_numbers<[2], [1], [1], [2], [0, 0, 0, 1, 1, 2], [0], [0]>} : vector<2x8x8xf32>, vector<2x8x8xf32>, vector<2x8x8xf32> -> vector<2x8x8xf32>
    "tpu.trace_stop"() : () -> ()
    %c40 = arith.constant 40 : index
    %c0_132 = arith.constant 0 : index
    %349 = vector.load %arg4[%c40, %c0_132] : memref<214x32xf32, #tpu.memory_space<vmem>>, vector<8x32xf32>
    %350 = vector.shape_cast %348 : vector<2x8x8xf32> to vector<16x8xf32>
    %cst_133 = arith.constant dense<0.000000e+00> : vector<16x32xf32>
    %351 = tpu.matmul %350, %349, %cst_133 {dimension_numbers = #tpu.dot_dimension_numbers<[1], [0], [0], [1], [0, 0, 1, 1], [], []>} : vector<16x8xf32>, vector<8x32xf32>, vector<16x32xf32> -> vector<16x32xf32>
    %352 = arith.addf %311, %351 : vector<16x32xf32>
    %c6 = arith.constant 6 : index
    %c0_134 = arith.constant 0 : index
    %c0_135 = arith.constant 0 : index
    %353 = vector.load %arg2[%c6, %c0_134, %c0_135] : memref<24x33x8xf32, #tpu.memory_space<vmem>>, vector<1x33x8xf32>
    %354 = vector.shape_cast %353 : vector<1x33x8xf32> to vector<33x8xf32>
    %c14 = arith.constant 14 : index
    %c0_136 = arith.constant 0 : index
    %c0_137 = arith.constant 0 : index
    %355 = vector.load %arg2[%c14, %c0_136, %c0_137] : memref<24x33x8xf32, #tpu.memory_space<vmem>>, vector<1x33x8xf32>
    %356 = vector.shape_cast %355 : vector<1x33x8xf32> to vector<33x8xf32>
    %c22 = arith.constant 22 : index
    %c0_138 = arith.constant 0 : index
    %c0_139 = arith.constant 0 : index
    %357 = vector.load %arg2[%c22, %c0_138, %c0_139] : memref<24x33x8xf32, #tpu.memory_space<vmem>>, vector<1x33x8xf32>
    %358 = vector.shape_cast %357 : vector<1x33x8xf32> to vector<33x8xf32>
    %359 = vector.extract_strided_slice %354 {offsets = [0, 0], sizes = [32, 8], strides = [1, 1]} : vector<33x8xf32> to vector<32x8xf32>
    %cst_140 = arith.constant dense<0.000000e+00> : vector<16x8xf32>
    %360 = tpu.matmul %269, %359, %cst_140 {dimension_numbers = #tpu.dot_dimension_numbers<[1], [0], [0], [1], [0, 0, 1, 1], [], []>} : vector<16x32xf32>, vector<32x8xf32>, vector<16x8xf32> -> vector<16x8xf32>
    %361 = vector.extract_strided_slice %354 {offsets = [32, 0], sizes = [1, 8], strides = [1, 1]} : vector<33x8xf32> to vector<1x8xf32>
    %362 = vector.broadcast %361 : vector<1x8xf32> to vector<16x8xf32>
    %363 = arith.addf %360, %362 : vector<16x8xf32>
    %364 = vector.extract_strided_slice %356 {offsets = [0, 0], sizes = [32, 8], strides = [1, 1]} : vector<33x8xf32> to vector<32x8xf32>
    %cst_141 = arith.constant dense<0.000000e+00> : vector<16x8xf32>
    %365 = tpu.matmul %269, %364, %cst_141 {dimension_numbers = #tpu.dot_dimension_numbers<[1], [0], [0], [1], [0, 0, 1, 1], [], []>} : vector<16x32xf32>, vector<32x8xf32>, vector<16x8xf32> -> vector<16x8xf32>
    %366 = vector.extract_strided_slice %356 {offsets = [32, 0], sizes = [1, 8], strides = [1, 1]} : vector<33x8xf32> to vector<1x8xf32>
    %367 = vector.broadcast %366 : vector<1x8xf32> to vector<16x8xf32>
    %368 = arith.addf %365, %367 : vector<16x8xf32>
    %369 = vector.extract_strided_slice %358 {offsets = [0, 0], sizes = [32, 8], strides = [1, 1]} : vector<33x8xf32> to vector<32x8xf32>
    %cst_142 = arith.constant dense<0.000000e+00> : vector<16x8xf32>
    %370 = tpu.matmul %269, %369, %cst_142 {dimension_numbers = #tpu.dot_dimension_numbers<[1], [0], [0], [1], [0, 0, 1, 1], [], []>} : vector<16x32xf32>, vector<32x8xf32>, vector<16x8xf32> -> vector<16x8xf32>
    %371 = vector.extract_strided_slice %358 {offsets = [32, 0], sizes = [1, 8], strides = [1, 1]} : vector<33x8xf32> to vector<1x8xf32>
    %372 = vector.broadcast %371 : vector<1x8xf32> to vector<16x8xf32>
    %373 = arith.addf %370, %372 : vector<16x8xf32>
    %374 = vector.shape_cast %363 : vector<16x8xf32> to vector<2x8x8xf32>
    %375 = vector.shape_cast %368 : vector<16x8xf32> to vector<2x8x8xf32>
    %376 = vector.shape_cast %373 : vector<16x8xf32> to vector<2x8x8xf32>
    "tpu.trace_start"() <{level = 10 : i32, message = "bqd,bkd->bqk"}> : () -> ()
    %cst_143 = arith.constant dense<0.000000e+00> : vector<2x8x8xf32>
    %377 = tpu.matmul %374, %375, %cst_143 {dimension_numbers = #tpu.dot_dimension_numbers<[2], [2], [1], [1], [0, 0, 0, 1, 1, 1], [0], [0]>} : vector<2x8x8xf32>, vector<2x8x8xf32>, vector<2x8x8xf32> -> vector<2x8x8xf32>
    "tpu.trace_stop"() : () -> ()
    %378 = arith.addf %377, %13 : vector<2x8x8xf32>
    %cst_144 = arith.constant dense<0xFF800000> : vector<2x8xf32>
    %379 = vector.multi_reduction <maximumf>, %378, %cst_144 [2] : vector<2x8x8xf32> to vector<2x8xf32>
    %380 = vector.shape_cast %379 : vector<2x8xf32> to vector<2x8x1xf32>
    %381 = vector.broadcast %380 : vector<2x8x1xf32> to vector<2x8x8xf32>
    %382 = arith.subf %378, %381 : vector<2x8x8xf32>
    %383 = math.exp %382 : vector<2x8x8xf32>
    %cst_145 = arith.constant dense<0.000000e+00> : vector<2x8xf32>
    %384 = vector.multi_reduction <add>, %383, %cst_145 [2] : vector<2x8x8xf32> to vector<2x8xf32>
    %385 = vector.shape_cast %384 : vector<2x8xf32> to vector<2x8x1xf32>
    %386 = tpu.reciprocal %385 {approx = true} : vector<2x8x1xf32> -> vector<2x8x1xf32>
    %387 = vector.broadcast %386 : vector<2x8x1xf32> to vector<2x8x8xf32>
    %388 = arith.mulf %383, %387 : vector<2x8x8xf32>
    "tpu.trace_start"() <{level = 10 : i32, message = "bqk,bkd->bqd"}> : () -> ()
    %cst_146 = arith.constant dense<0.000000e+00> : vector<2x8x8xf32>
    %389 = tpu.matmul %388, %376, %cst_146 {dimension_numbers = #tpu.dot_dimension_numbers<[2], [1], [1], [2], [0, 0, 0, 1, 1, 2], [0], [0]>} : vector<2x8x8xf32>, vector<2x8x8xf32>, vector<2x8x8xf32> -> vector<2x8x8xf32>
    "tpu.trace_stop"() : () -> ()
    %c48 = arith.constant 48 : index
    %c0_147 = arith.constant 0 : index
    %390 = vector.load %arg4[%c48, %c0_147] : memref<214x32xf32, #tpu.memory_space<vmem>>, vector<8x32xf32>
    %391 = vector.shape_cast %389 : vector<2x8x8xf32> to vector<16x8xf32>
    %cst_148 = arith.constant dense<0.000000e+00> : vector<16x32xf32>
    %392 = tpu.matmul %391, %390, %cst_148 {dimension_numbers = #tpu.dot_dimension_numbers<[1], [0], [0], [1], [0, 0, 1, 1], [], []>} : vector<16x8xf32>, vector<8x32xf32>, vector<16x32xf32> -> vector<16x32xf32>
    %393 = arith.addf %352, %392 : vector<16x32xf32>
    %c7 = arith.constant 7 : index
    %c0_149 = arith.constant 0 : index
    %c0_150 = arith.constant 0 : index
    %394 = vector.load %arg2[%c7, %c0_149, %c0_150] : memref<24x33x8xf32, #tpu.memory_space<vmem>>, vector<1x33x8xf32>
    %395 = vector.shape_cast %394 : vector<1x33x8xf32> to vector<33x8xf32>
    %c15 = arith.constant 15 : index
    %c0_151 = arith.constant 0 : index
    %c0_152 = arith.constant 0 : index
    %396 = vector.load %arg2[%c15, %c0_151, %c0_152] : memref<24x33x8xf32, #tpu.memory_space<vmem>>, vector<1x33x8xf32>
    %397 = vector.shape_cast %396 : vector<1x33x8xf32> to vector<33x8xf32>
    %c23 = arith.constant 23 : index
    %c0_153 = arith.constant 0 : index
    %c0_154 = arith.constant 0 : index
    %398 = vector.load %arg2[%c23, %c0_153, %c0_154] : memref<24x33x8xf32, #tpu.memory_space<vmem>>, vector<1x33x8xf32>
    %399 = vector.shape_cast %398 : vector<1x33x8xf32> to vector<33x8xf32>
    %400 = vector.extract_strided_slice %395 {offsets = [0, 0], sizes = [32, 8], strides = [1, 1]} : vector<33x8xf32> to vector<32x8xf32>
    %cst_155 = arith.constant dense<0.000000e+00> : vector<16x8xf32>
    %401 = tpu.matmul %269, %400, %cst_155 {dimension_numbers = #tpu.dot_dimension_numbers<[1], [0], [0], [1], [0, 0, 1, 1], [], []>} : vector<16x32xf32>, vector<32x8xf32>, vector<16x8xf32> -> vector<16x8xf32>
    %402 = vector.extract_strided_slice %395 {offsets = [32, 0], sizes = [1, 8], strides = [1, 1]} : vector<33x8xf32> to vector<1x8xf32>
    %403 = vector.broadcast %402 : vector<1x8xf32> to vector<16x8xf32>
    %404 = arith.addf %401, %403 : vector<16x8xf32>
    %405 = vector.extract_strided_slice %397 {offsets = [0, 0], sizes = [32, 8], strides = [1, 1]} : vector<33x8xf32> to vector<32x8xf32>
    %cst_156 = arith.constant dense<0.000000e+00> : vector<16x8xf32>
    %406 = tpu.matmul %269, %405, %cst_156 {dimension_numbers = #tpu.dot_dimension_numbers<[1], [0], [0], [1], [0, 0, 1, 1], [], []>} : vector<16x32xf32>, vector<32x8xf32>, vector<16x8xf32> -> vector<16x8xf32>
    %407 = vector.extract_strided_slice %397 {offsets = [32, 0], sizes = [1, 8], strides = [1, 1]} : vector<33x8xf32> to vector<1x8xf32>
    %408 = vector.broadcast %407 : vector<1x8xf32> to vector<16x8xf32>
    %409 = arith.addf %406, %408 : vector<16x8xf32>
    %410 = vector.extract_strided_slice %399 {offsets = [0, 0], sizes = [32, 8], strides = [1, 1]} : vector<33x8xf32> to vector<32x8xf32>
    %cst_157 = arith.constant dense<0.000000e+00> : vector<16x8xf32>
    %411 = tpu.matmul %269, %410, %cst_157 {dimension_numbers = #tpu.dot_dimension_numbers<[1], [0], [0], [1], [0, 0, 1, 1], [], []>} : vector<16x32xf32>, vector<32x8xf32>, vector<16x8xf32> -> vector<16x8xf32>
    %412 = vector.extract_strided_slice %399 {offsets = [32, 0], sizes = [1, 8], strides = [1, 1]} : vector<33x8xf32> to vector<1x8xf32>
    %413 = vector.broadcast %412 : vector<1x8xf32> to vector<16x8xf32>
    %414 = arith.addf %411, %413 : vector<16x8xf32>
    %415 = vector.shape_cast %404 : vector<16x8xf32> to vector<2x8x8xf32>
    %416 = vector.shape_cast %409 : vector<16x8xf32> to vector<2x8x8xf32>
    %417 = vector.shape_cast %414 : vector<16x8xf32> to vector<2x8x8xf32>
    "tpu.trace_start"() <{level = 10 : i32, message = "bqd,bkd->bqk"}> : () -> ()
    %cst_158 = arith.constant dense<0.000000e+00> : vector<2x8x8xf32>
    %418 = tpu.matmul %415, %416, %cst_158 {dimension_numbers = #tpu.dot_dimension_numbers<[2], [2], [1], [1], [0, 0, 0, 1, 1, 1], [0], [0]>} : vector<2x8x8xf32>, vector<2x8x8xf32>, vector<2x8x8xf32> -> vector<2x8x8xf32>
    "tpu.trace_stop"() : () -> ()
    %419 = arith.addf %418, %13 : vector<2x8x8xf32>
    %cst_159 = arith.constant dense<0xFF800000> : vector<2x8xf32>
    %420 = vector.multi_reduction <maximumf>, %419, %cst_159 [2] : vector<2x8x8xf32> to vector<2x8xf32>
    %421 = vector.shape_cast %420 : vector<2x8xf32> to vector<2x8x1xf32>
    %422 = vector.broadcast %421 : vector<2x8x1xf32> to vector<2x8x8xf32>
    %423 = arith.subf %419, %422 : vector<2x8x8xf32>
    %424 = math.exp %423 : vector<2x8x8xf32>
    %cst_160 = arith.constant dense<0.000000e+00> : vector<2x8xf32>
    %425 = vector.multi_reduction <add>, %424, %cst_160 [2] : vector<2x8x8xf32> to vector<2x8xf32>
    %426 = vector.shape_cast %425 : vector<2x8xf32> to vector<2x8x1xf32>
    %427 = tpu.reciprocal %426 {approx = true} : vector<2x8x1xf32> -> vector<2x8x1xf32>
    %428 = vector.broadcast %427 : vector<2x8x1xf32> to vector<2x8x8xf32>
    %429 = arith.mulf %424, %428 : vector<2x8x8xf32>
    "tpu.trace_start"() <{level = 10 : i32, message = "bqk,bkd->bqd"}> : () -> ()
    %cst_161 = arith.constant dense<0.000000e+00> : vector<2x8x8xf32>
    %430 = tpu.matmul %429, %417, %cst_161 {dimension_numbers = #tpu.dot_dimension_numbers<[2], [1], [1], [2], [0, 0, 0, 1, 1, 2], [0], [0]>} : vector<2x8x8xf32>, vector<2x8x8xf32>, vector<2x8x8xf32> -> vector<2x8x8xf32>
    "tpu.trace_stop"() : () -> ()
    %c56 = arith.constant 56 : index
    %c0_162 = arith.constant 0 : index
    %431 = vector.load %arg4[%c56, %c0_162] : memref<214x32xf32, #tpu.memory_space<vmem>>, vector<8x32xf32>
    %432 = vector.shape_cast %430 : vector<2x8x8xf32> to vector<16x8xf32>
    %cst_163 = arith.constant dense<0.000000e+00> : vector<16x32xf32>
    %433 = tpu.matmul %432, %431, %cst_163 {dimension_numbers = #tpu.dot_dimension_numbers<[1], [0], [0], [1], [0, 0, 1, 1], [], []>} : vector<16x8xf32>, vector<8x32xf32>, vector<16x32xf32> -> vector<16x32xf32>
    %434 = arith.addf %393, %433 : vector<16x32xf32>
    %435 = arith.addf %245, %434 : vector<16x32xf32>
    %c209 = arith.constant 209 : index
    %c0_164 = arith.constant 0 : index
    %436 = vector.load %arg4[%c209, %c0_164] : memref<214x32xf32, #tpu.memory_space<vmem>>, vector<1x32xf32>
    %437 = vector.broadcast %436 : vector<1x32xf32> to vector<16x32xf32>
    %438 = arith.addf %435, %437 : vector<16x32xf32>
    %c205 = arith.constant 205 : index
    %c0_165 = arith.constant 0 : index
    %439 = vector.load %arg4[%c205, %c0_165] : memref<214x32xf32, #tpu.memory_space<vmem>>, vector<1x32xf32>
    %c207 = arith.constant 207 : index
    %c0_166 = arith.constant 0 : index
    %440 = vector.load %arg4[%c207, %c0_166] : memref<214x32xf32, #tpu.memory_space<vmem>>, vector<1x32xf32>
    %cst_167 = arith.constant dense<0.000000e+00> : vector<16xf32>
    %441 = vector.multi_reduction <add>, %438, %cst_167 [1] : vector<16x32xf32> to vector<16xf32>
    %442 = vector.shape_cast %441 : vector<16xf32> to vector<16x1xf32>
    %cst_168 = arith.constant 3.200000e+01 : f32
    %443 = vector.broadcast %cst_168 : f32 to vector<16x1xf32>
    %444 = arith.divf %442, %443 : vector<16x1xf32>
    %445 = vector.broadcast %444 : vector<16x1xf32> to vector<16x32xf32>
    %446 = arith.subf %438, %445 : vector<16x32xf32>
    %447 = arith.mulf %446, %446 : vector<16x32xf32>
    %cst_169 = arith.constant dense<0.000000e+00> : vector<16xf32>
    %448 = vector.multi_reduction <add>, %447, %cst_169 [1] : vector<16x32xf32> to vector<16xf32>
    %449 = vector.shape_cast %448 : vector<16xf32> to vector<16x1xf32>
    %cst_170 = arith.constant 3.200000e+01 : f32
    %450 = vector.broadcast %cst_170 : f32 to vector<16x1xf32>
    %451 = arith.divf %449, %450 : vector<16x1xf32>
    %452 = vector.broadcast %444 : vector<16x1xf32> to vector<16x32xf32>
    %453 = arith.subf %438, %452 : vector<16x32xf32>
    %cst_171 = arith.constant 9.99999974E-6 : f32
    %454 = vector.broadcast %cst_171 : f32 to vector<16x1xf32>
    %455 = arith.addf %451, %454 : vector<16x1xf32>
    %456 = math.rsqrt %455 : vector<16x1xf32>
    %457 = vector.broadcast %456 : vector<16x1xf32> to vector<16x32xf32>
    %458 = arith.mulf %453, %457 : vector<16x32xf32>
    %459 = vector.broadcast %439 : vector<1x32xf32> to vector<16x32xf32>
    %460 = arith.mulf %458, %459 : vector<16x32xf32>
    %461 = vector.broadcast %440 : vector<1x32xf32> to vector<16x32xf32>
    %462 = arith.addf %460, %461 : vector<16x32xf32>
    %c1_172 = arith.constant 1 : index
    %c0_173 = arith.constant 0 : index
    %c0_174 = arith.constant 0 : index
    %463 = vector.load %arg3[%c1_172, %c0_173, %c0_174] : memref<2x33x64xf32, #tpu.memory_space<vmem>>, vector<1x33x64xf32>
    %464 = vector.shape_cast %463 : vector<1x33x64xf32> to vector<33x64xf32>
    %465 = vector.extract_strided_slice %464 {offsets = [0, 0], sizes = [32, 64], strides = [1, 1]} : vector<33x64xf32> to vector<32x64xf32>
    %cst_175 = arith.constant dense<0.000000e+00> : vector<16x64xf32>
    %466 = tpu.matmul %462, %465, %cst_175 {dimension_numbers = #tpu.dot_dimension_numbers<[1], [0], [0], [1], [0, 0, 1, 1], [], []>} : vector<16x32xf32>, vector<32x64xf32>, vector<16x64xf32> -> vector<16x64xf32>
    %467 = vector.extract_strided_slice %464 {offsets = [32, 0], sizes = [1, 64], strides = [1, 1]} : vector<33x64xf32> to vector<1x64xf32>
    %468 = vector.broadcast %467 : vector<1x64xf32> to vector<16x64xf32>
    %469 = arith.addf %466, %468 : vector<16x64xf32>
    %cst_176 = arith.constant 0.000000e+00 : f32
    %470 = vector.broadcast %cst_176 : f32 to vector<16x64xf32>
    %471 = arith.maximumf %469, %470 : vector<16x64xf32>
    %c128 = arith.constant 128 : index
    %c0_177 = arith.constant 0 : index
    %472 = vector.load %arg4[%c128, %c0_177] : memref<214x32xf32, #tpu.memory_space<vmem>>, vector<64x32xf32>
    %cst_178 = arith.constant dense<0.000000e+00> : vector<16x32xf32>
    %473 = tpu.matmul %471, %472, %cst_178 {dimension_numbers = #tpu.dot_dimension_numbers<[1], [0], [0], [1], [0, 0, 1, 1], [], []>} : vector<16x64xf32>, vector<64x32xf32>, vector<16x32xf32> -> vector<16x32xf32>
    %474 = arith.addf %438, %473 : vector<16x32xf32>
    %c211 = arith.constant 211 : index
    %c0_179 = arith.constant 0 : index
    %475 = vector.load %arg4[%c211, %c0_179] : memref<214x32xf32, #tpu.memory_space<vmem>>, vector<1x32xf32>
    %476 = vector.broadcast %475 : vector<1x32xf32> to vector<16x32xf32>
    %477 = arith.addf %474, %476 : vector<16x32xf32>
    %c212 = arith.constant 212 : index
    %c0_180 = arith.constant 0 : index
    %478 = vector.load %arg4[%c212, %c0_180] : memref<214x32xf32, #tpu.memory_space<vmem>>, vector<1x32xf32>
    %c213 = arith.constant 213 : index
    %c0_181 = arith.constant 0 : index
    %479 = vector.load %arg4[%c213, %c0_181] : memref<214x32xf32, #tpu.memory_space<vmem>>, vector<1x32xf32>
    %cst_182 = arith.constant dense<0.000000e+00> : vector<16xf32>
    %480 = vector.multi_reduction <add>, %477, %cst_182 [1] : vector<16x32xf32> to vector<16xf32>
    %481 = vector.shape_cast %480 : vector<16xf32> to vector<16x1xf32>
    %cst_183 = arith.constant 3.200000e+01 : f32
    %482 = vector.broadcast %cst_183 : f32 to vector<16x1xf32>
    %483 = arith.divf %481, %482 : vector<16x1xf32>
    %484 = vector.broadcast %483 : vector<16x1xf32> to vector<16x32xf32>
    %485 = arith.subf %477, %484 : vector<16x32xf32>
    %486 = arith.mulf %485, %485 : vector<16x32xf32>
    %cst_184 = arith.constant dense<0.000000e+00> : vector<16xf32>
    %487 = vector.multi_reduction <add>, %486, %cst_184 [1] : vector<16x32xf32> to vector<16xf32>
    %488 = vector.shape_cast %487 : vector<16xf32> to vector<16x1xf32>
    %cst_185 = arith.constant 3.200000e+01 : f32
    %489 = vector.broadcast %cst_185 : f32 to vector<16x1xf32>
    %490 = arith.divf %488, %489 : vector<16x1xf32>
    %491 = vector.broadcast %483 : vector<16x1xf32> to vector<16x32xf32>
    %492 = arith.subf %477, %491 : vector<16x32xf32>
    %cst_186 = arith.constant 9.99999974E-6 : f32
    %493 = vector.broadcast %cst_186 : f32 to vector<16x1xf32>
    %494 = arith.addf %490, %493 : vector<16x1xf32>
    %495 = math.rsqrt %494 : vector<16x1xf32>
    %496 = vector.broadcast %495 : vector<16x1xf32> to vector<16x32xf32>
    %497 = arith.mulf %492, %496 : vector<16x32xf32>
    %498 = vector.broadcast %478 : vector<1x32xf32> to vector<16x32xf32>
    %499 = arith.mulf %497, %498 : vector<16x32xf32>
    %500 = vector.broadcast %479 : vector<1x32xf32> to vector<16x32xf32>
    %501 = arith.addf %499, %500 : vector<16x32xf32>
    %502 = vector.shape_cast %501 : vector<16x32xf32> to vector<2x8x32xf32>
    %c0_187 = arith.constant 0 : index
    %c0_188 = arith.constant 0 : index
    %c0_189 = arith.constant 0 : index
    %503 = vector.load %arg5[%c0_187, %c0_188, %c0_189] : memref<2x8x32xf32, #tpu.memory_space<vmem>>, vector<2x8x32xf32>
    tpu.vector_store %arg5[%c0_187, %c0_188, %c0_189], %502 {strides = array<i32>} : memref<2x8x32xf32, #tpu.memory_space<vmem>>, vector<2x8x32xf32>,
    return
  }
}

</mosaic_0001>

<bundles_post_ra>
// kernel: tpu_custom_call.1
= control target key start
LH: loop header
LB: loop body
LE: loop exit
PB: predicated region body
PF: predicated region fallthrough
CT: control target
= control target key end

     0   :  { %vm46_vm0 = vcmask 261120   ;;  %s8112_s0 = inlined_call_operand.vmem [shape: f32[2,8,32], index: 0, kind: input, shape index: {}]   ;;  %s8113_s1 = inlined_call_operand.vmem [shape: f32[2,1,8], index: 1, kind: input, shape index: {}]   ;;  %s8114_s2 = inlined_call_operand.vmem [shape: f32[24,33,8], index: 2, kind: input, shape index: {}]   ;;  %s8115_s3 = inlined_call_operand.vmem [shape: f32[2,33,64], index: 3, kind: input, shape index: {}]   ;;  %s8116_s4 = inlined_call_operand.vmem [shape: f32[214,32], index: 4, kind: input, shape index: {}]   ;;  %s8117_s5 = inlined_call_operand.hbm [shape: f32[2,8,32], index: 5, kind: output, shape index: {}]  }
   0x1   :  { %v21_v0 = vld [vmem:[%s8116_s4 + $0xc0] sm:$0xff]  ;;  %v23_v2 = vld [vmem:[%s8112_s0 + $0x8] sm:$0xff] }
   0x2   :  { %v22_v1 = vld [vmem:[%s8112_s0] sm:$0xff]  ;;  %v7167_v4 = vadd.f32 %v23_v2, %v21_v0 }
   0x3   :  { %v7165_v3 = vadd.f32 %v22_v1, %v21_v0 }
   0x4   :  { %10 = vsyncpa [#allocation3], 0  ;;  %v50_v6 = vsel %vm46_vm0, %v7167_v4, 0.0  ;;  %v89_v17 = vld [vmem:[%s8114_s2 + $0x18] sm:$0xff]  ;;  %v88_v19 = vld [vmem:[%s8114_s2 + $0x10] sm:$0xff]  ;;  %v7120_v45 = vmov 0.0   ;;  %v34_v61 = vlaneseq }
   0x5   :  { %v47_v5 = vsel %vm46_vm0, %v7165_v3, 0.0  ;;  %6484 = vmatprep.subr.mxu0 %v89_v17  ;;  %v5945_v18 = vld [vmem:[%s8114_s2 + $0x158] sm:$0xff]  ;;  %v5944_v20 = vld [vmem:[%s8114_s2 + $0x150] sm:$0xff]  ;;  %v87_v21 = vld [vmem:[%s8114_s2 + $0x8] sm:$0xff]  ;;  %vm7121_vm1 = vmmov 0   ;;  %vm346_vm2 = vcmask 64512  }
   0x6   :  { %48 = vadd.xlane.f32.xlu0 %v47_v5  ;;  %6485 = vmatpush3.msra.mxu0 %v89_v17  ;;  %v5943_v22 = vld [vmem:[%s8114_s2 + $0x148] sm:$0xff]  ;;  %v86_v23 = vld [vmem:[%s8114_s2] sm:$0xff]  ;;  %v5950_v25 = vld [vmem:[%s8114_s2 + $0x298] sm:$0xff]  ;;  %v35_v63 = vshrl.u32 %v34_v61, 7  ;;  %v7122_v2 = vmov -1e+30  }
   0x7   :  { %6495 = vmatprep.subr.mxu1 %v5945_v18  ;;  %6486 = vmatprep.subr.mxu0 %v88_v19  ;;  %v5942_v24 = vld [vmem:[%s8114_s2 + $0x140] sm:$0xff]  ;;  %v5940_v33 = vld [vmem:[%s8116_s4 + $0xc8] ss:$0 sm:$0xff]  ;;  %v5941_v35 = vld [vmem:[%s8116_s4 + $0xca] ss:$0 sm:$0xff]  ;;  %vm2873_vm5 = vcmask 523264  }
   0x8   :  { %6496 = vmatpush3.msra.mxu1 %v5945_v18  ;;  %6487 = vmatpush3.msra.mxu0 %v88_v19  ;;  %v5949_v42 = vld [vmem:[%s8114_s2 + $0x290] sm:$0xff]  ;;  %v5948_v43 = vld [vmem:[%s8114_s2 + $0x288] sm:$0xff]  ;;  %v5947_v44 = vld [vmem:[%s8114_s2 + $0x280] sm:$0xff]  ;;  %v36_v1 = vsub.s32 0, %v35_v63  ;;  %s7123_s11 = smov [#allocation2]  }
   0x9   :  { %6497 = vmatprep.subr.mxu1 %v5944_v20  ;;  %6488 = vmatprep.subr.mxu0 %v87_v21  ;;  %v5955_v46 = vld [vmem:[%s8114_s2 + $0x160] ss:$0 sm:$0xff]  ;;  %v27_v62 = vld [vmem:[%s8113_s1 + $0x1] sm:$0x1]  ;;  %v5988_v61 = vld [vmem:[%s8114_s2 + $0x2c8] ss:$0 sm:$0xff] }
   0xa   :  { %51 = vadd.xlane.f32.xlu0 %v50_v6  ;;  %6498 = vmatpush3.msra.mxu1 %v5944_v20  ;;  %v5952_v49 = vld [vmem:[%s8114_s2 + $0x20] ss:$0 sm:$0xff]  ;;  %vm29_vm3 = vcmp.gt.f32.partialorder %v27_v62, 0.0  ;;  %s5929_s12 = sshll.u32 %s7123_s11, 4  ;;  %s5930_s12 = int_to_ptr.vmem [resolvable:$true] %s5929_s12 }
   0xb   :  { %6489 = vmatpush3.msra.mxu0 %v87_v21  ;;  %6499 = vmatprep.subr.mxu1 %v5943_v22  ;;  %v5958_v56 = vld [vmem:[%s8114_s2 + $0x2a0] ss:$0 sm:$0xff]  ;;  %v31_v5 = vsel %vm29_vm3, 0.0, %v7122_v2  ;;  %s7098_s13 = scalar_lea.vmem %s5930_s12, 256  ;;  %p7103_p1 = scmp.lt.s32.totalorder %s5930_s12, %s5930_s12 }
   0xc   :  { %6490 = vmatprep.subr.mxu0 %v86_v23  ;;  %6500 = vmatpush3.msra.mxu1 %v5943_v22  ;;  %v26_v0 = vld [vmem:[%s8113_s1] sm:$0x1]  ;;  %p7099_p0 = scmp.ne.s32.totalorder %s5930_s12, %s7098_s13  ;;  %p7104_p2 = scmp.lt.s32.totalorder %s7098_s13, %s7098_s13 }
   0xd   :  { %6491 = vmatpush3.msra.mxu0 %v86_v23  ;;  %6501 = vmatprep.subr.mxu1 %v5942_v24  ;;  %vm28_vm4 = vcmp.gt.f32.partialorder %v26_v0, 0.0 }
   0xe   :  { %6502 = vmatpush3.msra.mxu1 %v5942_v24  ;;  %6506 = vmatprep.subr.mxu0 %v5950_v25  ;;  %v30_v6 = vsel %vm28_vm4, 0.0, %v7122_v2  ;;  %p7105_p3 = por %p7104_p2, %p7103_p1 }
   0xf   :  { %6522 = vmatprep.subr.mxu1 %v7120_v45 }
  0x10   :  { %p7106_p4 = pnand %p7105_p3, %p7099_p0 }
  0x8f   :  { %v49_v7 = vpop.xlane.xlu0 %48 }
  0x90   :  { %v54_v8 = vmul.f32 0.03125, %v49_v7  ;;  %v7266_v7 = vrot.slane %v31_v5, %v36_v1 }
  0x92   :  { %v56_v9 = vsub.f32 %v7165_v3, %v54_v8  ;;  %v7268_v8 = vrot.slane %v30_v6, %v36_v1 }
  0x93   :  { %v52_v10 = vpop.xlane.xlu0 %51 }
  0x94   :  { %v55_v11 = vmul.f32 0.03125, %v52_v10  ;;  %v58_v12 = vmul.f32 %v56_v9, %v56_v9 }
  0x96   :  { %v57_v13 = vsub.f32 %v7167_v4, %v55_v11  ;;  %v60_v14 = vsel %vm46_vm0, %v58_v12, 0.0 }
  0x97   :  { %61 = vadd.xlane.f32.xlu1 %v60_v14 }
  0x98   :  { %v59_v15 = vmul.f32 %v57_v13, %v57_v13 }
  0x9a   :  { %v63_v16 = vsel %vm46_vm0, %v59_v15, 0.0 }
  0x9b   :  { %64 = vadd.xlane.f32.xlu1 %v63_v16 }
 0x120   :  { %v62_v26 = vpop.xlane.xlu1 %61 }
 0x121   :  { %v66_v27 = vmul.f32 0.03125, %v62_v26 }
 0x123   :  { %v68_v28 = vadd.f32 1e-05, %v66_v27  ;;  %v5975_v27 = vld [vmem:[%s8114_s2 + $0x180] sm:$0xff] }
 0x124   :  { %v65_v29 = vpop.xlane.xlu1 %64 }
 0x125   :  { %7014 = vrsqrt.f32 %v68_v28  ;;  %v67_v30 = vmul.f32 0.03125, %v65_v29  ;;  %v5970_v28 = vld [vmem:[%s8114_s2 + $0x40] sm:$0xff] }
 0x127   :  { %v69_v31 = vadd.f32 1e-05, %v67_v30 }
 0x129   :  { %7016 = vrsqrt.f32 %v69_v31 }
 0x132   :  { %v7015_v32 = vpop.eup %7014 }
 0x133   :  { %v72_v34 = vmul.f32 %v7015_v32, %v56_v9 }
 0x135   :  { %v78_v36 = vmul.f32 %v5940_v33, %v72_v34  ;;  %v5974_v34 = vld [vmem:[%s8114_s2 + $0x178] sm:$0xff] }
 0x136   :  { %v7017_v37 = vpop.eup %7016 }
 0x137   :  { %v7210_v38 = vadd.f32 %v5941_v35, %v78_v36  ;;  %v73_v39 = vmul.f32 %v7017_v37, %v57_v13  ;;  %v5969_v36 = vld [vmem:[%s8114_s2 + $0x38] sm:$0xff]  ;;  %v5973_v37 = vld [vmem:[%s8114_s2 + $0x170] sm:$0xff] }
 0x139   :  { %v79_v40 = vmul.f32 %v5940_v33, %v73_v39  ;;  %6492 = vmatprep.mubr.msk.f32.mxu0 %vm46_vm0, %v7210_v38  ;;  %6503 = vmatprep.mubr.msk.f32.mxu1 %vm46_vm0, %v7210_v38  ;;  %v5968_v39 = vld [vmem:[%s8114_s2 + $0x30] sm:$0xff] }
 0x13b   :  { %v7216_v41 = vadd.f32 %v5941_v35, %v79_v40  ;;  %v5972_v40 = vld [vmem:[%s8114_s2 + $0x168] sm:$0xff] }
 0x13d   :  { %6493 = vmatmul.mubr.msk.f32.vlgmr.msra.gmra.mxu0 %vm46_vm0, %v7216_v41  ;;  %6504 = vmatmul.mubr.msk.f32.vlgmr.msra.gmra.mxu1 %vm46_vm0, %v7216_v41 }
 0x13e   :  { %6507 = vmatpush3.msra.mxu0 %v5950_v25  ;;  %6514 = vmatprep.mubr.msk.f32.mxu0 %vm46_vm0, %v7210_v38 }
 0x13f   :  { %6508 = vmatprep.subr.mxu0 %v5949_v42  ;;  %6524 = vmatprep.mubr.msk.f32.mxu1 %vm7121_vm1, %v7120_v45 }
 0x140   :  { %6509 = vmatpush3.msra.mxu0 %v5949_v42  ;;  %v5967_v42 = vld [vmem:[%s8114_s2 + $0x28] sm:$0xff] }
 0x141   :  { %6510 = vmatprep.subr.mxu0 %v5948_v43 }
 0x142   :  { %6511 = vmatpush3.msra.mxu0 %v5948_v43  ;;  %v5980_v43 = vld [vmem:[%s8114_s2 + $0x2c0] sm:$0xff] }
 0x143   :  { %6512 = vmatprep.subr.mxu0 %v5947_v44 }
 0x144   :  { %6513 = vmatpush3.msra.mxu0 %v5947_v44  ;;  %v5979_v44 = vld [vmem:[%s8114_s2 + $0x2b8] sm:$0xff] }
 0x145   :  { %6515 = vmatmul.mubr.msk.f32.vlgmr.msra.gmra.mxu0 %vm46_vm0, %v7216_v41  ;;  %6517 = vmatprep.subr.mxu0 %v7120_v45 }
 0x146   :  { %6519 = vmatprep.mubr.msk.f32.mxu0 %vm7121_vm1, %v7120_v45 }
 0x1fd   :  { %v6494_v47 = vpop.f32.mrf.mxu0  ;;  %v6505_v48 = vpop.f32.mrf.mxu1 }
 0x1fe   :  { %v264_v50 = vadd.f32 %v6505_v48, %v5955_v46  ;;  %v185_v54 = vadd.f32 %v6494_v47, %v5952_v49  ;;  %v5977_v47 = vld [vmem:[%s8114_s2 + $0x2a8] sm:$0xff] }
 0x1ff   :  { %v258_v51 = vpop.f32.mrf.mxu1  ;;  %v179_v52 = vpop.f32.mrf.mxu0 }
 0x200   :  { %v259_v53 = vadd.f32 %v5955_v46, %v258_v51  ;;  %6523 = vmatpush3.xpose.msk.msra.mxu1 %vm346_vm2, %v264_v50  ;;  %v180_v55 = vadd.f32 %v5952_v49, %v179_v52  ;;  %v5978_v46 = vld [vmem:[%s8114_s2 + $0x2b0] sm:$0xff] }
 0x201   :  { %6532 = vmatprep.subr.mxu1 %v7120_v45 }
 0x202   :  { %6518 = vmatpush3.xpose.msk.msra.mxu0 %vm346_vm2, %v259_v53 }
 0x203   :  { %6525 = vmatmul.mubr.msk.f32.vlgmr.msra.gmra.mxu1 %vm346_vm2, %v185_v54  ;;  %6527 = vmatprep.subr.mxu0 %v7120_v45  ;;  %v5985_v54 = vld [vmem:[%s8114_s2 + $0x188] ss:$0 sm:$0xff] }
 0x204   :  { %6534 = vmatprep.mubr.msk.f32.mxu1 %vm7121_vm1, %v7120_v45 }
 0x205   :  { %v6516_v57 = vpop.f32.mrf.mxu0  ;;  %6520 = vmatmul.mubr.msk.f32.vlgmr.msra.gmra.mxu0 %vm346_vm2, %v180_v55 }
 0x206   :  { %v343_v58 = vadd.f32 %v6516_v57, %v5958_v56  ;;  %6529 = vmatprep.mubr.msk.f32.mxu0 %vm7121_vm1, %v7120_v45 }
 0x207   :  { %v337_v59 = vpop.f32.mrf.mxu0 }
 0x208   :  { %v338_v60 = vadd.f32 %v5958_v56, %v337_v59  ;;  %6533 = vmatpush3.msra.mxu1 %v343_v58  ;;  %v5982_v56 = vld [vmem:[%s8114_s2 + $0x48] ss:$0 sm:$0xff] }
 0x209   :  { %6548 = vmatprep.subr.mxu1 %v5975_v27 }
 0x20a   :  { %6528 = vmatpush3.msra.mxu0 %v338_v60 }
 0x20b   :  { %6537 = vmatprep.subr.mxu0 %v5970_v28 }
 0x2c3   :  { %v495_v9 = vpop.f32.mrf.mxu1 }
 0x2c4   :  { %v496_v10 = vadd.f32 %v495_v9, %v7266_v7 }
 0x2c5   :  { %v419_v11 = vpop.f32.mrf.mxu0  ;;  %v6526_v12 = vpop.f32.mrf.mxu1 }
 0x2c6   :  { %v420_v13 = vadd.f32 %v419_v11, %v7268_v8  ;;  %v502_v14 = vsel %vm346_vm2, %v496_v10, -inf }
 0x2c7   :  { %503 = vmax.xlane.f32.xlu0 %v502_v14  ;;  %v6521_v15 = vpop.f32.mrf.mxu0 }
 0x2c8   :  { %v499_v16 = vsel %vm346_vm2, %v420_v13, -inf }
 0x2c9   :  { %500 = vmax.xlane.f32.xlu1 %v499_v16 }
 0x350   :  { %v504_v17 = vpop.xlane.xlu0 %503 }
 0x351   :  { %v506_v18 = vsub.f32 %v496_v10, %v504_v17 }
 0x352   :  { %v501_v19 = vpop.xlane.xlu1 %500 }
 0x353   :  { %v509_v20 = vmul.f32 1.442695, %v506_v18  ;;  %v505_v21 = vsub.f32 %v420_v13, %v501_v19 }
 0x355   :  { %7018 = vpow2.f32 %v509_v20  ;;  %v507_v22 = vmul.f32 1.442695, %v505_v21 }
 0x357   :  { %7020 = vpow2.f32 %v507_v22 }
 0x362   :  { %v7019_v23 = vpop.eup %7018 }
 0x363   :  { %v514_v24 = vsel %vm346_vm2, %v7019_v23, 0.0 }
 0x364   :  { %v7021_v25 = vpop.eup %7020  ;;  %515 = vadd.xlane.f32.xlu0 %v514_v24 }
 0x365   :  { %v511_v26 = vsel %vm346_vm2, %v7021_v25, 0.0 }
 0x366   :  { %512 = vadd.xlane.f32.xlu1 %v511_v26 }
 0x3ed   :  { %v516_v29 = vpop.xlane.xlu0 %515 }
 0x3ee   :  { %7022 = vrcp.f32 %v516_v29 }
 0x3ef   :  { %v513_v30 = vpop.xlane.xlu1 %512 }
 0x3f0   :  { %7024 = vrcp.f32 %v513_v30 }
 0x3fb   :  { %v7023_v31 = vpop.eup %7022 }
 0x3fc   :  { %v520_v32 = vmul.f32 %v7023_v31, %v7019_v23 }
 0x3fd   :  { %v7025_v33 = vpop.eup %7024 }
 0x3fe   :  { %6535 = vmatmul.mubr.msk.f32.vlgmr.msra.gmra.mxu1 %vm346_vm2, %v520_v32  ;;  %v519_v35 = vmul.f32 %v7025_v33, %v7021_v25  ;;  %v667_v25 = vld [vmem:[%s8116_s4] sm:$0xff]  ;;  %v6009_v32 = vld [vmem:[%s8114_s2 + $0x1a8] sm:$0xff] }
 0x3ff   :  { %6549 = vmatpush3.msra.mxu1 %v5975_v27  ;;  %6556 = vmatprep.mubr.msk.f32.mxu1 %vm46_vm0, %v7210_v38  ;;  %v6008_v33 = vld [vmem:[%s8114_s2 + $0x1a0] sm:$0xff] }
 0x400   :  { %6550 = vmatprep.subr.mxu1 %v5974_v34  ;;  %6530 = vmatmul.mubr.msk.f32.vlgmr.msra.gmra.mxu0 %vm346_vm2, %v519_v35  ;;  %v6006_v35 = vld [vmem:[%s8114_s2 + $0x190] sm:$0xff] }
 0x401   :  { %6538 = vmatpush3.msra.mxu0 %v5970_v28  ;;  %6551 = vmatpush3.msra.mxu1 %v5974_v34  ;;  %v6007_v34 = vld [vmem:[%s8114_s2 + $0x198] sm:$0xff] }
 0x402   :  { %6539 = vmatprep.subr.mxu0 %v5969_v36  ;;  %6545 = vmatprep.mubr.msk.f32.mxu0 %vm46_vm0, %v7210_v38 }
 0x403   :  { %6552 = vmatprep.subr.mxu1 %v5973_v37  ;;  %6540 = vmatpush3.msra.mxu0 %v5969_v36  ;;  %v1243_v36 = vld [vmem:[%s8116_s4 + $0x8] sm:$0xff] }
 0x404   :  { %6553 = vmatpush3.msra.mxu1 %v5973_v37  ;;  %6541 = vmatprep.subr.mxu0 %v5968_v39  ;;  %v6004_v37 = vld [vmem:[%s8114_s2 + $0x68] sm:$0xff] }
 0x405   :  { %6554 = vmatprep.subr.mxu1 %v5972_v40  ;;  %6542 = vmatpush3.msra.mxu0 %v5968_v39 }
 0x406   :  { %6555 = vmatpush3.msra.mxu1 %v5972_v40  ;;  %6543 = vmatprep.subr.mxu0 %v5967_v42 }
 0x407   :  { %6557 = vmatmul.mubr.msk.f32.vlgmr.msra.gmra.mxu1 %vm46_vm0, %v7216_v41  ;;  %6544 = vmatpush3.msra.mxu0 %v5967_v42 }
 0x408   :  { %6546 = vmatmul.mubr.msk.f32.vlgmr.msra.gmra.mxu0 %vm46_vm0, %v7216_v41  ;;  %6559 = vmatprep.subr.mxu0 %v5980_v43 }
 0x409   :  { %6560 = vmatpush3.msra.mxu0 %v5980_v43  ;;  %6567 = vmatprep.mubr.msk.f32.mxu0 %vm46_vm0, %v7210_v38  ;;  %v6003_v43 = vld [vmem:[%s8114_s2 + $0x60] sm:$0xff] }
 0x40a   :  { %6561 = vmatprep.subr.mxu0 %v5979_v44  ;;  %6570 = vmatprep.subr.mxu1 %v7120_v45 }
 0x40b   :  { %6562 = vmatpush3.msra.mxu0 %v5979_v44  ;;  %6572 = vmatprep.mubr.msk.f32.mxu1 %vm7121_vm1, %v7120_v45 }
 0x40c   :  { %6563 = vmatprep.subr.mxu0 %v5978_v46 }
 0x40d   :  { %6564 = vmatpush3.msra.mxu0 %v5978_v46  ;;  %v6002_v46 = vld [vmem:[%s8114_s2 + $0x58] sm:$0xff] }
 0x40e   :  { %6565 = vmatprep.subr.mxu0 %v5977_v47 }
 0x40f   :  { %6566 = vmatpush3.msra.mxu0 %v5977_v47  ;;  %v6001_v47 = vld [vmem:[%s8114_s2 + $0x50] sm:$0xff] }
 0x410   :  { %6568 = vmatmul.mubr.msk.f32.vlgmr.msra.gmra.mxu0 %vm46_vm0, %v7216_v41  ;;  %6580 = vmatprep.subr.mxu0 %v7120_v45 }
 0x411   :  { %6582 = vmatprep.mubr.msk.f32.mxu0 %vm7121_vm1, %v7120_v45 }
 0x4be   :  { %v7332_v48 = vpop.f32.mrf.mxu1 }
 0x4c0   :  { %v7334_v49 = vpop.f32.mrf.mxu0  ;;  %v6536_v50 = vpop.f32.mrf.mxu1 }
 0x4c1   :  { %v6013_v50 = vld [vmem:[%s8114_s2 + $0x2e0] sm:$0xff] }
 0x4c2   :  { %v6531_v51 = vpop.f32.mrf.mxu0 }
 0x4c7   :  { %v6558_v52 = vpop.f32.mrf.mxu1 }
 0x4c8   :  { %v6547_v53 = vpop.f32.mrf.mxu0  ;;  %v841_v60 = vadd.f32 %v6558_v52, %v5985_v54  ;;  %v6019_v52 = vld [vmem:[%s8114_s2 + $0x1b0] ss:$0 sm:$0xff] }
 0x4c9   :  { %v835_v55 = vpop.f32.mrf.mxu1  ;;  %v762_v63 = vadd.f32 %v6547_v53, %v5982_v56  ;;  %v6012_v53 = vld [vmem:[%s8114_s2 + $0x2d8] sm:$0xff] }
 0x4ca   :  { %v836_v57 = vadd.f32 %v5985_v54, %v835_v55  ;;  %v756_v58 = vpop.f32.mrf.mxu0  ;;  %v6011_v55 = vld [vmem:[%s8114_s2 + $0x2d0] sm:$0xff] }
 0x4cb   :  { %v757_v59 = vadd.f32 %v5982_v56, %v756_v58 }
 0x4cc   :  { %6571 = vmatpush3.xpose.msk.msra.mxu1 %vm346_vm2, %v836_v57 }
 0x4cd   :  { %6575 = vmatprep.subr.mxu1 %v7120_v45 }
 0x4cf   :  { %6573 = vmatmul.mubr.msk.f32.vlgmr.msra.gmra.mxu1 %vm346_vm2, %v757_v59 }
 0x4d0   :  { %6576 = vmatpush3.xpose.msk.msra.mxu1 %vm346_vm2, %v841_v60  ;;  %v6569_v62 = vpop.f32.mrf.mxu0  ;;  %6577 = vmatprep.mubr.msk.f32.mxu1 %vm7121_vm1, %v7120_v45 }
 0x4d1   :  { %v920_v0 = vadd.f32 %v6569_v62, %v5988_v61  ;;  %6585 = vmatprep.subr.mxu1 %v7120_v45  ;;  %v6016_v62 = vld [vmem:[%s8114_s2 + $0x70] ss:$0 sm:$0xff] }
 0x4d2   :  { %v914_v1 = vpop.f32.mrf.mxu0 }
 0x4d3   :  { %v915_v2 = vadd.f32 %v5988_v61, %v914_v1  ;;  %6578 = vmatmul.mubr.msk.f32.vlgmr.msra.gmra.mxu1 %vm346_vm2, %v762_v63  ;;  %v6022_v1 = vld [vmem:[%s8114_s2 + $0x2f0] ss:$0 sm:$0xff] }
 0x4d4   :  { %6586 = vmatpush3.msra.mxu1 %v920_v0  ;;  %6587 = vmatprep.mubr.msk.f32.mxu1 %vm7121_vm1, %v7120_v45 }
 0x4d5   :  { %6581 = vmatpush3.msra.mxu0 %v915_v2  ;;  %6595 = vmatprep.subr.mxu1 %v667_v25 }
 0x4d6   :  { %6590 = vmatprep.subr.mxu0 %v1243_v36 }
 0x58f   :  { %v995_v5 = vpop.f32.mrf.mxu1 }
 0x590   :  { %v996_v6 = vadd.f32 %v995_v5, %v7268_v8 }
 0x591   :  { %v6574_v9 = vpop.f32.mrf.mxu1 }
 0x592   :  { %v1075_v10 = vsel %vm346_vm2, %v996_v6, -inf }
 0x593   :  { %1076 = vmax.xlane.f32.xlu0 %v1075_v10  ;;  %v1071_v11 = vpop.f32.mrf.mxu1 }
 0x594   :  { %v1072_v12 = vadd.f32 %v1071_v11, %v7266_v7 }
 0x595   :  { %v6579_v13 = vpop.f32.mrf.mxu1 }
 0x596   :  { %v1078_v14 = vsel %vm346_vm2, %v1072_v12, -inf }
 0x597   :  { %1079 = vmax.xlane.f32.xlu1 %v1078_v14 }
 0x61c   :  { %v1077_v15 = vpop.xlane.xlu0 %1076 }
 0x61d   :  { %v1081_v16 = vsub.f32 %v996_v6, %v1077_v15 }
 0x61f   :  { %v1083_v17 = vmul.f32 1.442695, %v1081_v16 }
 0x620   :  { %v1080_v18 = vpop.xlane.xlu1 %1079 }
 0x621   :  { %7026 = vpow2.f32 %v1083_v17  ;;  %v1082_v19 = vsub.f32 %v1072_v12, %v1080_v18 }
 0x623   :  { %v1085_v20 = vmul.f32 1.442695, %v1082_v19 }
 0x625   :  { %7028 = vpow2.f32 %v1085_v20 }
 0x62e   :  { %v7027_v21 = vpop.eup %7026 }
 0x62f   :  { %v1087_v22 = vsel %vm346_vm2, %v7027_v21, 0.0 }
 0x630   :  { %1088 = vadd.xlane.f32.xlu0 %v1087_v22 }
 0x632   :  { %v7029_v23 = vpop.eup %7028 }
 0x633   :  { %v1090_v24 = vsel %vm346_vm2, %v7029_v23, 0.0 }
 0x634   :  { %1091 = vadd.xlane.f32.xlu1 %v1090_v24 }
 0x6b9   :  { %v1089_v26 = vpop.xlane.xlu0 %1088 }
 0x6ba   :  { %7030 = vrcp.f32 %v1089_v26 }
 0x6bd   :  { %v1092_v27 = vpop.xlane.xlu1 %1091 }
 0x6be   :  { %7032 = vrcp.f32 %v1092_v27 }
 0x6c7   :  { %v7031_v28 = vpop.eup %7030 }
 0x6c8   :  { %v1095_v29 = vmul.f32 %v7031_v28, %v7027_v21 }
 0x6ca   :  { %6583 = vmatmul.mubr.msk.f32.vlgmr.msra.gmra.mxu0 %vm346_vm2, %v1095_v29  ;;  %v6036_v29 = vld [vmem:[%s8114_s2 + $0x90] sm:$0xff] }
 0x6cb   :  { %v7033_v30 = vpop.eup %7032  ;;  %6591 = vmatpush3.msra.mxu0 %v1243_v36  ;;  %v6035_v36 = vld [vmem:[%s8114_s2 + $0x88] sm:$0xff] }
 0x6cc   :  { %v1096_v31 = vmul.f32 %v7033_v30, %v7029_v23  ;;  %6600 = vmatprep.subr.mxu0 %v6004_v37 }
 0x6ce   :  { %6588 = vmatmul.mubr.msk.f32.vlgmr.msra.gmra.mxu1 %vm346_vm2, %v1096_v31 }
 0x6cf   :  { %6597 = vmatprep.mubr.msk.f32.mxu1 %vm346_vm2, %v7334_v49  ;;  %6596 = vmatpush3.msra.mxu1 %v667_v25  ;;  %v6014_v49 = vld [vmem:[%s8114_s2 + $0x2e8] sm:$0xff] }
 0x6d0   :  { %6611 = vmatprep.subr.mxu1 %v6009_v32 }
 0x6d2   :  { %6598 = vmatmul.mubr.msk.f32.vlgmr.msra.gmra.mxu1 %vm346_vm2, %v7332_v48 }
 0x6d3   :  { %6612 = vmatpush3.msra.mxu1 %v6009_v32  ;;  %6619 = vmatprep.mubr.msk.f32.mxu1 %vm46_vm0, %v7210_v38 }
 0x6d4   :  { %6613 = vmatprep.subr.mxu1 %v6008_v33 }
 0x6d5   :  { %6614 = vmatpush3.msra.mxu1 %v6008_v33 }
 0x6d6   :  { %6615 = vmatprep.subr.mxu1 %v6007_v34 }
 0x6d7   :  { %6616 = vmatpush3.msra.mxu1 %v6007_v34 }
 0x6d8   :  { %6617 = vmatprep.subr.mxu1 %v6006_v35 }
 0x6d9   :  { %6618 = vmatpush3.msra.mxu1 %v6006_v35 }
 0x6da   :  { %6620 = vmatmul.mubr.msk.f32.vlgmr.msra.gmra.mxu1 %vm46_vm0, %v7216_v41  ;;  %6633 = vmatprep.subr.mxu1 %v7120_v45 }
 0x6db   :  { %6635 = vmatprep.mubr.msk.f32.mxu1 %vm7121_vm1, %v7120_v45 }
 0x78a   :  { %v1166_v39 = vpop.f32.mrf.mxu0 }
 0x78b   :  { %6592 = vmatprep.mubr.msk.f32.mxu0 %vm346_vm2, %v1166_v39  ;;  %v6033_v39 = vld [vmem:[%s8114_s2 + $0x78] sm:$0xff] }
 0x78c   :  { %v6584_v40 = vpop.f32.mrf.mxu0 }
 0x78d   :  { %v6046_v40 = vld [vmem:[%s8114_s2 + $0x310] sm:$0xff] }
 0x78e   :  { %v1239_v42 = vpop.f32.mrf.mxu1 }
 0x78f   :  { %6593 = vmatmul.mubr.msk.f32.vlgmr.msra.gmra.mxu0 %vm346_vm2, %v1239_v42  ;;  %v6045_v42 = vld [vmem:[%s8114_s2 + $0x308] sm:$0xff] }
 0x790   :  { %6601 = vmatpush3.msra.mxu0 %v6004_v37  ;;  %v6589_v44 = vpop.f32.mrf.mxu1  ;;  %6608 = vmatprep.mubr.msk.f32.mxu0 %vm46_vm0, %v7210_v38  ;;  %v6034_v37 = vld [vmem:[%s8114_s2 + $0x80] sm:$0xff] }
 0x791   :  { %6602 = vmatprep.subr.mxu0 %v6003_v43  ;;  %v6043_v44 = vld [vmem:[%s8114_s2 + $0x2f8] sm:$0xff] }
 0x792   :  { %6603 = vmatpush3.msra.mxu0 %v6003_v43  ;;  %v7408_v48 = vpop.f32.mrf.mxu1  ;;  %v6044_v43 = vld [vmem:[%s8114_s2 + $0x300] sm:$0xff] }
 0x793   :  { %6604 = vmatprep.subr.mxu0 %v6002_v46 }
 0x794   :  { %6605 = vmatpush3.msra.mxu0 %v6002_v46  ;;  %v7418_v51 = vpop.f32.mrf.mxu1  ;;  %v1981_v46 = vld [vmem:[%s8116_s4 + $0x10] sm:$0xff] }
 0x795   :  { %6606 = vmatprep.subr.mxu0 %v6001_v47 }
 0x796   :  { %6607 = vmatpush3.msra.mxu0 %v6001_v47  ;;  %v6041_v47 = vld [vmem:[%s8114_s2 + $0x1d0] sm:$0xff] }
 0x797   :  { %6609 = vmatmul.mubr.msk.f32.vlgmr.msra.gmra.mxu0 %vm46_vm0, %v7216_v41  ;;  %6622 = vmatprep.subr.mxu0 %v6014_v49 }
 0x798   :  { %6623 = vmatpush3.msra.mxu0 %v6014_v49  ;;  %6630 = vmatprep.mubr.msk.f32.mxu0 %vm46_vm0, %v7210_v38 }
 0x799   :  { %6624 = vmatprep.subr.mxu0 %v6013_v50 }
 0x79a   :  { %v6621_v54 = vpop.f32.mrf.mxu1  ;;  %6625 = vmatpush3.msra.mxu0 %v6013_v50 }
 0x79b   :  { %v1579_v56 = vadd.f32 %v6621_v54, %v6019_v52  ;;  %6626 = vmatprep.subr.mxu0 %v6012_v53 }
 0x79c   :  { %v1573_v57 = vpop.f32.mrf.mxu1  ;;  %6627 = vmatpush3.msra.mxu0 %v6012_v53  ;;  %v6040_v53 = vld [vmem:[%s8114_s2 + $0x1c8] sm:$0xff] }
 0x79d   :  { %v1574_v58 = vadd.f32 %v6019_v52, %v1573_v57  ;;  %6628 = vmatprep.subr.mxu0 %v6011_v55 }
 0x79e   :  { %6629 = vmatpush3.msra.mxu0 %v6011_v55  ;;  %v6039_v55 = vld [vmem:[%s8114_s2 + $0x1c0] sm:$0xff] }
 0x79f   :  { %6631 = vmatmul.mubr.msk.f32.vlgmr.msra.gmra.mxu0 %vm46_vm0, %v7216_v41  ;;  %6634 = vmatpush3.xpose.msk.msra.mxu1 %vm346_vm2, %v1574_v58  ;;  %v6054_v58 = vld [vmem:[%s8114_s2 + $0x318] ss:$0 sm:$0xff] }
 0x7a0   :  { %6638 = vmatprep.subr.mxu1 %v7120_v45  ;;  %6643 = vmatprep.subr.mxu0 %v7120_v45 }
 0x7a1   :  { %6645 = vmatprep.mubr.msk.f32.mxu0 %vm7121_vm1, %v7120_v45 }
 0x84f   :  { %v7438_v59 = vpop.f32.mrf.mxu0 }
 0x851   :  { %v7440_v60 = vpop.f32.mrf.mxu0 }
 0x857   :  { %v6610_v61 = vpop.f32.mrf.mxu0 }
 0x858   :  { %v1500_v2 = vadd.f32 %v6610_v61, %v6016_v62 }
 0x859   :  { %v1494_v63 = vpop.f32.mrf.mxu0 }
 0x85a   :  { %v1495_v0 = vadd.f32 %v6016_v62, %v1494_v63 }
 0x85c   :  { %6636 = vmatmul.mubr.msk.f32.vlgmr.msra.gmra.mxu1 %vm346_vm2, %v1495_v0 }
 0x85d   :  { %6639 = vmatpush3.xpose.msk.msra.mxu1 %vm346_vm2, %v1579_v56  ;;  %6640 = vmatprep.mubr.msk.f32.mxu1 %vm7121_vm1, %v7120_v45  ;;  %v6038_v56 = vld [vmem:[%s8114_s2 + $0x1b8] sm:$0xff] }
 0x85e   :  { %6648 = vmatprep.subr.mxu1 %v7120_v45 }
 0x85f   :  { %v6632_v5 = vpop.f32.mrf.mxu0 }
 0x860   :  { %v1658_v6 = vadd.f32 %v6632_v5, %v6022_v1  ;;  %6641 = vmatmul.mubr.msk.f32.vlgmr.msra.gmra.mxu1 %vm346_vm2, %v1500_v2  ;;  %v1398_v2 = vadd.f32 %v7418_v51, %v7440_v60 }
 0x861   :  { %v1652_v9 = vpop.f32.mrf.mxu0  ;;  %6650 = vmatprep.mubr.msk.f32.mxu1 %vm7121_vm1, %v7120_v45 }
 0x862   :  { %v1653_v10 = vadd.f32 %v6022_v1, %v1652_v9  ;;  %6649 = vmatpush3.msra.mxu1 %v1658_v6  ;;  %v1403_v1 = vadd.f32 %v7408_v48, %v7438_v59  ;;  %v6048_v48 = vld [vmem:[%s8114_s2 + $0x98] ss:$0 sm:$0xff] }
 0x863   :  { %6658 = vmatprep.subr.mxu1 %v6036_v29 }
 0x864   :  { %6644 = vmatpush3.msra.mxu0 %v1653_v10 }
 0x865   :  { %6653 = vmatprep.subr.mxu0 %v1981_v46 }
 0x91c   :  { %v1733_v11 = vpop.f32.mrf.mxu1 }
 0x91d   :  { %v1734_v12 = vadd.f32 %v1733_v11, %v7268_v8  ;;  %v6051_v11 = vld [vmem:[%s8114_s2 + $0x1d8] ss:$0 sm:$0xff] }
 0x91e   :  { %v6637_v13 = vpop.f32.mrf.mxu1 }
 0x91f   :  { %v1813_v14 = vsel %vm346_vm2, %v1734_v12, -inf }
 0x920   :  { %1814 = vmax.xlane.f32.xlu0 %v1813_v14  ;;  %v1809_v15 = vpop.f32.mrf.mxu1 }
 0x921   :  { %v1810_v16 = vadd.f32 %v1809_v15, %v7266_v7 }
 0x922   :  { %v6642_v17 = vpop.f32.mrf.mxu1 }
 0x923   :  { %v1816_v18 = vsel %vm346_vm2, %v1810_v16, -inf }
 0x924   :  { %1817 = vmax.xlane.f32.xlu1 %v1816_v18 }
 0x9a9   :  { %v1815_v19 = vpop.xlane.xlu0 %1814 }
 0x9aa   :  { %v1819_v20 = vsub.f32 %v1734_v12, %v1815_v19 }
 0x9ac   :  { %v1821_v21 = vmul.f32 1.442695, %v1819_v20 }
 0x9ad   :  { %v1818_v22 = vpop.xlane.xlu1 %1817 }
 0x9ae   :  { %7034 = vpow2.f32 %v1821_v21  ;;  %v1820_v23 = vsub.f32 %v1810_v16, %v1818_v22 }
 0x9b0   :  { %v1823_v24 = vmul.f32 1.442695, %v1820_v23 }
 0x9b2   :  { %7036 = vpow2.f32 %v1823_v24 }
 0x9bb   :  { %v7035_v25 = vpop.eup %7034 }
 0x9bc   :  { %v1825_v26 = vsel %vm346_vm2, %v7035_v25, 0.0 }
 0x9bd   :  { %1826 = vadd.xlane.f32.xlu0 %v1825_v26 }
 0x9bf   :  { %v7037_v27 = vpop.eup %7036 }
 0x9c0   :  { %v1828_v28 = vsel %vm346_vm2, %v7037_v27, 0.0 }
 0x9c1   :  { %1829 = vadd.xlane.f32.xlu1 %v1828_v28 }
 0xa46   :  { %v1827_v30 = vpop.xlane.xlu0 %1826 }
 0xa47   :  { %7038 = vrcp.f32 %v1827_v30 }
 0xa4a   :  { %v1830_v31 = vpop.xlane.xlu1 %1829 }
 0xa4b   :  { %7040 = vrcp.f32 %v1830_v31 }
 0xa54   :  { %v7039_v32 = vpop.eup %7038 }
 0xa55   :  { %v1833_v33 = vmul.f32 %v7039_v32, %v7035_v25 }
 0xa57   :  { %6646 = vmatmul.mubr.msk.f32.vlgmr.msra.gmra.mxu0 %vm346_vm2, %v1833_v33 }
 0xa58   :  { %v7041_v34 = vpop.eup %7040  ;;  %6654 = vmatpush3.msra.mxu0 %v1981_v46 }
 0xa59   :  { %v1834_v35 = vmul.f32 %v7041_v34, %v7037_v27  ;;  %6669 = vmatprep.subr.mxu0 %v6041_v47 }
 0xa5b   :  { %6651 = vmatmul.mubr.msk.f32.vlgmr.msra.gmra.mxu1 %vm346_vm2, %v1834_v35 }
 0xa5c   :  { %6659 = vmatpush3.msra.mxu1 %v6036_v29  ;;  %6666 = vmatprep.mubr.msk.f32.mxu1 %vm46_vm0, %v7210_v38 }
 0xa5d   :  { %6660 = vmatprep.subr.mxu1 %v6035_v36 }
 0xa5e   :  { %6661 = vmatpush3.msra.mxu1 %v6035_v36 }
 0xa5f   :  { %6662 = vmatprep.subr.mxu1 %v6034_v37 }
 0xa60   :  { %6663 = vmatpush3.msra.mxu1 %v6034_v37 }
 0xa61   :  { %6664 = vmatprep.subr.mxu1 %v6033_v39 }
 0xa62   :  { %6665 = vmatpush3.msra.mxu1 %v6033_v39  ;;  %v2640_v39 = vld [vmem:[%s8116_s4 + $0x18] sm:$0xff] }
 0xa63   :  { %6667 = vmatmul.mubr.msk.f32.vlgmr.msra.gmra.mxu1 %vm46_vm0, %v7216_v41  ;;  %6680 = vmatprep.subr.mxu1 %v6046_v40 }
 0xa64   :  { %6681 = vmatpush3.msra.mxu1 %v6046_v40  ;;  %6688 = vmatprep.mubr.msk.f32.mxu1 %vm46_vm0, %v7210_v38 }
 0xa65   :  { %6682 = vmatprep.subr.mxu1 %v6045_v42 }
 0xa66   :  { %6683 = vmatpush3.msra.mxu1 %v6045_v42 }
 0xa67   :  { %6684 = vmatprep.subr.mxu1 %v6044_v43 }
 0xa68   :  { %6685 = vmatpush3.msra.mxu1 %v6044_v43 }
 0xa69   :  { %6686 = vmatprep.subr.mxu1 %v6043_v44 }
 0xa6a   :  { %6687 = vmatpush3.msra.mxu1 %v6043_v44 }
 0xa6b   :  { %6689 = vmatmul.mubr.msk.f32.vlgmr.msra.gmra.mxu1 %vm46_vm0, %v7216_v41  ;;  %6701 = vmatprep.subr.mxu1 %v7120_v45 }
 0xa6c   :  { %6703 = vmatprep.mubr.msk.f32.mxu1 %vm7121_vm1, %v7120_v45 }
 0xb17   :  { %v1904_v49 = vpop.f32.mrf.mxu0 }
 0xb18   :  { %6655 = vmatprep.mubr.msk.f32.mxu0 %vm346_vm2, %v1904_v49  ;;  %v6065_v49 = vld [vmem:[%s8116_s4 + $0xd0] ss:$0 sm:$0xff] }
 0xb19   :  { %v6647_v50 = vpop.f32.mrf.mxu0 }
 0xb1b   :  { %v1977_v52 = vpop.f32.mrf.mxu1 }
 0xb1c   :  { %6656 = vmatmul.mubr.msk.f32.vlgmr.msra.gmra.mxu0 %vm346_vm2, %v1977_v52 }
 0xb1d   :  { %6670 = vmatpush3.msra.mxu0 %v6041_v47  ;;  %v6652_v54 = vpop.f32.mrf.mxu1  ;;  %6677 = vmatprep.mubr.msk.f32.mxu0 %vm46_vm0, %v7210_v38 }
 0xb1e   :  { %6671 = vmatprep.subr.mxu0 %v6040_v53 }
 0xb1f   :  { %6672 = vmatpush3.msra.mxu0 %v6040_v53 }
 0xb20   :  { %6673 = vmatprep.subr.mxu0 %v6039_v55 }
 0xb21   :  { %6674 = vmatpush3.msra.mxu0 %v6039_v55 }
 0xb22   :  { %6675 = vmatprep.subr.mxu0 %v6038_v56 }
 0xb23   :  { %6676 = vmatpush3.msra.mxu0 %v6038_v56  ;;  %v6668_v38 = vpop.f32.mrf.mxu1 }
 0xb24   :  { %6678 = vmatmul.mubr.msk.f32.vlgmr.msra.gmra.mxu0 %vm46_vm0, %v7216_v41  ;;  %6691 = vmatprep.subr.mxu0 %v7120_v45  ;;  %v2159_v60 = vadd.f32 %v6668_v38, %v6048_v48 }
 0xb25   :  { %6693 = vmatprep.mubr.msk.f32.mxu0 %vm7121_vm1, %v7120_v45  ;;  %v2153_v57 = vpop.f32.mrf.mxu1 }
 0xb26   :  { %v2154_v59 = vadd.f32 %v6048_v48, %v2153_v57  ;;  %v2869_v48 = vld [vmem:[%s8116_s4 + $0x60] sm:$0xff] }
 0xb2b   :  { %v6690_v61 = vpop.f32.mrf.mxu1 }
 0xb2c   :  { %v2317_v62 = vadd.f32 %v6690_v61, %v6054_v58 }
 0xb2d   :  { %v2311_v63 = vpop.f32.mrf.mxu1 }
 0xb2e   :  { %v2312_v0 = vadd.f32 %v6054_v58, %v2311_v63 }
 0xb30   :  { %6702 = vmatpush3.msra.mxu1 %v2312_v0 }
 0xb31   :  { %6711 = vmatprep.subr.mxu1 %v2640_v39 }
 0xbdc   :  { %v6657_v41 = vpop.f32.mrf.mxu0 }
 0xbdd   :  { %v7530_v5 = vadd.f32 %v6657_v41, %v1403_v1 }
 0xbde   :  { %v2054_v6 = vpop.f32.mrf.mxu0 }
 0xbdf   :  { %v7532_v9 = vadd.f32 %v2054_v6, %v1398_v2  ;;  %v2775_v6 = vld [vmem:[%s8115_s3 + $0x10] sm:$0xff] }
 0xbe4   :  { %v6679_v10 = vpop.f32.mrf.mxu0 }
 0xbe5   :  { %v2238_v51 = vadd.f32 %v6679_v10, %v6051_v11  ;;  %v2773_v10 = vld [vmem:[%s8115_s3] sm:$0xff] }
 0xbe6   :  { %v2232_v12 = vpop.f32.mrf.mxu0 }
 0xbe7   :  { %v2233_v13 = vadd.f32 %v6051_v11, %v2232_v12  ;;  %v2872_v11 = vld [vmem:[%s8116_s4 + $0x78] sm:$0xff]  ;;  %v2871_v12 = vld [vmem:[%s8116_s4 + $0x70] sm:$0xff] }
 0xbe9   :  { %6692 = vmatpush3.xpose.msk.msra.mxu0 %vm346_vm2, %v2233_v13  ;;  %v2870_v13 = vld [vmem:[%s8116_s4 + $0x68] sm:$0xff] }
 0xbea   :  { %6696 = vmatprep.subr.mxu0 %v7120_v45 }
 0xbec   :  { %6694 = vmatmul.mubr.msk.f32.vlgmr.msra.gmra.mxu0 %vm346_vm2, %v2154_v59 }
 0xbed   :  { %6697 = vmatpush3.xpose.msk.msra.mxu0 %vm346_vm2, %v2238_v51  ;;  %6698 = vmatprep.mubr.msk.f32.mxu0 %vm7121_vm1, %v7120_v45 }
 0xbee   :  { %6706 = vmatprep.subr.mxu0 %v7120_v45 }
 0xbf0   :  { %6699 = vmatmul.mubr.msk.f32.vlgmr.msra.gmra.mxu0 %vm346_vm2, %v2159_v60 }
 0xbf1   :  { %6707 = vmatpush3.msra.mxu0 %v2317_v62  ;;  %6708 = vmatprep.mubr.msk.f32.mxu0 %vm7121_vm1, %v7120_v45 }
 0xcac   :  { %v2392_v14 = vpop.f32.mrf.mxu0 }
 0xcad   :  { %v2393_v15 = vadd.f32 %v2392_v14, %v7268_v8 }
 0xcae   :  { %v6695_v16 = vpop.f32.mrf.mxu0 }
 0xcaf   :  { %v2472_v17 = vsel %vm346_vm2, %v2393_v15, -inf }
 0xcb0   :  { %2473 = vmax.xlane.f32.xlu0 %v2472_v17  ;;  %v2468_v18 = vpop.f32.mrf.mxu0 }
 0xcb1   :  { %v2469_v19 = vadd.f32 %v2468_v18, %v7266_v7  ;;  %v6066_v18 = vld [vmem:[%s8116_s4 + $0xcc] ss:$0 sm:$0xff] }
 0xcb2   :  { %v6700_v20 = vpop.f32.mrf.mxu0 }
 0xcb3   :  { %v2475_v21 = vsel %vm346_vm2, %v2469_v19, -inf }
 0xcb4   :  { %2476 = vmax.xlane.f32.xlu1 %v2475_v21 }
 0xd39   :  { %v2474_v22 = vpop.xlane.xlu0 %2473 }
 0xd3a   :  { %v2478_v23 = vsub.f32 %v2393_v15, %v2474_v22 }
 0xd3c   :  { %v2480_v24 = vmul.f32 1.442695, %v2478_v23  ;;  %v6067_v23 = vld [vmem:[%s8116_s4 + $0xce] ss:$0 sm:$0xff] }
 0xd3d   :  { %v2477_v25 = vpop.xlane.xlu1 %2476 }
 0xd3e   :  { %7042 = vpow2.f32 %v2480_v24  ;;  %v2479_v26 = vsub.f32 %v2469_v19, %v2477_v25 }
 0xd40   :  { %v2482_v27 = vmul.f32 1.442695, %v2479_v26 }
 0xd42   :  { %7044 = vpow2.f32 %v2482_v27  ;;  %v2868_v27 = vld [vmem:[%s8116_s4 + $0x58] sm:$0xff] }
 0xd4b   :  { %v7043_v28 = vpop.eup %7042 }
 0xd4c   :  { %v2484_v29 = vsel %vm346_vm2, %v7043_v28, 0.0 }
 0xd4d   :  { %2485 = vadd.xlane.f32.xlu0 %v2484_v29  ;;  %v2866_v29 = vld [vmem:[%s8116_s4 + $0x48] sm:$0xff] }
 0xd4f   :  { %v7045_v30 = vpop.eup %7044 }
 0xd50   :  { %v2487_v31 = vsel %vm346_vm2, %v7045_v30, 0.0 }
 0xd51   :  { %2488 = vadd.xlane.f32.xlu1 %v2487_v31  ;;  %v6068_v31 = vld [vmem:[%s8115_s3 + $0x20] ss:$0 sm:$0xff] }
 0xdd6   :  { %v2486_v32 = vpop.xlane.xlu0 %2485 }
 0xdd7   :  { %7046 = vrcp.f32 %v2486_v32 }
 0xdda   :  { %v2489_v33 = vpop.xlane.xlu1 %2488 }
 0xddb   :  { %7048 = vrcp.f32 %v2489_v33 }
 0xde4   :  { %v7047_v34 = vpop.eup %7046 }
 0xde5   :  { %v2492_v35 = vmul.f32 %v7047_v34, %v7043_v28  ;;  %v2867_v28 = vld [vmem:[%s8116_s4 + $0x50] sm:$0xff] }
 0xde7   :  { %6704 = vmatmul.mubr.msk.f32.vlgmr.msra.gmra.mxu1 %vm346_vm2, %v2492_v35 }
 0xde8   :  { %v7049_v36 = vpop.eup %7048  ;;  %6712 = vmatpush3.msra.mxu1 %v2640_v39 }
 0xde9   :  { %v2493_v37 = vmul.f32 %v7049_v36, %v7045_v30  ;;  %6727 = vmatprep.subr.mxu1 %v2872_v11  ;;  %v2865_v30 = vld [vmem:[%s8116_s4 + $0x40] sm:$0xff] }
 0xdeb   :  { %6709 = vmatmul.mubr.msk.f32.vlgmr.msra.gmra.mxu0 %vm346_vm2, %v2493_v37 }
 0xea7   :  { %v2563_v40 = vpop.f32.mrf.mxu1 }
 0xea8   :  { %6713 = vmatprep.mubr.msk.f32.mxu1 %vm346_vm2, %v2563_v40  ;;  %v6073_v40 = vld [vmem:[%s8116_s4 + $0xd2] ss:$0 sm:$0xff] }
 0xea9   :  { %v6705_v42 = vpop.f32.mrf.mxu1 }
 0xeab   :  { %v2636_v43 = vpop.f32.mrf.mxu0 }
 0xeac   :  { %6714 = vmatmul.mubr.msk.f32.vlgmr.msra.gmra.mxu1 %vm346_vm2, %v2636_v43 }
 0xead   :  { %v6710_v44 = vpop.f32.mrf.mxu0  ;;  %6728 = vmatpush3.msra.mxu1 %v2872_v11 }
 0xeae   :  { %6729 = vmatprep.subr.mxu1 %v2871_v12 }
 0xeaf   :  { %6730 = vmatpush3.msra.mxu1 %v2871_v12 }
 0xeb0   :  { %6731 = vmatprep.subr.mxu1 %v2870_v13 }
 0xeb1   :  { %6732 = vmatpush3.msra.mxu1 %v2870_v13 }
 0xeb2   :  { %6733 = vmatprep.subr.mxu1 %v2869_v48 }
 0xeb3   :  { %6734 = vmatpush3.msra.mxu1 %v2869_v48 }
 0xeb4   :  { %6735 = vmatprep.subr.mxu1 %v2868_v27 }
 0xeb5   :  { %6736 = vmatpush3.msra.mxu1 %v2868_v27 }
 0xeb6   :  { %6737 = vmatprep.subr.mxu1 %v2867_v28 }
 0xeb7   :  { %6738 = vmatpush3.msra.mxu1 %v2867_v28 }
 0xeb8   :  { %6739 = vmatprep.subr.mxu1 %v2866_v29 }
 0xeb9   :  { %6740 = vmatpush3.msra.mxu1 %v2866_v29  ;;  %v6091_v29 = vld [vmem:[%s8114_s2 + $0xc0] ss:$0 sm:$0xff] }
 0xeba   :  { %6741 = vmatprep.subr.mxu1 %v2865_v30 }
 0xebb   :  { %6742 = vmatpush3.msra.mxu1 %v2865_v30 }
 0xf6c   :  { %v6715_v46 = vpop.f32.mrf.mxu1 }
 0xf6d   :  { %v2723_v47 = vadd.f32 %v6715_v46, %v7530_v5  ;;  %v2776_v5 = vld [vmem:[%s8115_s3 + $0x18] sm:$0xff] }
 0xf6e   :  { %v2713_v50 = vpop.f32.mrf.mxu1  ;;  %6716 = vmatprep.subr.mxu0 %v2776_v5 }
 0xf6f   :  { %v2725_v52 = vadd.f32 %v2723_v47, %v7167_v4  ;;  %v2722_v53 = vadd.f32 %v2713_v50, %v7532_v9  ;;  %6717 = vmatpush3.msra.mxu0 %v2776_v5  ;;  %v2774_v9 = vld [vmem:[%s8115_s3 + $0x8] sm:$0xff]  ;;  %v6086_v5 = vld [vmem:[%s8114_s2 + $0x320] sm:$0xff] }
 0xf70   :  { %6718 = vmatprep.subr.mxu0 %v2775_v6 }
 0xf71   :  { %v7569_v54 = vadd.f32 %v6065_v49, %v2725_v52  ;;  %v2724_v55 = vadd.f32 %v2722_v53, %v7165_v3  ;;  %6719 = vmatpush3.msra.mxu0 %v2775_v6  ;;  %v6084_v6 = vld [vmem:[%s8114_s2 + $0x1f8] sm:$0xff] }
 0xf72   :  { %6720 = vmatprep.subr.mxu0 %v2774_v9 }
 0xf73   :  { %v7572_v56 = vadd.f32 %v6065_v49, %v2724_v55  ;;  %v2738_v38 = vsel %vm46_vm0, %v7569_v54, 0.0  ;;  %6721 = vmatpush3.msra.mxu0 %v2774_v9 }
 0xf74   :  { %2739 = vadd.xlane.f32.xlu1 %v2738_v38  ;;  %6722 = vmatprep.subr.mxu0 %v2773_v10 }
 0xf75   :  { %v2735_v57 = vsel %vm46_vm0, %v7572_v56, 0.0  ;;  %6723 = vmatpush3.msra.mxu0 %v2773_v10 }
 0xf76   :  { %2736 = vadd.xlane.f32.xlu0 %v2735_v57 }
 0xffd   :  { %v2740_v58 = vpop.xlane.xlu1 %2739 }
 0xffe   :  { %v2742_v61 = vmul.f32 0.03125, %v2740_v58 }
 0xfff   :  { %v2737_v62 = vpop.xlane.xlu0 %2736 }
0x1000   :  { %v2744_v4 = vsub.f32 %v7569_v54, %v2742_v61  ;;  %v2741_v63 = vmul.f32 0.03125, %v2737_v62 }
0x1002   :  { %v2743_v0 = vsub.f32 %v7572_v56, %v2741_v63  ;;  %v2746_v1 = vmul.f32 %v2744_v4, %v2744_v4  ;;  %v6089_v63 = vld [vmem:[%s8114_s2 + $0x338] sm:$0xff] }
0x1003   :  { %6768 = vmatprep.subr.mxu1 %v6089_v63 }
0x1004   :  { %v2750_v3 = vsel %vm46_vm0, %v2746_v1, 0.0  ;;  %v2745_v41 = vmul.f32 %v2743_v0, %v2743_v0  ;;  %v6088_v1 = vld [vmem:[%s8114_s2 + $0x330] sm:$0xff] }
0x1005   :  { %2751 = vadd.xlane.f32.xlu1 %v2750_v3  ;;  %v6077_v3 = vld [vmem:[%s8114_s2 + $0xa8] sm:$0xff] }
0x1006   :  { %v2747_v2 = vsel %vm46_vm0, %v2745_v41, 0.0  ;;  %v6087_v41 = vld [vmem:[%s8114_s2 + $0x328] sm:$0xff] }
0x1007   :  { %2748 = vadd.xlane.f32.xlu0 %v2747_v2  ;;  %v6076_v2 = vld [vmem:[%s8114_s2 + $0xa0] sm:$0xff] }
0x108e   :  { %v2752_v59 = vpop.xlane.xlu1 %2751 }
0x108f   :  { %v2754_v51 = vmul.f32 0.03125, %v2752_v59 }
0x1090   :  { %v2749_v60 = vpop.xlane.xlu0 %2748 }
0x1091   :  { %v2756_v14 = vadd.f32 1e-05, %v2754_v51  ;;  %v2753_v15 = vmul.f32 0.03125, %v2749_v60  ;;  %v6074_v51 = vld [vmem:[%s8116_s4 + $0xc9] ss:$0 sm:$0xff] }
0x1093   :  { %7050 = vrsqrt.f32 %v2756_v14  ;;  %v2755_v16 = vadd.f32 1e-05, %v2753_v15 }
0x1095   :  { %7052 = vrsqrt.f32 %v2755_v16 }
0x10a0   :  { %v7051_v17 = vpop.eup %7050 }
0x10a1   :  { %v2760_v19 = vmul.f32 %v7051_v17, %v2744_v4  ;;  %v6079_v4 = vld [vmem:[%s8114_s2 + $0xb8] sm:$0xff]  ;;  %v6075_v17 = vld [vmem:[%s8116_s4 + $0xcb] ss:$0 sm:$0xff] }
0x10a2   :  { %v7053_v20 = vpop.eup %7052  ;;  %6746 = vmatprep.subr.mxu0 %v6079_v4 }
0x10a3   :  { %v2759_v21 = vmul.f32 %v7053_v20, %v2743_v0  ;;  %v2766_v22 = vmul.f32 %v6066_v18, %v2760_v19  ;;  %v6078_v0 = vld [vmem:[%s8114_s2 + $0xb0] sm:$0xff] }
0x10a5   :  { %v2765_v24 = vmul.f32 %v6066_v18, %v2759_v21  ;;  %v2772_v26 = vadd.f32 %v6067_v23, %v2766_v22  ;;  %v6083_v21 = vld [vmem:[%s8114_s2 + $0x1f0] sm:$0xff]  ;;  %v6082_v22 = vld [vmem:[%s8114_s2 + $0x1e8] sm:$0xff] }
0x10a7   :  { %v2771_v25 = vadd.f32 %v6067_v23, %v2765_v24  ;;  %v6081_v23 = vld [vmem:[%s8114_s2 + $0x1e0] sm:$0xff] }
0x10a9   :  { %6724 = vmatprep.mubr.msk.f32.mxu0 %vm46_vm0, %v2771_v25 }
0x10aa   :  { %6725 = vmatmul.mubr.msk.f32.vlgmr.msra.gmra.mxu0 %vm46_vm0, %v2772_v26  ;;  %v6094_v26 = vld [vmem:[%s8114_s2 + $0x200] ss:$0 sm:$0xff] }
0x10ab   :  { %6747 = vmatpush3.msra.mxu0 %v6079_v4 }
0x10ac   :  { %6748 = vmatprep.subr.mxu0 %v6078_v0 }
0x10ad   :  { %6749 = vmatpush3.msra.mxu0 %v6078_v0  ;;  %v6114_v0 = vld [vmem:[%s8114_s2 + $0x220] sm:$0xff] }
0x10ae   :  { %6750 = vmatprep.subr.mxu0 %v6077_v3 }
0x10af   :  { %6751 = vmatpush3.msra.mxu0 %v6077_v3 }
0x10b0   :  { %6752 = vmatprep.subr.mxu0 %v6076_v2 }
0x10b1   :  { %6753 = vmatpush3.msra.mxu0 %v6076_v2 }
0x10b2   :  { %6757 = vmatprep.subr.mxu0 %v6084_v6 }
0x116a   :  { %v6726_v32 = vpop.f32.mrf.mxu0 }
0x116b   :  { %v2860_v33 = vadd.f32 %v6726_v32, %v6068_v31 }
0x116c   :  { %v2854_v34 = vpop.f32.mrf.mxu0 }
0x116d   :  { %v2855_v35 = vadd.f32 %v6068_v31, %v2854_v34  ;;  %v2864_v37 = vmax.f32 %v2860_v33, 0.0  ;;  %v6097_v31 = vld [vmem:[%s8114_s2 + $0x340] ss:$0 sm:$0xff] }
0x116f   :  { %v2863_v36 = vmax.f32 %v2855_v35, 0.0 }
0x1171   :  { %6743 = vmatprep.mubr.msk.f32.mxu1 %vm2873_vm5, %v2863_v36 }
0x1172   :  { %6744 = vmatmul.mubr.msk.f32.vlgmr.msra.gmra.mxu1 %vm2873_vm5, %v2864_v37 }
0x1173   :  { %6769 = vmatpush3.msra.mxu1 %v6089_v63 }
0x1174   :  { %6770 = vmatprep.subr.mxu1 %v6088_v1 }
0x1175   :  { %6771 = vmatpush3.msra.mxu1 %v6088_v1  ;;  %v6109_v1 = vld [vmem:[%s8114_s2 + $0xe0] sm:$0xff] }
0x1176   :  { %6772 = vmatprep.subr.mxu1 %v6087_v41 }
0x1177   :  { %6773 = vmatpush3.msra.mxu1 %v6087_v41 }
0x1178   :  { %6774 = vmatprep.subr.mxu1 %v6086_v5 }
0x1179   :  { %6775 = vmatpush3.msra.mxu1 %v6086_v5 }
0x117a   :  { %6784 = vmatprep.subr.mxu1 %v7120_v45 }
0x1232   :  { %v6745_v39 = vpop.f32.mrf.mxu1 }
0x1233   :  { %v2956_v42 = vadd.f32 %v6745_v39, %v7569_v54 }
0x1234   :  { %v2946_v43 = vpop.f32.mrf.mxu1 }
0x1235   :  { %v7635_v44 = vadd.f32 %v6073_v40, %v2956_v42  ;;  %v2955_v46 = vadd.f32 %v2946_v43, %v7572_v56 }
0x1237   :  { %v7638_v47 = vadd.f32 %v6073_v40, %v2955_v46  ;;  %v2969_v49 = vsel %vm46_vm0, %v7635_v44, 0.0 }
0x1238   :  { %2970 = vadd.xlane.f32.xlu1 %v2969_v49 }
0x1239   :  { %v2966_v50 = vsel %vm46_vm0, %v7638_v47, 0.0 }
0x123a   :  { %2967 = vadd.xlane.f32.xlu0 %v2966_v50 }
0x12c1   :  { %v2971_v52 = vpop.xlane.xlu1 %2970 }
0x12c2   :  { %v2973_v53 = vmul.f32 0.03125, %v2971_v52 }
0x12c3   :  { %v2968_v55 = vpop.xlane.xlu0 %2967 }
0x12c4   :  { %v2975_v54 = vsub.f32 %v7635_v44, %v2973_v53  ;;  %v2972_v38 = vmul.f32 0.03125, %v2968_v55 }
0x12c6   :  { %v2974_v57 = vsub.f32 %v7638_v47, %v2972_v38  ;;  %v2977_v58 = vmul.f32 %v2975_v54, %v2975_v54 }
0x12c8   :  { %v2981_v56 = vsel %vm46_vm0, %v2977_v58, 0.0  ;;  %v2976_v61 = vmul.f32 %v2974_v57, %v2974_v57 }
0x12c9   :  { %2982 = vadd.xlane.f32.xlu1 %v2981_v56 }
0x12ca   :  { %v2978_v62 = vsel %vm46_vm0, %v2976_v61, 0.0 }
0x12cb   :  { %2979 = vadd.xlane.f32.xlu0 %v2978_v62 }
0x1352   :  { %v2983_v9 = vpop.xlane.xlu1 %2982 }
0x1353   :  { %v2985_v10 = vmul.f32 0.03125, %v2983_v9  ;;  %v6113_v9 = vld [vmem:[%s8114_s2 + $0x218] sm:$0xff] }
0x1354   :  { %v2980_v11 = vpop.xlane.xlu0 %2979 }
0x1355   :  { %v2987_v12 = vadd.f32 1e-05, %v2985_v10  ;;  %v2984_v13 = vmul.f32 0.03125, %v2980_v11  ;;  %v6108_v11 = vld [vmem:[%s8114_s2 + $0xd8] sm:$0xff] }
0x1357   :  { %7054 = vrsqrt.f32 %v2987_v12  ;;  %v2986_v48 = vadd.f32 1e-05, %v2984_v13  ;;  %v6112_v12 = vld [vmem:[%s8114_s2 + $0x210] sm:$0xff] }
0x1358   :  { %v6107_v13 = vld [vmem:[%s8114_s2 + $0xd0] sm:$0xff] }
0x1359   :  { %7056 = vrsqrt.f32 %v2986_v48  ;;  %v6111_v48 = vld [vmem:[%s8114_s2 + $0x208] sm:$0xff] }
0x1364   :  { %v7055_v59 = vpop.eup %7054 }
0x1365   :  { %v2991_v60 = vmul.f32 %v7055_v59, %v2975_v54  ;;  %v6106_v59 = vld [vmem:[%s8114_s2 + $0xc8] sm:$0xff] }
0x1366   :  { %v7057_v14 = vpop.eup %7056 }
0x1367   :  { %v2990_v15 = vmul.f32 %v7057_v14, %v2974_v57  ;;  %v2997_v16 = vmul.f32 %v6074_v51, %v2991_v60  ;;  %v6118_v60 = vld [vmem:[%s8114_s2 + $0x358] sm:$0xff]  ;;  %v6117_v14 = vld [vmem:[%s8114_s2 + $0x350] sm:$0xff] }
0x1369   :  { %v2996_v18 = vmul.f32 %v6074_v51, %v2990_v15  ;;  %v7684_v20 = vadd.f32 %v6075_v17, %v2997_v16  ;;  %v6119_v51 = vld [vmem:[%s8114_s2 + $0x360] sm:$0xff]  ;;  %v6116_v15 = vld [vmem:[%s8114_s2 + $0x348] sm:$0xff] }
0x136b   :  { %v7682_v19 = vadd.f32 %v6075_v17, %v2996_v18 }
0x136d   :  { %6754 = vmatprep.mubr.msk.f32.mxu0 %vm46_vm0, %v7682_v19  ;;  %6776 = vmatprep.mubr.msk.f32.mxu1 %vm46_vm0, %v7682_v19 }
0x136e   :  { %6755 = vmatmul.mubr.msk.f32.vlgmr.msra.gmra.mxu0 %vm46_vm0, %v7684_v20  ;;  %6777 = vmatmul.mubr.msk.f32.vlgmr.msra.gmra.mxu1 %vm46_vm0, %v7684_v20 }
0x136f   :  { %6758 = vmatpush3.msra.mxu0 %v6084_v6  ;;  %6765 = vmatprep.mubr.msk.f32.mxu0 %vm46_vm0, %v7682_v19 }
0x1370   :  { %6759 = vmatprep.subr.mxu0 %v6083_v21  ;;  %6786 = vmatprep.mubr.msk.f32.mxu1 %vm7121_vm1, %v7120_v45 }
0x1371   :  { %6760 = vmatpush3.msra.mxu0 %v6083_v21 }
0x1372   :  { %6761 = vmatprep.subr.mxu0 %v6082_v22 }
0x1373   :  { %6762 = vmatpush3.msra.mxu0 %v6082_v22 }
0x1374   :  { %6763 = vmatprep.subr.mxu0 %v6081_v23 }
0x1375   :  { %6764 = vmatpush3.msra.mxu0 %v6081_v23 }
0x1376   :  { %6766 = vmatmul.mubr.msk.f32.vlgmr.msra.gmra.mxu0 %vm46_vm0, %v7684_v20  ;;  %6779 = vmatprep.subr.mxu0 %v7120_v45 }
0x1377   :  { %6781 = vmatprep.mubr.msk.f32.mxu0 %vm7121_vm1, %v7120_v45 }
0x142e   :  { %v6756_v24 = vpop.f32.mrf.mxu0  ;;  %v6778_v27 = vpop.f32.mrf.mxu1 }
0x142f   :  { %v3104_v34 = vadd.f32 %v6756_v24, %v6091_v29  ;;  %v3262_v36 = vadd.f32 %v6778_v27, %v6097_v31  ;;  %v6124_v24 = vld [vmem:[%s8114_s2 + $0x228] ss:$0 sm:$0xff] }
0x1430   :  { %v3098_v25 = vpop.f32.mrf.mxu0  ;;  %v3256_v35 = vpop.f32.mrf.mxu1 }
0x1431   :  { %v3099_v37 = vadd.f32 %v6091_v29, %v3098_v25  ;;  %v3257_v39 = vadd.f32 %v6097_v31, %v3256_v35  ;;  %v6127_v31 = vld [vmem:[%s8114_s2 + $0x368] ss:$0 sm:$0xff] }
0x1436   :  { %v6767_v28 = vpop.f32.mrf.mxu0 }
0x1437   :  { %v3183_v30 = vadd.f32 %v6767_v28, %v6094_v26 }
0x1438   :  { %v3177_v32 = vpop.f32.mrf.mxu0 }
0x1439   :  { %v3178_v33 = vadd.f32 %v6094_v26, %v3177_v32  ;;  %6785 = vmatpush3.xpose.msk.msra.mxu1 %vm346_vm2, %v3183_v30  ;;  %v6121_v26 = vld [vmem:[%s8114_s2 + $0xe8] ss:$0 sm:$0xff] }
0x143a   :  { %6794 = vmatprep.subr.mxu1 %v7120_v45 }
0x143b   :  { %6780 = vmatpush3.xpose.msk.msra.mxu0 %vm346_vm2, %v3178_v33 }
0x143c   :  { %6787 = vmatmul.mubr.msk.f32.vlgmr.msra.gmra.mxu1 %vm346_vm2, %v3104_v34  ;;  %6789 = vmatprep.subr.mxu0 %v7120_v45 }
0x143d   :  { %6795 = vmatpush3.msra.mxu1 %v3262_v36  ;;  %6796 = vmatprep.mubr.msk.f32.mxu1 %vm7121_vm1, %v7120_v45 }
0x143e   :  { %6782 = vmatmul.mubr.msk.f32.vlgmr.msra.gmra.mxu0 %vm346_vm2, %v3099_v37  ;;  %6810 = vmatprep.subr.mxu1 %v6114_v0 }
0x143f   :  { %6790 = vmatpush3.msra.mxu0 %v3257_v39  ;;  %6791 = vmatprep.mubr.msk.f32.mxu0 %vm7121_vm1, %v7120_v45 }
0x1440   :  { %6799 = vmatprep.subr.mxu0 %v6109_v1 }
0x14fc   :  { %v3413_v40 = vpop.f32.mrf.mxu1 }
0x14fd   :  { %v3414_v42 = vadd.f32 %v3413_v40, %v7266_v7 }
0x14fe   :  { %v3337_v43 = vpop.f32.mrf.mxu0  ;;  %v6788_v46 = vpop.f32.mrf.mxu1 }
0x14ff   :  { %v3338_v49 = vadd.f32 %v3337_v43, %v7268_v8  ;;  %v3420_v50 = vsel %vm346_vm2, %v3414_v42, -inf }
0x1500   :  { %3421 = vmax.xlane.f32.xlu0 %v3420_v50  ;;  %v6783_v52 = vpop.f32.mrf.mxu0 }
0x1501   :  { %v3417_v53 = vsel %vm346_vm2, %v3338_v49, -inf }
0x1502   :  { %3418 = vmax.xlane.f32.xlu1 %v3417_v53 }
0x1589   :  { %v3422_v55 = vpop.xlane.xlu0 %3421 }
0x158a   :  { %v3424_v54 = vsub.f32 %v3414_v42, %v3422_v55 }
0x158b   :  { %v3419_v38 = vpop.xlane.xlu1 %3418 }
0x158c   :  { %v3427_v57 = vmul.f32 1.442695, %v3424_v54  ;;  %v3423_v58 = vsub.f32 %v3338_v49, %v3419_v38 }
0x158e   :  { %7058 = vpow2.f32 %v3427_v57  ;;  %v3425_v56 = vmul.f32 1.442695, %v3423_v58 }
0x1590   :  { %7060 = vpow2.f32 %v3425_v56 }
0x159b   :  { %v7059_v61 = vpop.eup %7058 }
0x159c   :  { %v3432_v62 = vsel %vm346_vm2, %v7059_v61, 0.0 }
0x159d   :  { %v7061_v4 = vpop.eup %7060  ;;  %3433 = vadd.xlane.f32.xlu0 %v3432_v62 }
0x159e   :  { %v3429_v63 = vsel %vm346_vm2, %v7061_v4, 0.0 }
0x159f   :  { %3430 = vadd.xlane.f32.xlu1 %v3429_v63 }
0x1626   :  { %v3434_v3 = vpop.xlane.xlu0 %3433 }
0x1627   :  { %7062 = vrcp.f32 %v3434_v3 }
0x1628   :  { %v3431_v41 = vpop.xlane.xlu1 %3430 }
0x1629   :  { %7064 = vrcp.f32 %v3431_v41 }
0x1634   :  { %v7063_v2 = vpop.eup %7062 }
0x1635   :  { %v3438_v5 = vmul.f32 %v7063_v2, %v7059_v61 }
0x1636   :  { %v7065_v6 = vpop.eup %7064 }
0x1637   :  { %6797 = vmatmul.mubr.msk.f32.vlgmr.msra.gmra.mxu1 %vm346_vm2, %v3438_v5  ;;  %v3437_v10 = vmul.f32 %v7065_v6, %v7061_v4  ;;  %v3585_v4 = vld [vmem:[%s8116_s4 + $0x20] sm:$0xff]  ;;  %v6148_v5 = vld [vmem:[%s8114_s2 + $0x248] sm:$0xff] }
0x1638   :  { %6811 = vmatpush3.msra.mxu1 %v6114_v0  ;;  %6818 = vmatprep.mubr.msk.f32.mxu1 %vm46_vm0, %v7682_v19  ;;  %v6147_v6 = vld [vmem:[%s8114_s2 + $0x240] sm:$0xff] }
0x1639   :  { %6812 = vmatprep.subr.mxu1 %v6113_v9  ;;  %6792 = vmatmul.mubr.msk.f32.vlgmr.msra.gmra.mxu0 %vm346_vm2, %v3437_v10  ;;  %v6145_v10 = vld [vmem:[%s8114_s2 + $0x230] sm:$0xff] }
0x163a   :  { %6800 = vmatpush3.msra.mxu0 %v6109_v1  ;;  %6813 = vmatpush3.msra.mxu1 %v6113_v9  ;;  %v6146_v9 = vld [vmem:[%s8114_s2 + $0x238] sm:$0xff] }
0x163b   :  { %6801 = vmatprep.subr.mxu0 %v6108_v11  ;;  %6807 = vmatprep.mubr.msk.f32.mxu0 %vm46_vm0, %v7682_v19 }
0x163c   :  { %6814 = vmatprep.subr.mxu1 %v6112_v12  ;;  %6802 = vmatpush3.msra.mxu0 %v6108_v11  ;;  %v4161_v11 = vld [vmem:[%s8116_s4 + $0x28] sm:$0xff] }
0x163d   :  { %6815 = vmatpush3.msra.mxu1 %v6112_v12  ;;  %6803 = vmatprep.subr.mxu0 %v6107_v13  ;;  %v6143_v12 = vld [vmem:[%s8114_s2 + $0x108] sm:$0xff] }
0x163e   :  { %6816 = vmatprep.subr.mxu1 %v6111_v48  ;;  %6804 = vmatpush3.msra.mxu0 %v6107_v13 }
0x163f   :  { %6817 = vmatpush3.msra.mxu1 %v6111_v48  ;;  %6805 = vmatprep.subr.mxu0 %v6106_v59 }
0x1640   :  { %6819 = vmatmul.mubr.msk.f32.vlgmr.msra.gmra.mxu1 %vm46_vm0, %v7684_v20  ;;  %6806 = vmatpush3.msra.mxu0 %v6106_v59 }
0x1641   :  { %6808 = vmatmul.mubr.msk.f32.vlgmr.msra.gmra.mxu0 %vm46_vm0, %v7684_v20  ;;  %6821 = vmatprep.subr.mxu0 %v6119_v51 }
0x1642   :  { %6822 = vmatpush3.msra.mxu0 %v6119_v51  ;;  %6829 = vmatprep.mubr.msk.f32.mxu0 %vm46_vm0, %v7682_v19  ;;  %v6142_v51 = vld [vmem:[%s8114_s2 + $0x100] sm:$0xff] }
0x1643   :  { %6823 = vmatprep.subr.mxu0 %v6118_v60  ;;  %6832 = vmatprep.subr.mxu1 %v7120_v45 }
0x1644   :  { %6824 = vmatpush3.msra.mxu0 %v6118_v60  ;;  %6834 = vmatprep.mubr.msk.f32.mxu1 %vm7121_vm1, %v7120_v45 }
0x1645   :  { %6825 = vmatprep.subr.mxu0 %v6117_v14 }
0x1646   :  { %6826 = vmatpush3.msra.mxu0 %v6117_v14  ;;  %v6141_v14 = vld [vmem:[%s8114_s2 + $0xf8] sm:$0xff] }
0x1647   :  { %6827 = vmatprep.subr.mxu0 %v6116_v15 }
0x1648   :  { %6828 = vmatpush3.msra.mxu0 %v6116_v15  ;;  %v6140_v15 = vld [vmem:[%s8114_s2 + $0xf0] sm:$0xff] }
0x1649   :  { %6830 = vmatmul.mubr.msk.f32.vlgmr.msra.gmra.mxu0 %vm46_vm0, %v7684_v20  ;;  %6842 = vmatprep.subr.mxu0 %v7120_v45 }
0x164a   :  { %6844 = vmatprep.mubr.msk.f32.mxu0 %vm7121_vm1, %v7120_v45 }
0x16f7   :  { %v7793_v16 = vpop.f32.mrf.mxu1 }
0x16f9   :  { %v7795_v17 = vpop.f32.mrf.mxu0  ;;  %v6798_v18 = vpop.f32.mrf.mxu1 }
0x16fa   :  { %v6152_v18 = vld [vmem:[%s8114_s2 + $0x380] sm:$0xff] }
0x16fb   :  { %v6793_v21 = vpop.f32.mrf.mxu0 }
0x1700   :  { %v6820_v22 = vpop.f32.mrf.mxu1 }
0x1701   :  { %v6809_v23 = vpop.f32.mrf.mxu0  ;;  %v3759_v30 = vadd.f32 %v6820_v22, %v6124_v24  ;;  %v6158_v22 = vld [vmem:[%s8114_s2 + $0x250] ss:$0 sm:$0xff] }
0x1702   :  { %v3753_v25 = vpop.f32.mrf.mxu1  ;;  %v3680_v33 = vadd.f32 %v6809_v23, %v6121_v26  ;;  %v6151_v23 = vld [vmem:[%s8114_s2 + $0x378] sm:$0xff] }
0x1703   :  { %v3754_v27 = vadd.f32 %v6124_v24, %v3753_v25  ;;  %v3674_v28 = vpop.f32.mrf.mxu0  ;;  %v6150_v25 = vld [vmem:[%s8114_s2 + $0x370] sm:$0xff] }
0x1704   :  { %v3675_v29 = vadd.f32 %v6121_v26, %v3674_v28 }
0x1705   :  { %6833 = vmatpush3.xpose.msk.msra.mxu1 %vm346_vm2, %v3754_v27 }
0x1706   :  { %6837 = vmatprep.subr.mxu1 %v7120_v45 }
0x1708   :  { %6835 = vmatmul.mubr.msk.f32.vlgmr.msra.gmra.mxu1 %vm346_vm2, %v3675_v29 }
0x1709   :  { %6838 = vmatpush3.xpose.msk.msra.mxu1 %vm346_vm2, %v3759_v30  ;;  %v6831_v32 = vpop.f32.mrf.mxu0  ;;  %6839 = vmatprep.mubr.msk.f32.mxu1 %vm7121_vm1, %v7120_v45 }
0x170a   :  { %v3838_v34 = vadd.f32 %v6831_v32, %v6127_v31  ;;  %6847 = vmatprep.subr.mxu1 %v7120_v45  ;;  %v6155_v32 = vld [vmem:[%s8114_s2 + $0x110] ss:$0 sm:$0xff] }
0x170b   :  { %v3832_v35 = vpop.f32.mrf.mxu0 }
0x170c   :  { %v3833_v36 = vadd.f32 %v6127_v31, %v3832_v35  ;;  %6840 = vmatmul.mubr.msk.f32.vlgmr.msra.gmra.mxu1 %vm346_vm2, %v3680_v33  ;;  %v6161_v35 = vld [vmem:[%s8114_s2 + $0x390] ss:$0 sm:$0xff] }
0x170d   :  { %6848 = vmatpush3.msra.mxu1 %v3838_v34  ;;  %6849 = vmatprep.mubr.msk.f32.mxu1 %vm7121_vm1, %v7120_v45 }
0x170e   :  { %6843 = vmatpush3.msra.mxu0 %v3833_v36  ;;  %6857 = vmatprep.subr.mxu1 %v3585_v4 }
0x170f   :  { %6852 = vmatprep.subr.mxu0 %v4161_v11 }
0x17c8   :  { %v3913_v37 = vpop.f32.mrf.mxu1 }
0x17c9   :  { %v3914_v39 = vadd.f32 %v3913_v37, %v7268_v8 }
0x17ca   :  { %v6836_v40 = vpop.f32.mrf.mxu1 }
0x17cb   :  { %v3993_v42 = vsel %vm346_vm2, %v3914_v39, -inf }
0x17cc   :  { %3994 = vmax.xlane.f32.xlu0 %v3993_v42  ;;  %v3989_v43 = vpop.f32.mrf.mxu1 }
0x17cd   :  { %v3990_v46 = vadd.f32 %v3989_v43, %v7266_v7 }
0x17ce   :  { %v6841_v49 = vpop.f32.mrf.mxu1 }
0x17cf   :  { %v3996_v50 = vsel %vm346_vm2, %v3990_v46, -inf }
0x17d0   :  { %3997 = vmax.xlane.f32.xlu1 %v3996_v50 }
0x1855   :  { %v3995_v52 = vpop.xlane.xlu0 %3994 }
0x1856   :  { %v3999_v53 = vsub.f32 %v3914_v39, %v3995_v52 }
0x1858   :  { %v4001_v55 = vmul.f32 1.442695, %v3999_v53 }
0x1859   :  { %v3998_v54 = vpop.xlane.xlu1 %3997 }
0x185a   :  { %7066 = vpow2.f32 %v4001_v55  ;;  %v4000_v38 = vsub.f32 %v3990_v46, %v3998_v54 }
0x185c   :  { %v4003_v57 = vmul.f32 1.442695, %v4000_v38 }
0x185e   :  { %7068 = vpow2.f32 %v4003_v57 }
0x1867   :  { %v7067_v58 = vpop.eup %7066 }
0x1868   :  { %v4005_v56 = vsel %vm346_vm2, %v7067_v58, 0.0 }
0x1869   :  { %4006 = vadd.xlane.f32.xlu0 %v4005_v56 }
0x186b   :  { %v7069_v61 = vpop.eup %7068 }
0x186c   :  { %v4008_v62 = vsel %vm346_vm2, %v7069_v61, 0.0 }
0x186d   :  { %4009 = vadd.xlane.f32.xlu1 %v4008_v62 }
0x18f2   :  { %v4007_v63 = vpop.xlane.xlu0 %4006 }
0x18f3   :  { %7070 = vrcp.f32 %v4007_v63 }
0x18f6   :  { %v4010_v0 = vpop.xlane.xlu1 %4009 }
0x18f7   :  { %7072 = vrcp.f32 %v4010_v0 }
0x1900   :  { %v7071_v1 = vpop.eup %7070 }
0x1901   :  { %v4013_v3 = vmul.f32 %v7071_v1, %v7067_v58 }
0x1903   :  { %6845 = vmatmul.mubr.msk.f32.vlgmr.msra.gmra.mxu0 %vm346_vm2, %v4013_v3  ;;  %v6175_v3 = vld [vmem:[%s8114_s2 + $0x130] sm:$0xff] }
0x1904   :  { %v7073_v41 = vpop.eup %7072  ;;  %6853 = vmatpush3.msra.mxu0 %v4161_v11  ;;  %v6174_v11 = vld [vmem:[%s8114_s2 + $0x128] sm:$0xff] }
0x1905   :  { %v4014_v2 = vmul.f32 %v7073_v41, %v7069_v61  ;;  %6862 = vmatprep.subr.mxu0 %v6143_v12 }
0x1907   :  { %6850 = vmatmul.mubr.msk.f32.vlgmr.msra.gmra.mxu1 %vm346_vm2, %v4014_v2 }
0x1908   :  { %6859 = vmatprep.mubr.msk.f32.mxu1 %vm346_vm2, %v7795_v17  ;;  %6858 = vmatpush3.msra.mxu1 %v3585_v4  ;;  %v6153_v17 = vld [vmem:[%s8114_s2 + $0x388] sm:$0xff] }
0x1909   :  { %6873 = vmatprep.subr.mxu1 %v6148_v5 }
0x190b   :  { %6860 = vmatmul.mubr.msk.f32.vlgmr.msra.gmra.mxu1 %vm346_vm2, %v7793_v16 }
0x190c   :  { %6874 = vmatpush3.msra.mxu1 %v6148_v5  ;;  %6881 = vmatprep.mubr.msk.f32.mxu1 %vm46_vm0, %v7682_v19 }
0x190d   :  { %6875 = vmatprep.subr.mxu1 %v6147_v6 }
0x190e   :  { %6876 = vmatpush3.msra.mxu1 %v6147_v6 }
0x190f   :  { %6877 = vmatprep.subr.mxu1 %v6146_v9 }
0x1910   :  { %6878 = vmatpush3.msra.mxu1 %v6146_v9 }
0x1911   :  { %6879 = vmatprep.subr.mxu1 %v6145_v10 }
0x1912   :  { %6880 = vmatpush3.msra.mxu1 %v6145_v10 }
0x1913   :  { %6882 = vmatmul.mubr.msk.f32.vlgmr.msra.gmra.mxu1 %vm46_vm0, %v7684_v20  ;;  %6895 = vmatprep.subr.mxu1 %v7120_v45 }
0x1914   :  { %6897 = vmatprep.mubr.msk.f32.mxu1 %vm7121_vm1, %v7120_v45 }
0x19c3   :  { %v4084_v13 = vpop.f32.mrf.mxu0 }
0x19c4   :  { %6854 = vmatprep.mubr.msk.f32.mxu0 %vm346_vm2, %v4084_v13  ;;  %v6172_v13 = vld [vmem:[%s8114_s2 + $0x118] sm:$0xff] }
0x19c5   :  { %v6846_v48 = vpop.f32.mrf.mxu0 }
0x19c6   :  { %v6185_v48 = vld [vmem:[%s8114_s2 + $0x3b0] sm:$0xff] }
0x19c7   :  { %v4157_v59 = vpop.f32.mrf.mxu1 }
0x19c8   :  { %6855 = vmatmul.mubr.msk.f32.vlgmr.msra.gmra.mxu0 %vm346_vm2, %v4157_v59  ;;  %v6184_v59 = vld [vmem:[%s8114_s2 + $0x3a8] sm:$0xff] }
0x19c9   :  { %6863 = vmatpush3.msra.mxu0 %v6143_v12  ;;  %v6851_v60 = vpop.f32.mrf.mxu1  ;;  %6870 = vmatprep.mubr.msk.f32.mxu0 %vm46_vm0, %v7682_v19  ;;  %v6173_v12 = vld [vmem:[%s8114_s2 + $0x120] sm:$0xff] }
0x19ca   :  { %6864 = vmatprep.subr.mxu0 %v6142_v51  ;;  %v6182_v60 = vld [vmem:[%s8114_s2 + $0x398] sm:$0xff] }
0x19cb   :  { %6865 = vmatpush3.msra.mxu0 %v6142_v51  ;;  %v7869_v16 = vpop.f32.mrf.mxu1  ;;  %v6183_v51 = vld [vmem:[%s8114_s2 + $0x3a0] sm:$0xff] }
0x19cc   :  { %6866 = vmatprep.subr.mxu0 %v6141_v14 }
0x19cd   :  { %6867 = vmatpush3.msra.mxu0 %v6141_v14  ;;  %v7879_v21 = vpop.f32.mrf.mxu1  ;;  %v4899_v14 = vld [vmem:[%s8116_s4 + $0x30] sm:$0xff] }
0x19ce   :  { %6868 = vmatprep.subr.mxu0 %v6140_v15 }
0x19cf   :  { %6869 = vmatpush3.msra.mxu0 %v6140_v15  ;;  %v6180_v15 = vld [vmem:[%s8114_s2 + $0x270] sm:$0xff] }
0x19d0   :  { %6871 = vmatmul.mubr.msk.f32.vlgmr.msra.gmra.mxu0 %vm46_vm0, %v7684_v20  ;;  %6884 = vmatprep.subr.mxu0 %v6153_v17 }
0x19d1   :  { %6885 = vmatpush3.msra.mxu0 %v6153_v17  ;;  %6892 = vmatprep.mubr.msk.f32.mxu0 %vm46_vm0, %v7682_v19 }
0x19d2   :  { %6886 = vmatprep.subr.mxu0 %v6152_v18 }
0x19d3   :  { %v6883_v24 = vpop.f32.mrf.mxu1  ;;  %6887 = vmatpush3.msra.mxu0 %v6152_v18 }
0x19d4   :  { %v4497_v26 = vadd.f32 %v6883_v24, %v6158_v22  ;;  %6888 = vmatprep.subr.mxu0 %v6151_v23 }
0x19d5   :  { %v4491_v27 = vpop.f32.mrf.mxu1  ;;  %6889 = vmatpush3.msra.mxu0 %v6151_v23  ;;  %v6179_v23 = vld [vmem:[%s8114_s2 + $0x268] sm:$0xff] }
0x19d6   :  { %v4492_v28 = vadd.f32 %v6158_v22, %v4491_v27  ;;  %6890 = vmatprep.subr.mxu0 %v6150_v25 }
0x19d7   :  { %6891 = vmatpush3.msra.mxu0 %v6150_v25  ;;  %v6178_v25 = vld [vmem:[%s8114_s2 + $0x260] sm:$0xff] }
0x19d8   :  { %6893 = vmatmul.mubr.msk.f32.vlgmr.msra.gmra.mxu0 %vm46_vm0, %v7684_v20  ;;  %6896 = vmatpush3.xpose.msk.msra.mxu1 %vm346_vm2, %v4492_v28  ;;  %v6193_v28 = vld [vmem:[%s8114_s2 + $0x3b8] ss:$0 sm:$0xff] }
0x19d9   :  { %6900 = vmatprep.subr.mxu1 %v7120_v45  ;;  %6905 = vmatprep.subr.mxu0 %v7120_v45 }
0x19da   :  { %6907 = vmatprep.mubr.msk.f32.mxu0 %vm7121_vm1, %v7120_v45 }
0x1a88   :  { %v7899_v29 = vpop.f32.mrf.mxu0 }
0x1a8a   :  { %v7901_v30 = vpop.f32.mrf.mxu0 }
0x1a90   :  { %v6872_v31 = vpop.f32.mrf.mxu0 }
0x1a91   :  { %v4418_v36 = vadd.f32 %v6872_v31, %v6155_v32 }
0x1a92   :  { %v4412_v33 = vpop.f32.mrf.mxu0 }
0x1a93   :  { %v4413_v34 = vadd.f32 %v6155_v32, %v4412_v33 }
0x1a95   :  { %6898 = vmatmul.mubr.msk.f32.vlgmr.msra.gmra.mxu1 %vm346_vm2, %v4413_v34 }
0x1a96   :  { %6901 = vmatpush3.xpose.msk.msra.mxu1 %vm346_vm2, %v4497_v26  ;;  %6902 = vmatprep.mubr.msk.f32.mxu1 %vm7121_vm1, %v7120_v45  ;;  %v6177_v26 = vld [vmem:[%s8114_s2 + $0x258] sm:$0xff] }
0x1a97   :  { %6910 = vmatprep.subr.mxu1 %v7120_v45 }
0x1a98   :  { %v6894_v37 = vpop.f32.mrf.mxu0 }
0x1a99   :  { %v4576_v39 = vadd.f32 %v6894_v37, %v6161_v35  ;;  %6903 = vmatmul.mubr.msk.f32.vlgmr.msra.gmra.mxu1 %vm346_vm2, %v4418_v36  ;;  %v4316_v36 = vadd.f32 %v7879_v21, %v7901_v30 }
0x1a9a   :  { %v4570_v40 = vpop.f32.mrf.mxu0  ;;  %6912 = vmatprep.mubr.msk.f32.mxu1 %vm7121_vm1, %v7120_v45 }
0x1a9b   :  { %v4571_v42 = vadd.f32 %v6161_v35, %v4570_v40  ;;  %6911 = vmatpush3.msra.mxu1 %v4576_v39  ;;  %v4321_v35 = vadd.f32 %v7869_v16, %v7899_v29  ;;  %v6187_v16 = vld [vmem:[%s8114_s2 + $0x138] ss:$0 sm:$0xff] }
0x1a9c   :  { %6920 = vmatprep.subr.mxu1 %v6175_v3 }
0x1a9d   :  { %6906 = vmatpush3.msra.mxu0 %v4571_v42 }
0x1a9e   :  { %6915 = vmatprep.subr.mxu0 %v4899_v14 }
0x1b55   :  { %v4651_v43 = vpop.f32.mrf.mxu1 }
0x1b56   :  { %v4652_v46 = vadd.f32 %v4651_v43, %v7268_v8  ;;  %v6190_v43 = vld [vmem:[%s8114_s2 + $0x278] ss:$0 sm:$0xff] }
0x1b57   :  { %v6899_v49 = vpop.f32.mrf.mxu1 }
0x1b58   :  { %v4731_v50 = vsel %vm346_vm2, %v4652_v46, -inf }
0x1b59   :  { %4732 = vmax.xlane.f32.xlu0 %v4731_v50  ;;  %v4727_v52 = vpop.f32.mrf.mxu1 }
0x1b5a   :  { %v4728_v53 = vadd.f32 %v4727_v52, %v7266_v7 }
0x1b5b   :  { %v6904_v55 = vpop.f32.mrf.mxu1 }
0x1b5c   :  { %v4734_v54 = vsel %vm346_vm2, %v4728_v53, -inf }
0x1b5d   :  { %4735 = vmax.xlane.f32.xlu1 %v4734_v54 }
0x1be2   :  { %v4733_v38 = vpop.xlane.xlu0 %4732 }
0x1be3   :  { %v4737_v57 = vsub.f32 %v4652_v46, %v4733_v38 }
0x1be5   :  { %v4739_v58 = vmul.f32 1.442695, %v4737_v57 }
0x1be6   :  { %v4736_v56 = vpop.xlane.xlu1 %4735 }
0x1be7   :  { %7074 = vpow2.f32 %v4739_v58  ;;  %v4738_v61 = vsub.f32 %v4728_v53, %v4736_v56 }
0x1be9   :  { %v4741_v62 = vmul.f32 1.442695, %v4738_v61 }
0x1beb   :  { %7076 = vpow2.f32 %v4741_v62 }
0x1bf4   :  { %v7075_v4 = vpop.eup %7074 }
0x1bf5   :  { %v4743_v63 = vsel %vm346_vm2, %v7075_v4, 0.0 }
0x1bf6   :  { %4744 = vadd.xlane.f32.xlu0 %v4743_v63 }
0x1bf8   :  { %v7077_v0 = vpop.eup %7076 }
0x1bf9   :  { %v4746_v1 = vsel %vm346_vm2, %v7077_v0, 0.0 }
0x1bfa   :  { %4747 = vadd.xlane.f32.xlu1 %v4746_v1 }
0x1c7f   :  { %v4745_v41 = vpop.xlane.xlu0 %4744 }
0x1c80   :  { %7078 = vrcp.f32 %v4745_v41 }
0x1c83   :  { %v4748_v2 = vpop.xlane.xlu1 %4747 }
0x1c84   :  { %7080 = vrcp.f32 %v4748_v2 }
0x1c8d   :  { %v7079_v5 = vpop.eup %7078 }
0x1c8e   :  { %v4751_v6 = vmul.f32 %v7079_v5, %v7075_v4 }
0x1c90   :  { %6908 = vmatmul.mubr.msk.f32.vlgmr.msra.gmra.mxu0 %vm346_vm2, %v4751_v6 }
0x1c91   :  { %v7081_v9 = vpop.eup %7080  ;;  %6916 = vmatpush3.msra.mxu0 %v4899_v14 }
0x1c92   :  { %v4752_v10 = vmul.f32 %v7081_v9, %v7077_v0  ;;  %6931 = vmatprep.subr.mxu0 %v6180_v15 }
0x1c94   :  { %6913 = vmatmul.mubr.msk.f32.vlgmr.msra.gmra.mxu1 %vm346_vm2, %v4752_v10  ;;  %v5558_v10 = vld [vmem:[%s8116_s4 + $0x38] sm:$0xff] }
0x1c95   :  { %6921 = vmatpush3.msra.mxu1 %v6175_v3  ;;  %6928 = vmatprep.mubr.msk.f32.mxu1 %vm46_vm0, %v7682_v19 }
0x1c96   :  { %6922 = vmatprep.subr.mxu1 %v6174_v11 }
0x1c97   :  { %6923 = vmatpush3.msra.mxu1 %v6174_v11 }
0x1c98   :  { %6924 = vmatprep.subr.mxu1 %v6173_v12 }
0x1c99   :  { %6925 = vmatpush3.msra.mxu1 %v6173_v12 }
0x1c9a   :  { %6926 = vmatprep.subr.mxu1 %v6172_v13 }
0x1c9b   :  { %6927 = vmatpush3.msra.mxu1 %v6172_v13 }
0x1c9c   :  { %6929 = vmatmul.mubr.msk.f32.vlgmr.msra.gmra.mxu1 %vm46_vm0, %v7684_v20  ;;  %6942 = vmatprep.subr.mxu1 %v6185_v48 }
0x1c9d   :  { %6943 = vmatpush3.msra.mxu1 %v6185_v48  ;;  %6950 = vmatprep.mubr.msk.f32.mxu1 %vm46_vm0, %v7682_v19 }
0x1c9e   :  { %6944 = vmatprep.subr.mxu1 %v6184_v59 }
0x1c9f   :  { %6945 = vmatpush3.msra.mxu1 %v6184_v59 }
0x1ca0   :  { %6946 = vmatprep.subr.mxu1 %v6183_v51 }
0x1ca1   :  { %6947 = vmatpush3.msra.mxu1 %v6183_v51 }
0x1ca2   :  { %6948 = vmatprep.subr.mxu1 %v6182_v60 }
0x1ca3   :  { %6949 = vmatpush3.msra.mxu1 %v6182_v60  ;;  %v6204_v60 = vld [vmem:[%s8116_s4 + $0xd1] ss:$0 sm:$0xff] }
0x1ca4   :  { %6951 = vmatmul.mubr.msk.f32.vlgmr.msra.gmra.mxu1 %vm46_vm0, %v7684_v20  ;;  %6963 = vmatprep.subr.mxu1 %v7120_v45 }
0x1ca5   :  { %6965 = vmatprep.mubr.msk.f32.mxu1 %vm7121_vm1, %v7120_v45 }
0x1d50   :  { %v4822_v17 = vpop.f32.mrf.mxu0 }
0x1d51   :  { %6917 = vmatprep.mubr.msk.f32.mxu0 %vm346_vm2, %v4822_v17 }
0x1d52   :  { %v6909_v18 = vpop.f32.mrf.mxu0 }
0x1d54   :  { %v4895_v22 = vpop.f32.mrf.mxu1 }
0x1d55   :  { %6918 = vmatmul.mubr.msk.f32.vlgmr.msra.gmra.mxu0 %vm346_vm2, %v4895_v22 }
0x1d56   :  { %6932 = vmatpush3.msra.mxu0 %v6180_v15  ;;  %v6914_v24 = vpop.f32.mrf.mxu1  ;;  %6939 = vmatprep.mubr.msk.f32.mxu0 %vm46_vm0, %v7682_v19 }
0x1d57   :  { %6933 = vmatprep.subr.mxu0 %v6179_v23 }
0x1d58   :  { %6934 = vmatpush3.msra.mxu0 %v6179_v23 }
0x1d59   :  { %6935 = vmatprep.subr.mxu0 %v6178_v25 }
0x1d5a   :  { %6936 = vmatpush3.msra.mxu0 %v6178_v25 }
0x1d5b   :  { %6937 = vmatprep.subr.mxu0 %v6177_v26 }
0x1d5c   :  { %6938 = vmatpush3.msra.mxu0 %v6177_v26  ;;  %v6930_v19 = vpop.f32.mrf.mxu1 }
0x1d5d   :  { %6940 = vmatmul.mubr.msk.f32.vlgmr.msra.gmra.mxu0 %vm46_vm0, %v7684_v20  ;;  %6953 = vmatprep.subr.mxu0 %v7120_v45  ;;  %v5077_v30 = vadd.f32 %v6930_v19, %v6187_v16 }
0x1d5e   :  { %6955 = vmatprep.mubr.msk.f32.mxu0 %vm7121_vm1, %v7120_v45  ;;  %v5071_v27 = vpop.f32.mrf.mxu1 }
0x1d5f   :  { %v5072_v29 = vadd.f32 %v6187_v16, %v5071_v27 }
0x1d64   :  { %v6952_v31 = vpop.f32.mrf.mxu1 }
0x1d65   :  { %v5235_v32 = vadd.f32 %v6952_v31, %v6193_v28 }
0x1d66   :  { %v5229_v33 = vpop.f32.mrf.mxu1 }
0x1d67   :  { %v5230_v34 = vadd.f32 %v6193_v28, %v5229_v33 }
0x1d69   :  { %6964 = vmatpush3.msra.mxu1 %v5230_v34 }
0x1d6a   :  { %6973 = vmatprep.subr.mxu1 %v5558_v10 }
0x1e15   :  { %v6919_v20 = vpop.f32.mrf.mxu0 }
0x1e16   :  { %v7991_v37 = vadd.f32 %v6919_v20, %v4321_v35  ;;  %v6210_v35 = vld [vmem:[%s8115_s3 + $0x40] sm:$0xff]  ;;  %v6209_v20 = vld [vmem:[%s8115_s3 + $0x38] sm:$0xff] }
0x1e17   :  { %v4972_v39 = vpop.f32.mrf.mxu0 }
0x1e18   :  { %v7993_v40 = vadd.f32 %v4972_v39, %v4316_v36  ;;  %v6208_v36 = vld [vmem:[%s8115_s3 + $0x30] sm:$0xff]  ;;  %v5791_v39 = vld [vmem:[%s8116_s4 + $0xb8] sm:$0xff] }
0x1e1d   :  { %v6941_v42 = vpop.f32.mrf.mxu0 }
0x1e1e   :  { %v5156_v21 = vadd.f32 %v6941_v42, %v6190_v43  ;;  %v5789_v42 = vld [vmem:[%s8116_s4 + $0xa8] sm:$0xff] }
0x1e1f   :  { %v5150_v46 = vpop.f32.mrf.mxu0 }
0x1e20   :  { %v5151_v49 = vadd.f32 %v6190_v43, %v5150_v46  ;;  %v5788_v43 = vld [vmem:[%s8116_s4 + $0xa0] sm:$0xff] }
0x1e22   :  { %6954 = vmatpush3.xpose.msk.msra.mxu0 %vm346_vm2, %v5151_v49 }
0x1e23   :  { %6958 = vmatprep.subr.mxu0 %v7120_v45 }
0x1e25   :  { %6956 = vmatmul.mubr.msk.f32.vlgmr.msra.gmra.mxu0 %vm346_vm2, %v5072_v29 }
0x1e26   :  { %6959 = vmatpush3.xpose.msk.msra.mxu0 %vm346_vm2, %v5156_v21  ;;  %6960 = vmatprep.mubr.msk.f32.mxu0 %vm7121_vm1, %v7120_v45 }
0x1e27   :  { %6968 = vmatprep.subr.mxu0 %v7120_v45 }
0x1e29   :  { %6961 = vmatmul.mubr.msk.f32.vlgmr.msra.gmra.mxu0 %vm346_vm2, %v5077_v30 }
0x1e2a   :  { %6969 = vmatpush3.msra.mxu0 %v5235_v32  ;;  %6970 = vmatprep.mubr.msk.f32.mxu0 %vm7121_vm1, %v7120_v45 }
0x1e2b   :  { %6978 = vmatprep.subr.mxu0 %v6210_v35 }
0x1ee5   :  { %v5310_v50 = vpop.f32.mrf.mxu0 }
0x1ee6   :  { %v5311_v52 = vadd.f32 %v5310_v50, %v7268_v8 }
0x1ee7   :  { %v6957_v53 = vpop.f32.mrf.mxu0 }
0x1ee8   :  { %v5390_v55 = vsel %vm346_vm2, %v5311_v52, -inf }
0x1ee9   :  { %5391 = vmax.xlane.f32.xlu0 %v5390_v55  ;;  %v5386_v54 = vpop.f32.mrf.mxu0 }
0x1eea   :  { %v5387_v38 = vadd.f32 %v5386_v54, %v7266_v7 }
0x1eeb   :  { %v6962_v57 = vpop.f32.mrf.mxu0 }
0x1eec   :  { %v5393_v58 = vsel %vm346_vm2, %v5387_v38, -inf  ;;  %v6206_v57 = vld [vmem:[%s8116_s4 + $0xcf] ss:$0 sm:$0xff] }
0x1eed   :  { %5394 = vmax.xlane.f32.xlu1 %v5393_v58 }
0x1f72   :  { %v5392_v56 = vpop.xlane.xlu0 %5391 }
0x1f73   :  { %v5396_v61 = vsub.f32 %v5311_v52, %v5392_v56  ;;  %v6205_v52 = vld [vmem:[%s8116_s4 + $0xcd] ss:$0 sm:$0xff] }
0x1f75   :  { %v5398_v62 = vmul.f32 1.442695, %v5396_v61 }
0x1f76   :  { %v5395_v4 = vpop.xlane.xlu1 %5394 }
0x1f77   :  { %7082 = vpow2.f32 %v5398_v62  ;;  %v5397_v45 = vsub.f32 %v5387_v38, %v5395_v4  ;;  %v5787_v62 = vld [vmem:[%s8116_s4 + $0x98] sm:$0xff]  ;;  %v5786_v4 = vld [vmem:[%s8116_s4 + $0x90] sm:$0xff] }
0x1f79   :  { %v5400_v63 = vmul.f32 1.442695, %v5397_v45  ;;  %v5785_v45 = vld [vmem:[%s8116_s4 + $0x88] sm:$0xff] }
0x1f7b   :  { %7084 = vpow2.f32 %v5400_v63  ;;  %v5784_v63 = vld [vmem:[%s8116_s4 + $0x80] sm:$0xff] }
0x1f84   :  { %v7083_v8 = vpop.eup %7082 }
0x1f85   :  { %v5402_v0 = vsel %vm346_vm2, %v7083_v8, 0.0 }
0x1f86   :  { %5403 = vadd.xlane.f32.xlu0 %v5402_v0 }
0x1f88   :  { %v7085_v1 = vpop.eup %7084 }
0x1f89   :  { %v5405_v3 = vsel %vm346_vm2, %v7085_v1, 0.0 }
0x1f8a   :  { %5406 = vadd.xlane.f32.xlu1 %v5405_v3 }
0x200f   :  { %v5404_v7 = vpop.xlane.xlu0 %5403 }
0x2010   :  { %7086 = vrcp.f32 %v5404_v7 }
0x2013   :  { %v5407_v41 = vpop.xlane.xlu1 %5406 }
0x2014   :  { %7088 = vrcp.f32 %v5407_v41 }
0x201d   :  { %v7087_v2 = vpop.eup %7086 }
0x201e   :  { %v5410_v5 = vmul.f32 %v7087_v2, %v7083_v8  ;;  %v6212_v8 = vld [vmem:[%s8115_s3 + $0x48] ss:$0 sm:$0xff] }
0x2020   :  { %6966 = vmatmul.mubr.msk.f32.vlgmr.msra.gmra.mxu1 %vm346_vm2, %v5410_v5 }
0x2021   :  { %v7089_v6 = vpop.eup %7088  ;;  %6974 = vmatpush3.msra.mxu1 %v5558_v10 }
0x2022   :  { %v5411_v9 = vmul.f32 %v7089_v6, %v7085_v1  ;;  %6989 = vmatprep.subr.mxu1 %v5791_v39  ;;  %v6217_v6 = vld [vmem:[%s8116_s4 + $0xd3] ss:$0 sm:$0xff] }
0x2024   :  { %6971 = vmatmul.mubr.msk.f32.vlgmr.msra.gmra.mxu0 %vm346_vm2, %v5411_v9 }
0x2025   :  { %6979 = vmatpush3.msra.mxu0 %v6210_v35  ;;  %v6219_v35 = vld [vmem:[%s8116_s4 + $0xd5] ss:$0 sm:$0xff] }
0x2026   :  { %6980 = vmatprep.subr.mxu0 %v6209_v20 }
0x2027   :  { %6981 = vmatpush3.msra.mxu0 %v6209_v20 }
0x2028   :  { %6982 = vmatprep.subr.mxu0 %v6208_v36 }
0x2029   :  { %6983 = vmatpush3.msra.mxu0 %v6208_v36 }
0x20e0   :  { %v5481_v11 = vpop.f32.mrf.mxu1 }
0x20e1   :  { %6975 = vmatprep.mubr.msk.f32.mxu1 %vm346_vm2, %v5481_v11 }
0x20e2   :  { %v6967_v12 = vpop.f32.mrf.mxu1 }
0x20e4   :  { %v5554_v13 = vpop.f32.mrf.mxu0 }
0x20e5   :  { %6976 = vmatmul.mubr.msk.f32.vlgmr.msra.gmra.mxu1 %vm346_vm2, %v5554_v13 }
0x20e6   :  { %v6972_v48 = vpop.f32.mrf.mxu0  ;;  %6990 = vmatpush3.msra.mxu1 %v5791_v39 }
0x21a5   :  { %v6977_v59 = vpop.f32.mrf.mxu1 }
0x21a6   :  { %v5641_v51 = vadd.f32 %v6977_v59, %v7991_v37  ;;  %v6207_v37 = vld [vmem:[%s8115_s3 + $0x28] sm:$0xff] }
0x21a7   :  { %v5631_v14 = vpop.f32.mrf.mxu1  ;;  %6984 = vmatprep.subr.mxu0 %v6207_v37 }
0x21a8   :  { %v5643_v15 = vadd.f32 %v5641_v51, %v7635_v44  ;;  %v5640_v17 = vadd.f32 %v5631_v14, %v7993_v40  ;;  %6985 = vmatpush3.msra.mxu0 %v6207_v37  ;;  %v5790_v40 = vld [vmem:[%s8116_s4 + $0xb0] sm:$0xff] }
0x21a9   :  { %6991 = vmatprep.subr.mxu1 %v5790_v40 }
0x21aa   :  { %v8030_v18 = vadd.f32 %v6204_v60, %v5643_v15  ;;  %v5642_v22 = vadd.f32 %v5640_v17, %v7638_v47  ;;  %6992 = vmatpush3.msra.mxu1 %v5790_v40 }
0x21ab   :  { %6993 = vmatprep.subr.mxu1 %v5789_v42 }
0x21ac   :  { %v8033_v23 = vadd.f32 %v6204_v60, %v5642_v22  ;;  %v5656_v24 = vsel %vm46_vm0, %v8030_v18, 0.0  ;;  %6994 = vmatpush3.msra.mxu1 %v5789_v42 }
0x21ad   :  { %5657 = vadd.xlane.f32.xlu1 %v5656_v24  ;;  %6995 = vmatprep.subr.mxu1 %v5788_v43 }
0x21ae   :  { %v5653_v25 = vsel %vm46_vm0, %v8033_v23, 0.0  ;;  %6996 = vmatpush3.msra.mxu1 %v5788_v43 }
0x21af   :  { %5654 = vadd.xlane.f32.xlu0 %v5653_v25  ;;  %6997 = vmatprep.subr.mxu1 %v5787_v62 }
0x21b0   :  { %6998 = vmatpush3.msra.mxu1 %v5787_v62 }
0x21b1   :  { %6999 = vmatprep.subr.mxu1 %v5786_v4 }
0x21b2   :  { %7000 = vmatpush3.msra.mxu1 %v5786_v4 }
0x21b3   :  { %7001 = vmatprep.subr.mxu1 %v5785_v45 }
0x21b4   :  { %7002 = vmatpush3.msra.mxu1 %v5785_v45 }
0x21b5   :  { %7003 = vmatprep.subr.mxu1 %v5784_v63 }
0x21b6   :  { %7004 = vmatpush3.msra.mxu1 %v5784_v63 }
0x2236   :  { %v5658_v26 = vpop.xlane.xlu1 %5657 }
0x2237   :  { %v5660_v19 = vmul.f32 0.03125, %v5658_v26 }
0x2238   :  { %v5655_v27 = vpop.xlane.xlu0 %5654 }
0x2239   :  { %v5662_v44 = vsub.f32 %v8030_v18, %v5660_v19  ;;  %v5659_v28 = vmul.f32 0.03125, %v5655_v27 }
0x223b   :  { %v5661_v31 = vsub.f32 %v8033_v23, %v5659_v28  ;;  %v5664_v32 = vmul.f32 %v5662_v44, %v5662_v44 }
0x223d   :  { %v5668_v47 = vsel %vm46_vm0, %v5664_v32, 0.0  ;;  %v5663_v33 = vmul.f32 %v5661_v31, %v5661_v31 }
0x223e   :  { %5669 = vadd.xlane.f32.xlu1 %v5668_v47  ;;  %v6218_v47 = vld [vmem:[%s8116_s4 + $0xd4] ss:$0 sm:$0xff] }
0x223f   :  { %v5665_v34 = vsel %vm46_vm0, %v5663_v33, 0.0 }
0x2240   :  { %5666 = vadd.xlane.f32.xlu0 %v5665_v34 }
0x22c7   :  { %v5670_v46 = vpop.xlane.xlu1 %5669 }
0x22c8   :  { %v5672_v49 = vmul.f32 0.03125, %v5670_v46 }
0x22c9   :  { %v5667_v16 = vpop.xlane.xlu0 %5666 }
0x22ca   :  { %v5674_v29 = vadd.f32 1e-05, %v5672_v49  ;;  %v5671_v21 = vmul.f32 0.03125, %v5667_v16 }
0x22cc   :  { %7090 = vrsqrt.f32 %v5674_v29  ;;  %v5673_v30 = vadd.f32 1e-05, %v5671_v21 }
0x22ce   :  { %7092 = vrsqrt.f32 %v5673_v30 }
0x22d9   :  { %v7091_v50 = vpop.eup %7090 }
0x22da   :  { %v5678_v53 = vmul.f32 %v7091_v50, %v5662_v44 }
0x22db   :  { %v7093_v55 = vpop.eup %7092 }
0x22dc   :  { %v5677_v54 = vmul.f32 %v7093_v55, %v5661_v31  ;;  %v5684_v38 = vmul.f32 %v6205_v52, %v5678_v53 }
0x22de   :  { %v5683_v58 = vmul.f32 %v6205_v52, %v5677_v54  ;;  %v5690_v61 = vadd.f32 %v6206_v57, %v5684_v38 }
0x22e0   :  { %v5689_v56 = vadd.f32 %v6206_v57, %v5683_v58 }
0x22e2   :  { %6986 = vmatprep.mubr.msk.f32.mxu0 %vm46_vm0, %v5689_v56 }
0x22e3   :  { %6987 = vmatmul.mubr.msk.f32.vlgmr.msra.gmra.mxu0 %vm46_vm0, %v5690_v61 }
0x23a3   :  { %v6988_v0 = vpop.f32.mrf.mxu0 }
0x23a4   :  { %v5779_v1 = vadd.f32 %v6988_v0, %v6212_v8 }
0x23a5   :  { %v5773_v3 = vpop.f32.mrf.mxu0 }
0x23a6   :  { %v5774_v7 = vadd.f32 %v6212_v8, %v5773_v3  ;;  %v5783_v2 = vmax.f32 %v5779_v1, 0.0 }
0x23a8   :  { %v5782_v41 = vmax.f32 %v5774_v7, 0.0 }
0x23aa   :  { %7005 = vmatprep.mubr.msk.f32.mxu1 %vm2873_vm5, %v5782_v41 }
0x23ab   :  { %7006 = vmatmul.mubr.msk.f32.vlgmr.msra.gmra.mxu1 %vm2873_vm5, %v5783_v2 }
0x246b   :  { %v7007_v5 = vpop.f32.mrf.mxu1 }
0x246c   :  { %v5874_v9 = vadd.f32 %v7007_v5, %v8030_v18 }
0x246d   :  { %v5864_v10 = vpop.f32.mrf.mxu1 }
0x246e   :  { %v5873_v11 = vadd.f32 %v5864_v10, %v8033_v23  ;;  %v5881_v12 = vadd.f32 %v6217_v6, %v5874_v9 }
0x2470   :  { %v5887_v13 = vsel %vm46_vm0, %v5881_v12, 0.0  ;;  %v5880_v48 = vadd.f32 %v6217_v6, %v5873_v11 }
0x2471   :  { %5888 = vadd.xlane.f32.xlu1 %v5887_v13 }
0x2472   :  { %v5884_v59 = vsel %vm46_vm0, %v5880_v48, 0.0 }
0x2473   :  { %5885 = vadd.xlane.f32.xlu0 %v5884_v59 }
0x24fa   :  { %v5889_v51 = vpop.xlane.xlu1 %5888 }
0x24fb   :  { %v5891_v60 = vmul.f32 0.03125, %v5889_v51 }
0x24fc   :  { %v5886_v14 = vpop.xlane.xlu0 %5885 }
0x24fd   :  { %v5893_v15 = vsub.f32 %v5881_v12, %v5891_v60  ;;  %v5890_v17 = vmul.f32 0.03125, %v5886_v14 }
0x24ff   :  { %v5892_v22 = vsub.f32 %v5880_v48, %v5890_v17  ;;  %v5895_v24 = vmul.f32 %v5893_v15, %v5893_v15 }
0x2501   :  { %v5899_v18 = vsel %vm46_vm0, %v5895_v24, 0.0  ;;  %v5894_v25 = vmul.f32 %v5892_v22, %v5892_v22 }
0x2502   :  { %5900 = vadd.xlane.f32.xlu1 %v5899_v18 }
0x2503   :  { %v5896_v23 = vsel %vm46_vm0, %v5894_v25, 0.0 }
0x2504   :  { %5897 = vadd.xlane.f32.xlu0 %v5896_v23 }
0x258b   :  { %v5901_v26 = vpop.xlane.xlu1 %5900 }
0x258c   :  { %v5903_v19 = vmul.f32 0.03125, %v5901_v26 }
0x258d   :  { %v5898_v27 = vpop.xlane.xlu0 %5897 }
0x258e   :  { %v5905_v44 = vadd.f32 1e-05, %v5903_v19  ;;  %v5902_v28 = vmul.f32 0.03125, %v5898_v27 }
0x2590   :  { %7094 = vrsqrt.f32 %v5905_v44  ;;  %v5904_v31 = vadd.f32 1e-05, %v5902_v28 }
0x2592   :  { %7096 = vrsqrt.f32 %v5904_v31 }
0x259d   :  { %v7095_v32 = vpop.eup %7094 }
0x259e   :  { %v5909_v33 = vmul.f32 %v7095_v32, %v5893_v15 }
0x259f   :  { %v7097_v34 = vpop.eup %7096 }
0x25a0   :  { %v5908_v20 = vmul.f32 %v7097_v34, %v5892_v22  ;;  %v5915_v36 = vmul.f32 %v6218_v47, %v5909_v33 }
0x25a2   :  { %v5914_v37 = vmul.f32 %v6218_v47, %v5908_v20  ;;  %v5921_v39 = vadd.f32 %v6219_v35, %v5915_v36 }
0x25a4   :  { %v5920_v40 = vadd.f32 %v6219_v35, %v5914_v37  ;;  %5923 = vst.msk [vmem:[#allocation2 + $0x8] sm:$0xff] %vm46_vm0, %v5921_v39 }
0x25a6   :  { %5922 = vst.msk [vmem:[#allocation2] sm:$0xff] %vm46_vm0, %v5920_v40 }
0x25a7   :  { %7109 = shalt.err (!%p7106_p4)
}
0x25a8   :  { %s7124_s4 = smov 128   ;;  %s7125_s14 = smov 8  }
0x25a9   :  { %5935 = dma.vmem_to_hbm [thread:$0]  %s5930_s12, 256, %s8117_s5, [#allocation3], %s7124_s4, %s7124_s4, %s7125_s14  }
0x25aa   :  { %7118 = dma.done.wait [#allocation3], 256  }
0x25ab   :  { %7119 = vsyncadd [#allocation3], 4294967040 }
0x25ac   :  { %5939 = vsyncpa [#allocation3], 1 }

</bundles_post_ra>
